<compile_context>
chip_gen: v6e
topology: v6e:2x2x1
jax: 0.10.0
libtpu: 0.0.40
codegen_flags: <defaults>
</compile_context>

<pallas_src>
import functools

import jax
import jax.numpy as jnp
from jax.experimental import pallas as pl
from jax.experimental.pallas import tpu as pltpu


def _round_up(x, m):
    return ((x + m - 1) // m) * m


# -----------------------------------------------------------------------------
# Pallas kernel: one grid step = one batch element x one TT-row tile of points,
# pushed through all S latent rows, all resnet blocks and lin_out.
# -----------------------------------------------------------------------------
def _resnet_fc_kernel(pts_ref, z_ref, w0_ref, b0_ref, w1_ref, b1_ref,
                      wout_ref, bout_ref, out_ref, *, n_blocks, n_src):
    # pts_ref : (1, TT, 1)          f32  query coordinates (in_size == 1)
    # z_ref   : (S*n_blocks, 1, H)  f32  precomputed lin_z(features)+bias for this batch elem
    # w*_ref  : bf16 weights (constant index_map -> fetched once, resident in VMEM)
    # b*_ref  : f32 biases
    # out_ref : (1, TT, S*G)        f32  lane-dense output tile
    pts = pts_ref[0]                       # (TT, 1)
    wout = wout_ref[...]                   # (H, G) bf16
    bout = bout_ref[...]                   # (1, G) f32

    outs = []
    for s in range(n_src):                 # S (source views) is small -> static unroll
        x = pts                            # (TT, 1); broadcasts to (TT, H) on first add
        for k in range(n_blocks):          # static unroll over resnet blocks
            x = x + z_ref[s * n_blocks + k]                     # (TT, H), z hoisted out of T loop
            h = jnp.dot(jax.nn.relu(x).astype(jnp.bfloat16), w0_ref[k],
                        preferred_element_type=jnp.float32) + b0_ref[k]
            dx = jnp.dot(jax.nn.relu(h).astype(jnp.bfloat16), w1_ref[k],
                         preferred_element_type=jnp.float32) + b1_ref[k]
            x = x + dx                                          # identity shortcut (d_in == d_out)
        o = jnp.dot(jax.nn.relu(x).astype(jnp.bfloat16), wout,
                    preferred_element_type=jnp.float32) + bout  # (TT, G)
        outs.append(o)

    # Pack all S outputs along lanes -> one dense (TT, S*G) store per grid step.
    out_ref[0] = jnp.concatenate(outs, axis=-1).astype(out_ref.dtype)


# -----------------------------------------------------------------------------
# Wrapper
# -----------------------------------------------------------------------------
def resnet_fc_forward(features, points, params, *, tile_t=512):
    """features: (B, S, D), points: (B, T, 1) -> (B, T, S, G)."""
    B, T, in_size = points.shape
    _, S, D = features.shape
    n_blocks, _, H = params["wz"].shape
    G = params["wout"].shape[1]
    assert in_size == 1, "kernel implements the default in_size=1 broadcast semantics"
    assert features.shape[0] == B

    # ---- T tiling with remainder handling (pad T up to a multiple of the 8-aligned tile) ----
    TT = min(tile_t, _round_up(T, 8))
    T_pad = _round_up(T, TT)
    n_t = T_pad // TT
    pts = points.astype(jnp.float32)
    if T_pad != T:
        pts = jnp.pad(pts, ((0, 0), (0, T_pad - T), (0, 0)))

    # ---- bf16 matmul operands (f32 accumulation happens inside the kernel) ----
    wz = params["wz"].astype(jnp.bfloat16)
    w0 = params["w0"].astype(jnp.bfloat16)
    w1 = params["w1"].astype(jnp.bfloat16)
    wout = params["wout"].astype(jnp.bfloat16)
    b0 = params["b0"].astype(jnp.float32)
    b1 = params["b1"].astype(jnp.float32)
    bout = params["bout"].astype(jnp.float32)

    # ---- hoist lin_z out of the per-point hot loop: z depends only on (b, s, block) ----
    # Tiny pre-pass (no T factor). Stored as (B*S*n_blocks, 1, H) so the kernel reads
    # z_ref[s*n_blocks + k] -> (1, H).
    z = jnp.einsum("bsd,kdh->bskh", features.astype(jnp.bfloat16), wz,
                   preferred_element_type=jnp.float32)
    z = z + params["bz"][:, 0, :][None, None]            # (B, S, n_blocks, H), f32
    z = z.reshape(B * S * n_blocks, 1, H)

    kernel = functools.partial(_resnet_fc_kernel, n_blocks=n_blocks, n_src=S)

    # Advisory cost estimate for XLA's scheduler.
    flops = 2 * B * T_pad * S * (n_blocks * 2 * H * H + H * G)
    bytes_accessed = (4 * pts.size                         # points (read once per tile)
                      + 4 * z.size * n_t                   # z block re-read per T tile
                      + 2 * (w0.size + w1.size + wout.size)  # bf16 weights (fetched once)
                      + 4 * (b0.size + b1.size + bout.size)
                      + 4 * B * T_pad * S * G)             # output writes

    out = pl.pallas_call(
        kernel,
        out_shape=jax.ShapeDtypeStruct((B, T_pad, S * G), jnp.float32),
        grid=(B, n_t),
        in_specs=[
            pl.BlockSpec((1, TT, 1), lambda b, t: (b, t, 0)),             # points tile
            pl.BlockSpec((S * n_blocks, 1, H), lambda b, t: (b, 0, 0)),   # per-batch z
            pl.BlockSpec((n_blocks, H, H), lambda b, t: (0, 0, 0)),       # fc_0 weights
            pl.BlockSpec((n_blocks, 1, H), lambda b, t: (0, 0, 0)),       # fc_0 biases
            pl.BlockSpec((n_blocks, H, H), lambda b, t: (0, 0, 0)),       # fc_1 weights
            pl.BlockSpec((n_blocks, 1, H), lambda b, t: (0, 0, 0)),       # fc_1 biases
            pl.BlockSpec((H, G), lambda b, t: (0, 0)),                    # lin_out weight
            pl.BlockSpec((1, G), lambda b, t: (0, 0)),                    # lin_out bias
        ],
        out_specs=pl.BlockSpec((1, TT, S * G), lambda b, t: (b, t, 0)),   # lane-dense output
        compiler_params=pltpu.CompilerParams(
            dimension_semantics=("parallel", "parallel"),   # no carried state -> shard on v7x
            vmem_limit_bytes=64 * 1024 * 1024,              # raise v5e/v6e default; fits v7x
        ),
        cost_estimate=pl.CostEstimate(flops=flops, transcendentals=0,
                                      bytes_accessed=bytes_accessed),
    )(pts, z, w0, b0, w1, b1, wout, bout)

    # Drop T padding; trailing split (S*G -> S, G) is a free reshape.
    return out[:, :T].reshape(B, T, S, G)


# -----------------------------------------------------------------------------
# Pure-JAX f32 reference (mirrors the PyTorch forward exactly) for validation.
# -----------------------------------------------------------------------------
def resnet_fc_reference(features, points, params):
    n_blocks = params["wz"].shape[0]
    x = points[:, :, None, :]                             # (B, T, 1, in_size)
    for k in range(n_blocks):
        z = features @ params["wz"][k] + params["bz"][k]  # (B, S, H)
        x = x + z[:, None, :, :]                          # (B, T, S, H)
        h = jax.nn.relu(x) @ params["w0"][k] + params["b0"][k]
        dx = jax.nn.relu(h) @ params["w1"][k] + params["b1"][k]
        x = x + dx
    x = jax.nn.relu(x)
    return x @ params["wout"] + params["bout"]


# -----------------------------------------------------------------------------
# Deterministic parameter construction (shapes follow ResnetFC.__init__).
# -----------------------------------------------------------------------------
def make_params(key, *, hidden_size, out_size, feature_size, n_blocks):
    ks = jax.random.split(key, 9)
    scale = 0.1
    return {
        "wz": scale * jax.random.normal(ks[0], (n_blocks, feature_size, hidden_size), jnp.float32),
        "bz": scale * jax.random.normal(ks[1], (n_blocks, 1, hidden_size), jnp.float32),
        "w0": scale * jax.random.normal(ks[2], (n_blocks, hidden_size, hidden_size), jnp.float32),
        "b0": scale * jax.random.normal(ks[3], (n_blocks, 1, hidden_size), jnp.float32),
        "w1": scale * jax.random.normal(ks[4], (n_blocks, hidden_size, hidden_size), jnp.float32),
        "b1": scale * jax.random.normal(ks[5], (n_blocks, 1, hidden_size), jnp.float32),
        "wout": scale * jax.random.normal(ks[6], (hidden_size, out_size), jnp.float32),
        "bout": scale * jax.random.normal(ks[7], (1, out_size), jnp.float32),
    }


if __name__ == "__main__":
    # Small shapes consistent with the module (in_size=1 default; S = number of source views).
    B, T, S = 2, 16, 8
    in_size, hidden_size, out_size, feature_size, n_blocks = 1, 32, 16, 32, 3

    key = jax.random.PRNGKey(0)
    k_feat, k_pts, k_par = jax.random.split(key, 3)

    features = jax.random.normal(k_feat, (B, S, feature_size), jnp.float32)
    points = jax.random.normal(k_pts, (B, T, in_size), jnp.float32)
    params = make_params(k_par, hidden_size=hidden_size, out_size=out_size,
                         feature_size=feature_size, n_blocks=n_blocks)

    out = resnet_fc_forward(features, points, params)
    out = jax.block_until_ready(out)

    ref = resnet_fc_reference(features, points, params)
    assert out.shape == (B, T, S, out_size)
    # bf16 matmul operands with f32 accumulation -> relaxed tolerance vs the f32 reference.
    assert jnp.allclose(out, ref, atol=5e-2, rtol=5e-2), "Pallas output mismatch vs reference"

    print("KERNEL_OK")
</pallas_src>

<mosaic_0001>
module attributes {stable_mosaic.version = 11 : i64} {
  func.func @_resnet_fc_kernel(%arg0: i32, %arg1: i32, %arg2: memref<1x16x1xf32, #tpu.memory_space<vmem>>, %arg3: memref<24x1x32xf32, #tpu.memory_space<vmem>>, %arg4: memref<3x32x32xbf16, #tpu.memory_space<vmem>>, %arg5: memref<3x1x32xf32, #tpu.memory_space<vmem>>, %arg6: memref<3x32x32xbf16, #tpu.memory_space<vmem>>, %arg7: memref<3x1x32xf32, #tpu.memory_space<vmem>>, %arg8: memref<32x16xbf16, #tpu.memory_space<vmem>>, %arg9: memref<1x16xf32, #tpu.memory_space<vmem>>, %arg10: memref<1x16x128xf32, #tpu.memory_space<vmem>>) attributes {dimension_semantics = [#tpu.dimension_semantics<parallel>, #tpu.dimension_semantics<parallel>], iteration_bounds = array<i64: 2, 1>, scalar_prefetch = 0 : i64, scratch_operands = 0 : i64, tpu.core_type = #tpu.core_type<tc>, window_params = [{transform_indices = @transform_0, window_bounds = array<i64: 1, 16, 1>}, {transform_indices = @transform_1, window_bounds = array<i64: 24, 1, 32>}, {pipeline_mode = #tpu.pipeline_mode<synchronous>, transform_indices = @transform_2, window_bounds = array<i64: 3, 32, 32>}, {pipeline_mode = #tpu.pipeline_mode<synchronous>, transform_indices = @transform_3, window_bounds = array<i64: 3, 1, 32>}, {pipeline_mode = #tpu.pipeline_mode<synchronous>, transform_indices = @transform_4, window_bounds = array<i64: 3, 32, 32>}, {pipeline_mode = #tpu.pipeline_mode<synchronous>, transform_indices = @transform_5, window_bounds = array<i64: 3, 1, 32>}, {pipeline_mode = #tpu.pipeline_mode<synchronous>, transform_indices = @transform_6, window_bounds = array<i64: 32, 16>}, {pipeline_mode = #tpu.pipeline_mode<synchronous>, transform_indices = @transform_7, window_bounds = array<i64: 1, 16>}, {transform_indices = @transform_8, window_bounds = array<i64: 1, 16, 128>}]} {
    %c0 = arith.constant 0 : index
    %c0_0 = arith.constant 0 : index
    %c0_1 = arith.constant 0 : index
    %0 = vector.load %arg2[%c0, %c0_0, %c0_1] : memref<1x16x1xf32, #tpu.memory_space<vmem>>, vector<1x16x1xf32>
    %1 = vector.shape_cast %0 : vector<1x16x1xf32> to vector<16x1xf32>
    %c0_2 = arith.constant 0 : index
    %c0_3 = arith.constant 0 : index
    %2 = vector.load %arg8[%c0_2, %c0_3] : memref<32x16xbf16, #tpu.memory_space<vmem>>, vector<32x16xbf16>
    %c0_4 = arith.constant 0 : index
    %c0_5 = arith.constant 0 : index
    %3 = vector.load %arg9[%c0_4, %c0_5] : memref<1x16xf32, #tpu.memory_space<vmem>>, vector<1x16xf32>
    %c0_6 = arith.constant 0 : index
    %c0_7 = arith.constant 0 : index
    %c0_8 = arith.constant 0 : index
    %4 = vector.load %arg3[%c0_6, %c0_7, %c0_8] : memref<24x1x32xf32, #tpu.memory_space<vmem>>, vector<1x1x32xf32>
    %5 = vector.shape_cast %4 : vector<1x1x32xf32> to vector<1x32xf32>
    %6 = vector.broadcast %1 : vector<16x1xf32> to vector<16x32xf32>
    %7 = vector.broadcast %5 : vector<1x32xf32> to vector<16x32xf32>
    %8 = arith.addf %6, %7 : vector<16x32xf32>
    %cst = arith.constant 0.000000e+00 : f32
    %9 = vector.broadcast %cst : f32 to vector<16x32xf32>
    %10 = arith.maximumf %8, %9 : vector<16x32xf32>
    %11 = arith.truncf %10 : vector<16x32xf32> to vector<16x32xbf16>
    %c0_9 = arith.constant 0 : index
    %c0_10 = arith.constant 0 : index
    %c0_11 = arith.constant 0 : index
    %12 = vector.load %arg4[%c0_9, %c0_10, %c0_11] : memref<3x32x32xbf16, #tpu.memory_space<vmem>>, vector<1x32x32xbf16>
    %13 = vector.shape_cast %12 : vector<1x32x32xbf16> to vector<32x32xbf16>
    %cst_12 = arith.constant dense<0.000000e+00> : vector<16x32xf32>
    %14 = tpu.matmul %11, %13, %cst_12 {dimension_numbers = #tpu.dot_dimension_numbers<[1], [0], [0], [1], [0, 0, 1, 1], [], []>} : vector<16x32xbf16>, vector<32x32xbf16>, vector<16x32xf32> -> vector<16x32xf32>
    %c0_13 = arith.constant 0 : index
    %c0_14 = arith.constant 0 : index
    %c0_15 = arith.constant 0 : index
    %15 = vector.load %arg5[%c0_13, %c0_14, %c0_15] : memref<3x1x32xf32, #tpu.memory_space<vmem>>, vector<1x1x32xf32>
    %16 = vector.shape_cast %15 : vector<1x1x32xf32> to vector<1x32xf32>
    %17 = vector.broadcast %16 : vector<1x32xf32> to vector<16x32xf32>
    %18 = arith.addf %14, %17 : vector<16x32xf32>
    %cst_16 = arith.constant 0.000000e+00 : f32
    %19 = vector.broadcast %cst_16 : f32 to vector<16x32xf32>
    %20 = arith.maximumf %18, %19 : vector<16x32xf32>
    %21 = arith.truncf %20 : vector<16x32xf32> to vector<16x32xbf16>
    %c0_17 = arith.constant 0 : index
    %c0_18 = arith.constant 0 : index
    %c0_19 = arith.constant 0 : index
    %22 = vector.load %arg6[%c0_17, %c0_18, %c0_19] : memref<3x32x32xbf16, #tpu.memory_space<vmem>>, vector<1x32x32xbf16>
    %23 = vector.shape_cast %22 : vector<1x32x32xbf16> to vector<32x32xbf16>
    %cst_20 = arith.constant dense<0.000000e+00> : vector<16x32xf32>
    %24 = tpu.matmul %21, %23, %cst_20 {dimension_numbers = #tpu.dot_dimension_numbers<[1], [0], [0], [1], [0, 0, 1, 1], [], []>} : vector<16x32xbf16>, vector<32x32xbf16>, vector<16x32xf32> -> vector<16x32xf32>
    %c0_21 = arith.constant 0 : index
    %c0_22 = arith.constant 0 : index
    %c0_23 = arith.constant 0 : index
    %25 = vector.load %arg7[%c0_21, %c0_22, %c0_23] : memref<3x1x32xf32, #tpu.memory_space<vmem>>, vector<1x1x32xf32>
    %26 = vector.shape_cast %25 : vector<1x1x32xf32> to vector<1x32xf32>
    %27 = vector.broadcast %26 : vector<1x32xf32> to vector<16x32xf32>
    %28 = arith.addf %24, %27 : vector<16x32xf32>
    %29 = arith.addf %8, %28 : vector<16x32xf32>
    %c1 = arith.constant 1 : index
    %c0_24 = arith.constant 0 : index
    %c0_25 = arith.constant 0 : index
    %30 = vector.load %arg3[%c1, %c0_24, %c0_25] : memref<24x1x32xf32, #tpu.memory_space<vmem>>, vector<1x1x32xf32>
    %31 = vector.shape_cast %30 : vector<1x1x32xf32> to vector<1x32xf32>
    %32 = vector.broadcast %31 : vector<1x32xf32> to vector<16x32xf32>
    %33 = arith.addf %29, %32 : vector<16x32xf32>
    %cst_26 = arith.constant 0.000000e+00 : f32
    %34 = vector.broadcast %cst_26 : f32 to vector<16x32xf32>
    %35 = arith.maximumf %33, %34 : vector<16x32xf32>
    %36 = arith.truncf %35 : vector<16x32xf32> to vector<16x32xbf16>
    %c1_27 = arith.constant 1 : index
    %c0_28 = arith.constant 0 : index
    %c0_29 = arith.constant 0 : index
    %37 = vector.load %arg4[%c1_27, %c0_28, %c0_29] : memref<3x32x32xbf16, #tpu.memory_space<vmem>>, vector<1x32x32xbf16>
    %38 = vector.shape_cast %37 : vector<1x32x32xbf16> to vector<32x32xbf16>
    %cst_30 = arith.constant dense<0.000000e+00> : vector<16x32xf32>
    %39 = tpu.matmul %36, %38, %cst_30 {dimension_numbers = #tpu.dot_dimension_numbers<[1], [0], [0], [1], [0, 0, 1, 1], [], []>} : vector<16x32xbf16>, vector<32x32xbf16>, vector<16x32xf32> -> vector<16x32xf32>
    %c1_31 = arith.constant 1 : index
    %c0_32 = arith.constant 0 : index
    %c0_33 = arith.constant 0 : index
    %40 = vector.load %arg5[%c1_31, %c0_32, %c0_33] : memref<3x1x32xf32, #tpu.memory_space<vmem>>, vector<1x1x32xf32>
    %41 = vector.shape_cast %40 : vector<1x1x32xf32> to vector<1x32xf32>
    %42 = vector.broadcast %41 : vector<1x32xf32> to vector<16x32xf32>
    %43 = arith.addf %39, %42 : vector<16x32xf32>
    %cst_34 = arith.constant 0.000000e+00 : f32
    %44 = vector.broadcast %cst_34 : f32 to vector<16x32xf32>
    %45 = arith.maximumf %43, %44 : vector<16x32xf32>
    %46 = arith.truncf %45 : vector<16x32xf32> to vector<16x32xbf16>
    %c1_35 = arith.constant 1 : index
    %c0_36 = arith.constant 0 : index
    %c0_37 = arith.constant 0 : index
    %47 = vector.load %arg6[%c1_35, %c0_36, %c0_37] : memref<3x32x32xbf16, #tpu.memory_space<vmem>>, vector<1x32x32xbf16>
    %48 = vector.shape_cast %47 : vector<1x32x32xbf16> to vector<32x32xbf16>
    %cst_38 = arith.constant dense<0.000000e+00> : vector<16x32xf32>
    %49 = tpu.matmul %46, %48, %cst_38 {dimension_numbers = #tpu.dot_dimension_numbers<[1], [0], [0], [1], [0, 0, 1, 1], [], []>} : vector<16x32xbf16>, vector<32x32xbf16>, vector<16x32xf32> -> vector<16x32xf32>
    %c1_39 = arith.constant 1 : index
    %c0_40 = arith.constant 0 : index
    %c0_41 = arith.constant 0 : index
    %50 = vector.load %arg7[%c1_39, %c0_40, %c0_41] : memref<3x1x32xf32, #tpu.memory_space<vmem>>, vector<1x1x32xf32>
    %51 = vector.shape_cast %50 : vector<1x1x32xf32> to vector<1x32xf32>
    %52 = vector.broadcast %51 : vector<1x32xf32> to vector<16x32xf32>
    %53 = arith.addf %49, %52 : vector<16x32xf32>
    %54 = arith.addf %33, %53 : vector<16x32xf32>
    %c2 = arith.constant 2 : index
    %c0_42 = arith.constant 0 : index
    %c0_43 = arith.constant 0 : index
    %55 = vector.load %arg3[%c2, %c0_42, %c0_43] : memref<24x1x32xf32, #tpu.memory_space<vmem>>, vector<1x1x32xf32>
    %56 = vector.shape_cast %55 : vector<1x1x32xf32> to vector<1x32xf32>
    %57 = vector.broadcast %56 : vector<1x32xf32> to vector<16x32xf32>
    %58 = arith.addf %54, %57 : vector<16x32xf32>
    %cst_44 = arith.constant 0.000000e+00 : f32
    %59 = vector.broadcast %cst_44 : f32 to vector<16x32xf32>
    %60 = arith.maximumf %58, %59 : vector<16x32xf32>
    %61 = arith.truncf %60 : vector<16x32xf32> to vector<16x32xbf16>
    %c2_45 = arith.constant 2 : index
    %c0_46 = arith.constant 0 : index
    %c0_47 = arith.constant 0 : index
    %62 = vector.load %arg4[%c2_45, %c0_46, %c0_47] : memref<3x32x32xbf16, #tpu.memory_space<vmem>>, vector<1x32x32xbf16>
    %63 = vector.shape_cast %62 : vector<1x32x32xbf16> to vector<32x32xbf16>
    %cst_48 = arith.constant dense<0.000000e+00> : vector<16x32xf32>
    %64 = tpu.matmul %61, %63, %cst_48 {dimension_numbers = #tpu.dot_dimension_numbers<[1], [0], [0], [1], [0, 0, 1, 1], [], []>} : vector<16x32xbf16>, vector<32x32xbf16>, vector<16x32xf32> -> vector<16x32xf32>
    %c2_49 = arith.constant 2 : index
    %c0_50 = arith.constant 0 : index
    %c0_51 = arith.constant 0 : index
    %65 = vector.load %arg5[%c2_49, %c0_50, %c0_51] : memref<3x1x32xf32, #tpu.memory_space<vmem>>, vector<1x1x32xf32>
    %66 = vector.shape_cast %65 : vector<1x1x32xf32> to vector<1x32xf32>
    %67 = vector.broadcast %66 : vector<1x32xf32> to vector<16x32xf32>
    %68 = arith.addf %64, %67 : vector<16x32xf32>
    %cst_52 = arith.constant 0.000000e+00 : f32
    %69 = vector.broadcast %cst_52 : f32 to vector<16x32xf32>
    %70 = arith.maximumf %68, %69 : vector<16x32xf32>
    %71 = arith.truncf %70 : vector<16x32xf32> to vector<16x32xbf16>
    %c2_53 = arith.constant 2 : index
    %c0_54 = arith.constant 0 : index
    %c0_55 = arith.constant 0 : index
    %72 = vector.load %arg6[%c2_53, %c0_54, %c0_55] : memref<3x32x32xbf16, #tpu.memory_space<vmem>>, vector<1x32x32xbf16>
    %73 = vector.shape_cast %72 : vector<1x32x32xbf16> to vector<32x32xbf16>
    %cst_56 = arith.constant dense<0.000000e+00> : vector<16x32xf32>
    %74 = tpu.matmul %71, %73, %cst_56 {dimension_numbers = #tpu.dot_dimension_numbers<[1], [0], [0], [1], [0, 0, 1, 1], [], []>} : vector<16x32xbf16>, vector<32x32xbf16>, vector<16x32xf32> -> vector<16x32xf32>
    %c2_57 = arith.constant 2 : index
    %c0_58 = arith.constant 0 : index
    %c0_59 = arith.constant 0 : index
    %75 = vector.load %arg7[%c2_57, %c0_58, %c0_59] : memref<3x1x32xf32, #tpu.memory_space<vmem>>, vector<1x1x32xf32>
    %76 = vector.shape_cast %75 : vector<1x1x32xf32> to vector<1x32xf32>
    %77 = vector.broadcast %76 : vector<1x32xf32> to vector<16x32xf32>
    %78 = arith.addf %74, %77 : vector<16x32xf32>
    %79 = arith.addf %58, %78 : vector<16x32xf32>
    %cst_60 = arith.constant 0.000000e+00 : f32
    %80 = vector.broadcast %cst_60 : f32 to vector<16x32xf32>
    %81 = arith.maximumf %79, %80 : vector<16x32xf32>
    %82 = arith.truncf %81 : vector<16x32xf32> to vector<16x32xbf16>
    %cst_61 = arith.constant dense<0.000000e+00> : vector<16x16xf32>
    %83 = tpu.matmul %82, %2, %cst_61 {dimension_numbers = #tpu.dot_dimension_numbers<[1], [0], [0], [1], [0, 0, 1, 1], [], []>} : vector<16x32xbf16>, vector<32x16xbf16>, vector<16x16xf32> -> vector<16x16xf32>
    %84 = vector.broadcast %3 : vector<1x16xf32> to vector<16x16xf32>
    %85 = arith.addf %83, %84 : vector<16x16xf32>
    %c3 = arith.constant 3 : index
    %c0_62 = arith.constant 0 : index
    %c0_63 = arith.constant 0 : index
    %86 = vector.load %arg3[%c3, %c0_62, %c0_63] : memref<24x1x32xf32, #tpu.memory_space<vmem>>, vector<1x1x32xf32>
    %87 = vector.shape_cast %86 : vector<1x1x32xf32> to vector<1x32xf32>
    %88 = vector.broadcast %1 : vector<16x1xf32> to vector<16x32xf32>
    %89 = vector.broadcast %87 : vector<1x32xf32> to vector<16x32xf32>
    %90 = arith.addf %88, %89 : vector<16x32xf32>
    %cst_64 = arith.constant 0.000000e+00 : f32
    %91 = vector.broadcast %cst_64 : f32 to vector<16x32xf32>
    %92 = arith.maximumf %90, %91 : vector<16x32xf32>
    %93 = arith.truncf %92 : vector<16x32xf32> to vector<16x32xbf16>
    %c0_65 = arith.constant 0 : index
    %c0_66 = arith.constant 0 : index
    %c0_67 = arith.constant 0 : index
    %94 = vector.load %arg4[%c0_65, %c0_66, %c0_67] : memref<3x32x32xbf16, #tpu.memory_space<vmem>>, vector<1x32x32xbf16>
    %95 = vector.shape_cast %94 : vector<1x32x32xbf16> to vector<32x32xbf16>
    %cst_68 = arith.constant dense<0.000000e+00> : vector<16x32xf32>
    %96 = tpu.matmul %93, %95, %cst_68 {dimension_numbers = #tpu.dot_dimension_numbers<[1], [0], [0], [1], [0, 0, 1, 1], [], []>} : vector<16x32xbf16>, vector<32x32xbf16>, vector<16x32xf32> -> vector<16x32xf32>
    %c0_69 = arith.constant 0 : index
    %c0_70 = arith.constant 0 : index
    %c0_71 = arith.constant 0 : index
    %97 = vector.load %arg5[%c0_69, %c0_70, %c0_71] : memref<3x1x32xf32, #tpu.memory_space<vmem>>, vector<1x1x32xf32>
    %98 = vector.shape_cast %97 : vector<1x1x32xf32> to vector<1x32xf32>
    %99 = vector.broadcast %98 : vector<1x32xf32> to vector<16x32xf32>
    %100 = arith.addf %96, %99 : vector<16x32xf32>
    %cst_72 = arith.constant 0.000000e+00 : f32
    %101 = vector.broadcast %cst_72 : f32 to vector<16x32xf32>
    %102 = arith.maximumf %100, %101 : vector<16x32xf32>
    %103 = arith.truncf %102 : vector<16x32xf32> to vector<16x32xbf16>
    %c0_73 = arith.constant 0 : index
    %c0_74 = arith.constant 0 : index
    %c0_75 = arith.constant 0 : index
    %104 = vector.load %arg6[%c0_73, %c0_74, %c0_75] : memref<3x32x32xbf16, #tpu.memory_space<vmem>>, vector<1x32x32xbf16>
    %105 = vector.shape_cast %104 : vector<1x32x32xbf16> to vector<32x32xbf16>
    %cst_76 = arith.constant dense<0.000000e+00> : vector<16x32xf32>
    %106 = tpu.matmul %103, %105, %cst_76 {dimension_numbers = #tpu.dot_dimension_numbers<[1], [0], [0], [1], [0, 0, 1, 1], [], []>} : vector<16x32xbf16>, vector<32x32xbf16>, vector<16x32xf32> -> vector<16x32xf32>
    %c0_77 = arith.constant 0 : index
    %c0_78 = arith.constant 0 : index
    %c0_79 = arith.constant 0 : index
    %107 = vector.load %arg7[%c0_77, %c0_78, %c0_79] : memref<3x1x32xf32, #tpu.memory_space<vmem>>, vector<1x1x32xf32>
    %108 = vector.shape_cast %107 : vector<1x1x32xf32> to vector<1x32xf32>
    %109 = vector.broadcast %108 : vector<1x32xf32> to vector<16x32xf32>
    %110 = arith.addf %106, %109 : vector<16x32xf32>
    %111 = arith.addf %90, %110 : vector<16x32xf32>
    %c4 = arith.constant 4 : index
    %c0_80 = arith.constant 0 : index
    %c0_81 = arith.constant 0 : index
    %112 = vector.load %arg3[%c4, %c0_80, %c0_81] : memref<24x1x32xf32, #tpu.memory_space<vmem>>, vector<1x1x32xf32>
    %113 = vector.shape_cast %112 : vector<1x1x32xf32> to vector<1x32xf32>
    %114 = vector.broadcast %113 : vector<1x32xf32> to vector<16x32xf32>
    %115 = arith.addf %111, %114 : vector<16x32xf32>
    %cst_82 = arith.constant 0.000000e+00 : f32
    %116 = vector.broadcast %cst_82 : f32 to vector<16x32xf32>
    %117 = arith.maximumf %115, %116 : vector<16x32xf32>
    %118 = arith.truncf %117 : vector<16x32xf32> to vector<16x32xbf16>
    %c1_83 = arith.constant 1 : index
    %c0_84 = arith.constant 0 : index
    %c0_85 = arith.constant 0 : index
    %119 = vector.load %arg4[%c1_83, %c0_84, %c0_85] : memref<3x32x32xbf16, #tpu.memory_space<vmem>>, vector<1x32x32xbf16>
    %120 = vector.shape_cast %119 : vector<1x32x32xbf16> to vector<32x32xbf16>
    %cst_86 = arith.constant dense<0.000000e+00> : vector<16x32xf32>
    %121 = tpu.matmul %118, %120, %cst_86 {dimension_numbers = #tpu.dot_dimension_numbers<[1], [0], [0], [1], [0, 0, 1, 1], [], []>} : vector<16x32xbf16>, vector<32x32xbf16>, vector<16x32xf32> -> vector<16x32xf32>
    %c1_87 = arith.constant 1 : index
    %c0_88 = arith.constant 0 : index
    %c0_89 = arith.constant 0 : index
    %122 = vector.load %arg5[%c1_87, %c0_88, %c0_89] : memref<3x1x32xf32, #tpu.memory_space<vmem>>, vector<1x1x32xf32>
    %123 = vector.shape_cast %122 : vector<1x1x32xf32> to vector<1x32xf32>
    %124 = vector.broadcast %123 : vector<1x32xf32> to vector<16x32xf32>
    %125 = arith.addf %121, %124 : vector<16x32xf32>
    %cst_90 = arith.constant 0.000000e+00 : f32
    %126 = vector.broadcast %cst_90 : f32 to vector<16x32xf32>
    %127 = arith.maximumf %125, %126 : vector<16x32xf32>
    %128 = arith.truncf %127 : vector<16x32xf32> to vector<16x32xbf16>
    %c1_91 = arith.constant 1 : index
    %c0_92 = arith.constant 0 : index
    %c0_93 = arith.constant 0 : index
    %129 = vector.load %arg6[%c1_91, %c0_92, %c0_93] : memref<3x32x32xbf16, #tpu.memory_space<vmem>>, vector<1x32x32xbf16>
    %130 = vector.shape_cast %129 : vector<1x32x32xbf16> to vector<32x32xbf16>
    %cst_94 = arith.constant dense<0.000000e+00> : vector<16x32xf32>
    %131 = tpu.matmul %128, %130, %cst_94 {dimension_numbers = #tpu.dot_dimension_numbers<[1], [0], [0], [1], [0, 0, 1, 1], [], []>} : vector<16x32xbf16>, vector<32x32xbf16>, vector<16x32xf32> -> vector<16x32xf32>
    %c1_95 = arith.constant 1 : index
    %c0_96 = arith.constant 0 : index
    %c0_97 = arith.constant 0 : index
    %132 = vector.load %arg7[%c1_95, %c0_96, %c0_97] : memref<3x1x32xf32, #tpu.memory_space<vmem>>, vector<1x1x32xf32>
    %133 = vector.shape_cast %132 : vector<1x1x32xf32> to vector<1x32xf32>
    %134 = vector.broadcast %133 : vector<1x32xf32> to vector<16x32xf32>
    %135 = arith.addf %131, %134 : vector<16x32xf32>
    %136 = arith.addf %115, %135 : vector<16x32xf32>
    %c5 = arith.constant 5 : index
    %c0_98 = arith.constant 0 : index
    %c0_99 = arith.constant 0 : index
    %137 = vector.load %arg3[%c5, %c0_98, %c0_99] : memref<24x1x32xf32, #tpu.memory_space<vmem>>, vector<1x1x32xf32>
    %138 = vector.shape_cast %137 : vector<1x1x32xf32> to vector<1x32xf32>
    %139 = vector.broadcast %138 : vector<1x32xf32> to vector<16x32xf32>
    %140 = arith.addf %136, %139 : vector<16x32xf32>
    %cst_100 = arith.constant 0.000000e+00 : f32
    %141 = vector.broadcast %cst_100 : f32 to vector<16x32xf32>
    %142 = arith.maximumf %140, %141 : vector<16x32xf32>
    %143 = arith.truncf %142 : vector<16x32xf32> to vector<16x32xbf16>
    %c2_101 = arith.constant 2 : index
    %c0_102 = arith.constant 0 : index
    %c0_103 = arith.constant 0 : index
    %144 = vector.load %arg4[%c2_101, %c0_102, %c0_103] : memref<3x32x32xbf16, #tpu.memory_space<vmem>>, vector<1x32x32xbf16>
    %145 = vector.shape_cast %144 : vector<1x32x32xbf16> to vector<32x32xbf16>
    %cst_104 = arith.constant dense<0.000000e+00> : vector<16x32xf32>
    %146 = tpu.matmul %143, %145, %cst_104 {dimension_numbers = #tpu.dot_dimension_numbers<[1], [0], [0], [1], [0, 0, 1, 1], [], []>} : vector<16x32xbf16>, vector<32x32xbf16>, vector<16x32xf32> -> vector<16x32xf32>
    %c2_105 = arith.constant 2 : index
    %c0_106 = arith.constant 0 : index
    %c0_107 = arith.constant 0 : index
    %147 = vector.load %arg5[%c2_105, %c0_106, %c0_107] : memref<3x1x32xf32, #tpu.memory_space<vmem>>, vector<1x1x32xf32>
    %148 = vector.shape_cast %147 : vector<1x1x32xf32> to vector<1x32xf32>
    %149 = vector.broadcast %148 : vector<1x32xf32> to vector<16x32xf32>
    %150 = arith.addf %146, %149 : vector<16x32xf32>
    %cst_108 = arith.constant 0.000000e+00 : f32
    %151 = vector.broadcast %cst_108 : f32 to vector<16x32xf32>
    %152 = arith.maximumf %150, %151 : vector<16x32xf32>
    %153 = arith.truncf %152 : vector<16x32xf32> to vector<16x32xbf16>
    %c2_109 = arith.constant 2 : index
    %c0_110 = arith.constant 0 : index
    %c0_111 = arith.constant 0 : index
    %154 = vector.load %arg6[%c2_109, %c0_110, %c0_111] : memref<3x32x32xbf16, #tpu.memory_space<vmem>>, vector<1x32x32xbf16>
    %155 = vector.shape_cast %154 : vector<1x32x32xbf16> to vector<32x32xbf16>
    %cst_112 = arith.constant dense<0.000000e+00> : vector<16x32xf32>
    %156 = tpu.matmul %153, %155, %cst_112 {dimension_numbers = #tpu.dot_dimension_numbers<[1], [0], [0], [1], [0, 0, 1, 1], [], []>} : vector<16x32xbf16>, vector<32x32xbf16>, vector<16x32xf32> -> vector<16x32xf32>
    %c2_113 = arith.constant 2 : index
    %c0_114 = arith.constant 0 : index
    %c0_115 = arith.constant 0 : index
    %157 = vector.load %arg7[%c2_113, %c0_114, %c0_115] : memref<3x1x32xf32, #tpu.memory_space<vmem>>, vector<1x1x32xf32>
    %158 = vector.shape_cast %157 : vector<1x1x32xf32> to vector<1x32xf32>
    %159 = vector.broadcast %158 : vector<1x32xf32> to vector<16x32xf32>
    %160 = arith.addf %156, %159 : vector<16x32xf32>
    %161 = arith.addf %140, %160 : vector<16x32xf32>
    %cst_116 = arith.constant 0.000000e+00 : f32
    %162 = vector.broadcast %cst_116 : f32 to vector<16x32xf32>
    %163 = arith.maximumf %161, %162 : vector<16x32xf32>
    %164 = arith.truncf %163 : vector<16x32xf32> to vector<16x32xbf16>
    %cst_117 = arith.constant dense<0.000000e+00> : vector<16x16xf32>
    %165 = tpu.matmul %164, %2, %cst_117 {dimension_numbers = #tpu.dot_dimension_numbers<[1], [0], [0], [1], [0, 0, 1, 1], [], []>} : vector<16x32xbf16>, vector<32x16xbf16>, vector<16x16xf32> -> vector<16x16xf32>
    %166 = vector.broadcast %3 : vector<1x16xf32> to vector<16x16xf32>
    %167 = arith.addf %165, %166 : vector<16x16xf32>
    %c6 = arith.constant 6 : index
    %c0_118 = arith.constant 0 : index
    %c0_119 = arith.constant 0 : index
    %168 = vector.load %arg3[%c6, %c0_118, %c0_119] : memref<24x1x32xf32, #tpu.memory_space<vmem>>, vector<1x1x32xf32>
    %169 = vector.shape_cast %168 : vector<1x1x32xf32> to vector<1x32xf32>
    %170 = vector.broadcast %1 : vector<16x1xf32> to vector<16x32xf32>
    %171 = vector.broadcast %169 : vector<1x32xf32> to vector<16x32xf32>
    %172 = arith.addf %170, %171 : vector<16x32xf32>
    %cst_120 = arith.constant 0.000000e+00 : f32
    %173 = vector.broadcast %cst_120 : f32 to vector<16x32xf32>
    %174 = arith.maximumf %172, %173 : vector<16x32xf32>
    %175 = arith.truncf %174 : vector<16x32xf32> to vector<16x32xbf16>
    %c0_121 = arith.constant 0 : index
    %c0_122 = arith.constant 0 : index
    %c0_123 = arith.constant 0 : index
    %176 = vector.load %arg4[%c0_121, %c0_122, %c0_123] : memref<3x32x32xbf16, #tpu.memory_space<vmem>>, vector<1x32x32xbf16>
    %177 = vector.shape_cast %176 : vector<1x32x32xbf16> to vector<32x32xbf16>
    %cst_124 = arith.constant dense<0.000000e+00> : vector<16x32xf32>
    %178 = tpu.matmul %175, %177, %cst_124 {dimension_numbers = #tpu.dot_dimension_numbers<[1], [0], [0], [1], [0, 0, 1, 1], [], []>} : vector<16x32xbf16>, vector<32x32xbf16>, vector<16x32xf32> -> vector<16x32xf32>
    %c0_125 = arith.constant 0 : index
    %c0_126 = arith.constant 0 : index
    %c0_127 = arith.constant 0 : index
    %179 = vector.load %arg5[%c0_125, %c0_126, %c0_127] : memref<3x1x32xf32, #tpu.memory_space<vmem>>, vector<1x1x32xf32>
    %180 = vector.shape_cast %179 : vector<1x1x32xf32> to vector<1x32xf32>
    %181 = vector.broadcast %180 : vector<1x32xf32> to vector<16x32xf32>
    %182 = arith.addf %178, %181 : vector<16x32xf32>
    %cst_128 = arith.constant 0.000000e+00 : f32
    %183 = vector.broadcast %cst_128 : f32 to vector<16x32xf32>
    %184 = arith.maximumf %182, %183 : vector<16x32xf32>
    %185 = arith.truncf %184 : vector<16x32xf32> to vector<16x32xbf16>
    %c0_129 = arith.constant 0 : index
    %c0_130 = arith.constant 0 : index
    %c0_131 = arith.constant 0 : index
    %186 = vector.load %arg6[%c0_129, %c0_130, %c0_131] : memref<3x32x32xbf16, #tpu.memory_space<vmem>>, vector<1x32x32xbf16>
    %187 = vector.shape_cast %186 : vector<1x32x32xbf16> to vector<32x32xbf16>
    %cst_132 = arith.constant dense<0.000000e+00> : vector<16x32xf32>
    %188 = tpu.matmul %185, %187, %cst_132 {dimension_numbers = #tpu.dot_dimension_numbers<[1], [0], [0], [1], [0, 0, 1, 1], [], []>} : vector<16x32xbf16>, vector<32x32xbf16>, vector<16x32xf32> -> vector<16x32xf32>
    %c0_133 = arith.constant 0 : index
    %c0_134 = arith.constant 0 : index
    %c0_135 = arith.constant 0 : index
    %189 = vector.load %arg7[%c0_133, %c0_134, %c0_135] : memref<3x1x32xf32, #tpu.memory_space<vmem>>, vector<1x1x32xf32>
    %190 = vector.shape_cast %189 : vector<1x1x32xf32> to vector<1x32xf32>
    %191 = vector.broadcast %190 : vector<1x32xf32> to vector<16x32xf32>
    %192 = arith.addf %188, %191 : vector<16x32xf32>
    %193 = arith.addf %172, %192 : vector<16x32xf32>
    %c7 = arith.constant 7 : index
    %c0_136 = arith.constant 0 : index
    %c0_137 = arith.constant 0 : index
    %194 = vector.load %arg3[%c7, %c0_136, %c0_137] : memref<24x1x32xf32, #tpu.memory_space<vmem>>, vector<1x1x32xf32>
    %195 = vector.shape_cast %194 : vector<1x1x32xf32> to vector<1x32xf32>
    %196 = vector.broadcast %195 : vector<1x32xf32> to vector<16x32xf32>
    %197 = arith.addf %193, %196 : vector<16x32xf32>
    %cst_138 = arith.constant 0.000000e+00 : f32
    %198 = vector.broadcast %cst_138 : f32 to vector<16x32xf32>
    %199 = arith.maximumf %197, %198 : vector<16x32xf32>
    %200 = arith.truncf %199 : vector<16x32xf32> to vector<16x32xbf16>
    %c1_139 = arith.constant 1 : index
    %c0_140 = arith.constant 0 : index
    %c0_141 = arith.constant 0 : index
    %201 = vector.load %arg4[%c1_139, %c0_140, %c0_141] : memref<3x32x32xbf16, #tpu.memory_space<vmem>>, vector<1x32x32xbf16>
    %202 = vector.shape_cast %201 : vector<1x32x32xbf16> to vector<32x32xbf16>
    %cst_142 = arith.constant dense<0.000000e+00> : vector<16x32xf32>
    %203 = tpu.matmul %200, %202, %cst_142 {dimension_numbers = #tpu.dot_dimension_numbers<[1], [0], [0], [1], [0, 0, 1, 1], [], []>} : vector<16x32xbf16>, vector<32x32xbf16>, vector<16x32xf32> -> vector<16x32xf32>
    %c1_143 = arith.constant 1 : index
    %c0_144 = arith.constant 0 : index
    %c0_145 = arith.constant 0 : index
    %204 = vector.load %arg5[%c1_143, %c0_144, %c0_145] : memref<3x1x32xf32, #tpu.memory_space<vmem>>, vector<1x1x32xf32>
    %205 = vector.shape_cast %204 : vector<1x1x32xf32> to vector<1x32xf32>
    %206 = vector.broadcast %205 : vector<1x32xf32> to vector<16x32xf32>
    %207 = arith.addf %203, %206 : vector<16x32xf32>
    %cst_146 = arith.constant 0.000000e+00 : f32
    %208 = vector.broadcast %cst_146 : f32 to vector<16x32xf32>
    %209 = arith.maximumf %207, %208 : vector<16x32xf32>
    %210 = arith.truncf %209 : vector<16x32xf32> to vector<16x32xbf16>
    %c1_147 = arith.constant 1 : index
    %c0_148 = arith.constant 0 : index
    %c0_149 = arith.constant 0 : index
    %211 = vector.load %arg6[%c1_147, %c0_148, %c0_149] : memref<3x32x32xbf16, #tpu.memory_space<vmem>>, vector<1x32x32xbf16>
    %212 = vector.shape_cast %211 : vector<1x32x32xbf16> to vector<32x32xbf16>
    %cst_150 = arith.constant dense<0.000000e+00> : vector<16x32xf32>
    %213 = tpu.matmul %210, %212, %cst_150 {dimension_numbers = #tpu.dot_dimension_numbers<[1], [0], [0], [1], [0, 0, 1, 1], [], []>} : vector<16x32xbf16>, vector<32x32xbf16>, vector<16x32xf32> -> vector<16x32xf32>
    %c1_151 = arith.constant 1 : index
    %c0_152 = arith.constant 0 : index
    %c0_153 = arith.constant 0 : index
    %214 = vector.load %arg7[%c1_151, %c0_152, %c0_153] : memref<3x1x32xf32, #tpu.memory_space<vmem>>, vector<1x1x32xf32>
    %215 = vector.shape_cast %214 : vector<1x1x32xf32> to vector<1x32xf32>
    %216 = vector.broadcast %215 : vector<1x32xf32> to vector<16x32xf32>
    %217 = arith.addf %213, %216 : vector<16x32xf32>
    %218 = arith.addf %197, %217 : vector<16x32xf32>
    %c8 = arith.constant 8 : index
    %c0_154 = arith.constant 0 : index
    %c0_155 = arith.constant 0 : index
    %219 = vector.load %arg3[%c8, %c0_154, %c0_155] : memref<24x1x32xf32, #tpu.memory_space<vmem>>, vector<1x1x32xf32>
    %220 = vector.shape_cast %219 : vector<1x1x32xf32> to vector<1x32xf32>
    %221 = vector.broadcast %220 : vector<1x32xf32> to vector<16x32xf32>
    %222 = arith.addf %218, %221 : vector<16x32xf32>
    %cst_156 = arith.constant 0.000000e+00 : f32
    %223 = vector.broadcast %cst_156 : f32 to vector<16x32xf32>
    %224 = arith.maximumf %222, %223 : vector<16x32xf32>
    %225 = arith.truncf %224 : vector<16x32xf32> to vector<16x32xbf16>
    %c2_157 = arith.constant 2 : index
    %c0_158 = arith.constant 0 : index
    %c0_159 = arith.constant 0 : index
    %226 = vector.load %arg4[%c2_157, %c0_158, %c0_159] : memref<3x32x32xbf16, #tpu.memory_space<vmem>>, vector<1x32x32xbf16>
    %227 = vector.shape_cast %226 : vector<1x32x32xbf16> to vector<32x32xbf16>
    %cst_160 = arith.constant dense<0.000000e+00> : vector<16x32xf32>
    %228 = tpu.matmul %225, %227, %cst_160 {dimension_numbers = #tpu.dot_dimension_numbers<[1], [0], [0], [1], [0, 0, 1, 1], [], []>} : vector<16x32xbf16>, vector<32x32xbf16>, vector<16x32xf32> -> vector<16x32xf32>
    %c2_161 = arith.constant 2 : index
    %c0_162 = arith.constant 0 : index
    %c0_163 = arith.constant 0 : index
    %229 = vector.load %arg5[%c2_161, %c0_162, %c0_163] : memref<3x1x32xf32, #tpu.memory_space<vmem>>, vector<1x1x32xf32>
    %230 = vector.shape_cast %229 : vector<1x1x32xf32> to vector<1x32xf32>
    %231 = vector.broadcast %230 : vector<1x32xf32> to vector<16x32xf32>
    %232 = arith.addf %228, %231 : vector<16x32xf32>
    %cst_164 = arith.constant 0.000000e+00 : f32
    %233 = vector.broadcast %cst_164 : f32 to vector<16x32xf32>
    %234 = arith.maximumf %232, %233 : vector<16x32xf32>
    %235 = arith.truncf %234 : vector<16x32xf32> to vector<16x32xbf16>
    %c2_165 = arith.constant 2 : index
    %c0_166 = arith.constant 0 : index
    %c0_167 = arith.constant 0 : index
    %236 = vector.load %arg6[%c2_165, %c0_166, %c0_167] : memref<3x32x32xbf16, #tpu.memory_space<vmem>>, vector<1x32x32xbf16>
    %237 = vector.shape_cast %236 : vector<1x32x32xbf16> to vector<32x32xbf16>
    %cst_168 = arith.constant dense<0.000000e+00> : vector<16x32xf32>
    %238 = tpu.matmul %235, %237, %cst_168 {dimension_numbers = #tpu.dot_dimension_numbers<[1], [0], [0], [1], [0, 0, 1, 1], [], []>} : vector<16x32xbf16>, vector<32x32xbf16>, vector<16x32xf32> -> vector<16x32xf32>
    %c2_169 = arith.constant 2 : index
    %c0_170 = arith.constant 0 : index
    %c0_171 = arith.constant 0 : index
    %239 = vector.load %arg7[%c2_169, %c0_170, %c0_171] : memref<3x1x32xf32, #tpu.memory_space<vmem>>, vector<1x1x32xf32>
    %240 = vector.shape_cast %239 : vector<1x1x32xf32> to vector<1x32xf32>
    %241 = vector.broadcast %240 : vector<1x32xf32> to vector<16x32xf32>
    %242 = arith.addf %238, %241 : vector<16x32xf32>
    %243 = arith.addf %222, %242 : vector<16x32xf32>
    %cst_172 = arith.constant 0.000000e+00 : f32
    %244 = vector.broadcast %cst_172 : f32 to vector<16x32xf32>
    %245 = arith.maximumf %243, %244 : vector<16x32xf32>
    %246 = arith.truncf %245 : vector<16x32xf32> to vector<16x32xbf16>
    %cst_173 = arith.constant dense<0.000000e+00> : vector<16x16xf32>
    %247 = tpu.matmul %246, %2, %cst_173 {dimension_numbers = #tpu.dot_dimension_numbers<[1], [0], [0], [1], [0, 0, 1, 1], [], []>} : vector<16x32xbf16>, vector<32x16xbf16>, vector<16x16xf32> -> vector<16x16xf32>
    %248 = vector.broadcast %3 : vector<1x16xf32> to vector<16x16xf32>
    %249 = arith.addf %247, %248 : vector<16x16xf32>
    %c9 = arith.constant 9 : index
    %c0_174 = arith.constant 0 : index
    %c0_175 = arith.constant 0 : index
    %250 = vector.load %arg3[%c9, %c0_174, %c0_175] : memref<24x1x32xf32, #tpu.memory_space<vmem>>, vector<1x1x32xf32>
    %251 = vector.shape_cast %250 : vector<1x1x32xf32> to vector<1x32xf32>
    %252 = vector.broadcast %1 : vector<16x1xf32> to vector<16x32xf32>
    %253 = vector.broadcast %251 : vector<1x32xf32> to vector<16x32xf32>
    %254 = arith.addf %252, %253 : vector<16x32xf32>
    %cst_176 = arith.constant 0.000000e+00 : f32
    %255 = vector.broadcast %cst_176 : f32 to vector<16x32xf32>
    %256 = arith.maximumf %254, %255 : vector<16x32xf32>
    %257 = arith.truncf %256 : vector<16x32xf32> to vector<16x32xbf16>
    %c0_177 = arith.constant 0 : index
    %c0_178 = arith.constant 0 : index
    %c0_179 = arith.constant 0 : index
    %258 = vector.load %arg4[%c0_177, %c0_178, %c0_179] : memref<3x32x32xbf16, #tpu.memory_space<vmem>>, vector<1x32x32xbf16>
    %259 = vector.shape_cast %258 : vector<1x32x32xbf16> to vector<32x32xbf16>
    %cst_180 = arith.constant dense<0.000000e+00> : vector<16x32xf32>
    %260 = tpu.matmul %257, %259, %cst_180 {dimension_numbers = #tpu.dot_dimension_numbers<[1], [0], [0], [1], [0, 0, 1, 1], [], []>} : vector<16x32xbf16>, vector<32x32xbf16>, vector<16x32xf32> -> vector<16x32xf32>
    %c0_181 = arith.constant 0 : index
    %c0_182 = arith.constant 0 : index
    %c0_183 = arith.constant 0 : index
    %261 = vector.load %arg5[%c0_181, %c0_182, %c0_183] : memref<3x1x32xf32, #tpu.memory_space<vmem>>, vector<1x1x32xf32>
    %262 = vector.shape_cast %261 : vector<1x1x32xf32> to vector<1x32xf32>
    %263 = vector.broadcast %262 : vector<1x32xf32> to vector<16x32xf32>
    %264 = arith.addf %260, %263 : vector<16x32xf32>
    %cst_184 = arith.constant 0.000000e+00 : f32
    %265 = vector.broadcast %cst_184 : f32 to vector<16x32xf32>
    %266 = arith.maximumf %264, %265 : vector<16x32xf32>
    %267 = arith.truncf %266 : vector<16x32xf32> to vector<16x32xbf16>
    %c0_185 = arith.constant 0 : index
    %c0_186 = arith.constant 0 : index
    %c0_187 = arith.constant 0 : index
    %268 = vector.load %arg6[%c0_185, %c0_186, %c0_187] : memref<3x32x32xbf16, #tpu.memory_space<vmem>>, vector<1x32x32xbf16>
    %269 = vector.shape_cast %268 : vector<1x32x32xbf16> to vector<32x32xbf16>
    %cst_188 = arith.constant dense<0.000000e+00> : vector<16x32xf32>
    %270 = tpu.matmul %267, %269, %cst_188 {dimension_numbers = #tpu.dot_dimension_numbers<[1], [0], [0], [1], [0, 0, 1, 1], [], []>} : vector<16x32xbf16>, vector<32x32xbf16>, vector<16x32xf32> -> vector<16x32xf32>
    %c0_189 = arith.constant 0 : index
    %c0_190 = arith.constant 0 : index
    %c0_191 = arith.constant 0 : index
    %271 = vector.load %arg7[%c0_189, %c0_190, %c0_191] : memref<3x1x32xf32, #tpu.memory_space<vmem>>, vector<1x1x32xf32>
    %272 = vector.shape_cast %271 : vector<1x1x32xf32> to vector<1x32xf32>
    %273 = vector.broadcast %272 : vector<1x32xf32> to vector<16x32xf32>
    %274 = arith.addf %270, %273 : vector<16x32xf32>
    %275 = arith.addf %254, %274 : vector<16x32xf32>
    %c10 = arith.constant 10 : index
    %c0_192 = arith.constant 0 : index
    %c0_193 = arith.constant 0 : index
    %276 = vector.load %arg3[%c10, %c0_192, %c0_193] : memref<24x1x32xf32, #tpu.memory_space<vmem>>, vector<1x1x32xf32>
    %277 = vector.shape_cast %276 : vector<1x1x32xf32> to vector<1x32xf32>
    %278 = vector.broadcast %277 : vector<1x32xf32> to vector<16x32xf32>
    %279 = arith.addf %275, %278 : vector<16x32xf32>
    %cst_194 = arith.constant 0.000000e+00 : f32
    %280 = vector.broadcast %cst_194 : f32 to vector<16x32xf32>
    %281 = arith.maximumf %279, %280 : vector<16x32xf32>
    %282 = arith.truncf %281 : vector<16x32xf32> to vector<16x32xbf16>
    %c1_195 = arith.constant 1 : index
    %c0_196 = arith.constant 0 : index
    %c0_197 = arith.constant 0 : index
    %283 = vector.load %arg4[%c1_195, %c0_196, %c0_197] : memref<3x32x32xbf16, #tpu.memory_space<vmem>>, vector<1x32x32xbf16>
    %284 = vector.shape_cast %283 : vector<1x32x32xbf16> to vector<32x32xbf16>
    %cst_198 = arith.constant dense<0.000000e+00> : vector<16x32xf32>
    %285 = tpu.matmul %282, %284, %cst_198 {dimension_numbers = #tpu.dot_dimension_numbers<[1], [0], [0], [1], [0, 0, 1, 1], [], []>} : vector<16x32xbf16>, vector<32x32xbf16>, vector<16x32xf32> -> vector<16x32xf32>
    %c1_199 = arith.constant 1 : index
    %c0_200 = arith.constant 0 : index
    %c0_201 = arith.constant 0 : index
    %286 = vector.load %arg5[%c1_199, %c0_200, %c0_201] : memref<3x1x32xf32, #tpu.memory_space<vmem>>, vector<1x1x32xf32>
    %287 = vector.shape_cast %286 : vector<1x1x32xf32> to vector<1x32xf32>
    %288 = vector.broadcast %287 : vector<1x32xf32> to vector<16x32xf32>
    %289 = arith.addf %285, %288 : vector<16x32xf32>
    %cst_202 = arith.constant 0.000000e+00 : f32
    %290 = vector.broadcast %cst_202 : f32 to vector<16x32xf32>
    %291 = arith.maximumf %289, %290 : vector<16x32xf32>
    %292 = arith.truncf %291 : vector<16x32xf32> to vector<16x32xbf16>
    %c1_203 = arith.constant 1 : index
    %c0_204 = arith.constant 0 : index
    %c0_205 = arith.constant 0 : index
    %293 = vector.load %arg6[%c1_203, %c0_204, %c0_205] : memref<3x32x32xbf16, #tpu.memory_space<vmem>>, vector<1x32x32xbf16>
    %294 = vector.shape_cast %293 : vector<1x32x32xbf16> to vector<32x32xbf16>
    %cst_206 = arith.constant dense<0.000000e+00> : vector<16x32xf32>
    %295 = tpu.matmul %292, %294, %cst_206 {dimension_numbers = #tpu.dot_dimension_numbers<[1], [0], [0], [1], [0, 0, 1, 1], [], []>} : vector<16x32xbf16>, vector<32x32xbf16>, vector<16x32xf32> -> vector<16x32xf32>
    %c1_207 = arith.constant 1 : index
    %c0_208 = arith.constant 0 : index
    %c0_209 = arith.constant 0 : index
    %296 = vector.load %arg7[%c1_207, %c0_208, %c0_209] : memref<3x1x32xf32, #tpu.memory_space<vmem>>, vector<1x1x32xf32>
    %297 = vector.shape_cast %296 : vector<1x1x32xf32> to vector<1x32xf32>
    %298 = vector.broadcast %297 : vector<1x32xf32> to vector<16x32xf32>
    %299 = arith.addf %295, %298 : vector<16x32xf32>
    %300 = arith.addf %279, %299 : vector<16x32xf32>
    %c11 = arith.constant 11 : index
    %c0_210 = arith.constant 0 : index
    %c0_211 = arith.constant 0 : index
    %301 = vector.load %arg3[%c11, %c0_210, %c0_211] : memref<24x1x32xf32, #tpu.memory_space<vmem>>, vector<1x1x32xf32>
    %302 = vector.shape_cast %301 : vector<1x1x32xf32> to vector<1x32xf32>
    %303 = vector.broadcast %302 : vector<1x32xf32> to vector<16x32xf32>
    %304 = arith.addf %300, %303 : vector<16x32xf32>
    %cst_212 = arith.constant 0.000000e+00 : f32
    %305 = vector.broadcast %cst_212 : f32 to vector<16x32xf32>
    %306 = arith.maximumf %304, %305 : vector<16x32xf32>
    %307 = arith.truncf %306 : vector<16x32xf32> to vector<16x32xbf16>
    %c2_213 = arith.constant 2 : index
    %c0_214 = arith.constant 0 : index
    %c0_215 = arith.constant 0 : index
    %308 = vector.load %arg4[%c2_213, %c0_214, %c0_215] : memref<3x32x32xbf16, #tpu.memory_space<vmem>>, vector<1x32x32xbf16>
    %309 = vector.shape_cast %308 : vector<1x32x32xbf16> to vector<32x32xbf16>
    %cst_216 = arith.constant dense<0.000000e+00> : vector<16x32xf32>
    %310 = tpu.matmul %307, %309, %cst_216 {dimension_numbers = #tpu.dot_dimension_numbers<[1], [0], [0], [1], [0, 0, 1, 1], [], []>} : vector<16x32xbf16>, vector<32x32xbf16>, vector<16x32xf32> -> vector<16x32xf32>
    %c2_217 = arith.constant 2 : index
    %c0_218 = arith.constant 0 : index
    %c0_219 = arith.constant 0 : index
    %311 = vector.load %arg5[%c2_217, %c0_218, %c0_219] : memref<3x1x32xf32, #tpu.memory_space<vmem>>, vector<1x1x32xf32>
    %312 = vector.shape_cast %311 : vector<1x1x32xf32> to vector<1x32xf32>
    %313 = vector.broadcast %312 : vector<1x32xf32> to vector<16x32xf32>
    %314 = arith.addf %310, %313 : vector<16x32xf32>
    %cst_220 = arith.constant 0.000000e+00 : f32
    %315 = vector.broadcast %cst_220 : f32 to vector<16x32xf32>
    %316 = arith.maximumf %314, %315 : vector<16x32xf32>
    %317 = arith.truncf %316 : vector<16x32xf32> to vector<16x32xbf16>
    %c2_221 = arith.constant 2 : index
    %c0_222 = arith.constant 0 : index
    %c0_223 = arith.constant 0 : index
    %318 = vector.load %arg6[%c2_221, %c0_222, %c0_223] : memref<3x32x32xbf16, #tpu.memory_space<vmem>>, vector<1x32x32xbf16>
    %319 = vector.shape_cast %318 : vector<1x32x32xbf16> to vector<32x32xbf16>
    %cst_224 = arith.constant dense<0.000000e+00> : vector<16x32xf32>
    %320 = tpu.matmul %317, %319, %cst_224 {dimension_numbers = #tpu.dot_dimension_numbers<[1], [0], [0], [1], [0, 0, 1, 1], [], []>} : vector<16x32xbf16>, vector<32x32xbf16>, vector<16x32xf32> -> vector<16x32xf32>
    %c2_225 = arith.constant 2 : index
    %c0_226 = arith.constant 0 : index
    %c0_227 = arith.constant 0 : index
    %321 = vector.load %arg7[%c2_225, %c0_226, %c0_227] : memref<3x1x32xf32, #tpu.memory_space<vmem>>, vector<1x1x32xf32>
    %322 = vector.shape_cast %321 : vector<1x1x32xf32> to vector<1x32xf32>
    %323 = vector.broadcast %322 : vector<1x32xf32> to vector<16x32xf32>
    %324 = arith.addf %320, %323 : vector<16x32xf32>
    %325 = arith.addf %304, %324 : vector<16x32xf32>
    %cst_228 = arith.constant 0.000000e+00 : f32
    %326 = vector.broadcast %cst_228 : f32 to vector<16x32xf32>
    %327 = arith.maximumf %325, %326 : vector<16x32xf32>
    %328 = arith.truncf %327 : vector<16x32xf32> to vector<16x32xbf16>
    %cst_229 = arith.constant dense<0.000000e+00> : vector<16x16xf32>
    %329 = tpu.matmul %328, %2, %cst_229 {dimension_numbers = #tpu.dot_dimension_numbers<[1], [0], [0], [1], [0, 0, 1, 1], [], []>} : vector<16x32xbf16>, vector<32x16xbf16>, vector<16x16xf32> -> vector<16x16xf32>
    %330 = vector.broadcast %3 : vector<1x16xf32> to vector<16x16xf32>
    %331 = arith.addf %329, %330 : vector<16x16xf32>
    %c12 = arith.constant 12 : index
    %c0_230 = arith.constant 0 : index
    %c0_231 = arith.constant 0 : index
    %332 = vector.load %arg3[%c12, %c0_230, %c0_231] : memref<24x1x32xf32, #tpu.memory_space<vmem>>, vector<1x1x32xf32>
    %333 = vector.shape_cast %332 : vector<1x1x32xf32> to vector<1x32xf32>
    %334 = vector.broadcast %1 : vector<16x1xf32> to vector<16x32xf32>
    %335 = vector.broadcast %333 : vector<1x32xf32> to vector<16x32xf32>
    %336 = arith.addf %334, %335 : vector<16x32xf32>
    %cst_232 = arith.constant 0.000000e+00 : f32
    %337 = vector.broadcast %cst_232 : f32 to vector<16x32xf32>
    %338 = arith.maximumf %336, %337 : vector<16x32xf32>
    %339 = arith.truncf %338 : vector<16x32xf32> to vector<16x32xbf16>
    %c0_233 = arith.constant 0 : index
    %c0_234 = arith.constant 0 : index
    %c0_235 = arith.constant 0 : index
    %340 = vector.load %arg4[%c0_233, %c0_234, %c0_235] : memref<3x32x32xbf16, #tpu.memory_space<vmem>>, vector<1x32x32xbf16>
    %341 = vector.shape_cast %340 : vector<1x32x32xbf16> to vector<32x32xbf16>
    %cst_236 = arith.constant dense<0.000000e+00> : vector<16x32xf32>
    %342 = tpu.matmul %339, %341, %cst_236 {dimension_numbers = #tpu.dot_dimension_numbers<[1], [0], [0], [1], [0, 0, 1, 1], [], []>} : vector<16x32xbf16>, vector<32x32xbf16>, vector<16x32xf32> -> vector<16x32xf32>
    %c0_237 = arith.constant 0 : index
    %c0_238 = arith.constant 0 : index
    %c0_239 = arith.constant 0 : index
    %343 = vector.load %arg5[%c0_237, %c0_238, %c0_239] : memref<3x1x32xf32, #tpu.memory_space<vmem>>, vector<1x1x32xf32>
    %344 = vector.shape_cast %343 : vector<1x1x32xf32> to vector<1x32xf32>
    %345 = vector.broadcast %344 : vector<1x32xf32> to vector<16x32xf32>
    %346 = arith.addf %342, %345 : vector<16x32xf32>
    %cst_240 = arith.constant 0.000000e+00 : f32
    %347 = vector.broadcast %cst_240 : f32 to vector<16x32xf32>
    %348 = arith.maximumf %346, %347 : vector<16x32xf32>
    %349 = arith.truncf %348 : vector<16x32xf32> to vector<16x32xbf16>
    %c0_241 = arith.constant 0 : index
    %c0_242 = arith.constant 0 : index
    %c0_243 = arith.constant 0 : index
    %350 = vector.load %arg6[%c0_241, %c0_242, %c0_243] : memref<3x32x32xbf16, #tpu.memory_space<vmem>>, vector<1x32x32xbf16>
    %351 = vector.shape_cast %350 : vector<1x32x32xbf16> to vector<32x32xbf16>
    %cst_244 = arith.constant dense<0.000000e+00> : vector<16x32xf32>
    %352 = tpu.matmul %349, %351, %cst_244 {dimension_numbers = #tpu.dot_dimension_numbers<[1], [0], [0], [1], [0, 0, 1, 1], [], []>} : vector<16x32xbf16>, vector<32x32xbf16>, vector<16x32xf32> -> vector<16x32xf32>
    %c0_245 = arith.constant 0 : index
    %c0_246 = arith.constant 0 : index
    %c0_247 = arith.constant 0 : index
    %353 = vector.load %arg7[%c0_245, %c0_246, %c0_247] : memref<3x1x32xf32, #tpu.memory_space<vmem>>, vector<1x1x32xf32>
    %354 = vector.shape_cast %353 : vector<1x1x32xf32> to vector<1x32xf32>
    %355 = vector.broadcast %354 : vector<1x32xf32> to vector<16x32xf32>
    %356 = arith.addf %352, %355 : vector<16x32xf32>
    %357 = arith.addf %336, %356 : vector<16x32xf32>
    %c13 = arith.constant 13 : index
    %c0_248 = arith.constant 0 : index
    %c0_249 = arith.constant 0 : index
    %358 = vector.load %arg3[%c13, %c0_248, %c0_249] : memref<24x1x32xf32, #tpu.memory_space<vmem>>, vector<1x1x32xf32>
    %359 = vector.shape_cast %358 : vector<1x1x32xf32> to vector<1x32xf32>
    %360 = vector.broadcast %359 : vector<1x32xf32> to vector<16x32xf32>
    %361 = arith.addf %357, %360 : vector<16x32xf32>
    %cst_250 = arith.constant 0.000000e+00 : f32
    %362 = vector.broadcast %cst_250 : f32 to vector<16x32xf32>
    %363 = arith.maximumf %361, %362 : vector<16x32xf32>
    %364 = arith.truncf %363 : vector<16x32xf32> to vector<16x32xbf16>
    %c1_251 = arith.constant 1 : index
    %c0_252 = arith.constant 0 : index
    %c0_253 = arith.constant 0 : index
    %365 = vector.load %arg4[%c1_251, %c0_252, %c0_253] : memref<3x32x32xbf16, #tpu.memory_space<vmem>>, vector<1x32x32xbf16>
    %366 = vector.shape_cast %365 : vector<1x32x32xbf16> to vector<32x32xbf16>
    %cst_254 = arith.constant dense<0.000000e+00> : vector<16x32xf32>
    %367 = tpu.matmul %364, %366, %cst_254 {dimension_numbers = #tpu.dot_dimension_numbers<[1], [0], [0], [1], [0, 0, 1, 1], [], []>} : vector<16x32xbf16>, vector<32x32xbf16>, vector<16x32xf32> -> vector<16x32xf32>
    %c1_255 = arith.constant 1 : index
    %c0_256 = arith.constant 0 : index
    %c0_257 = arith.constant 0 : index
    %368 = vector.load %arg5[%c1_255, %c0_256, %c0_257] : memref<3x1x32xf32, #tpu.memory_space<vmem>>, vector<1x1x32xf32>
    %369 = vector.shape_cast %368 : vector<1x1x32xf32> to vector<1x32xf32>
    %370 = vector.broadcast %369 : vector<1x32xf32> to vector<16x32xf32>
    %371 = arith.addf %367, %370 : vector<16x32xf32>
    %cst_258 = arith.constant 0.000000e+00 : f32
    %372 = vector.broadcast %cst_258 : f32 to vector<16x32xf32>
    %373 = arith.maximumf %371, %372 : vector<16x32xf32>
    %374 = arith.truncf %373 : vector<16x32xf32> to vector<16x32xbf16>
    %c1_259 = arith.constant 1 : index
    %c0_260 = arith.constant 0 : index
    %c0_261 = arith.constant 0 : index
    %375 = vector.load %arg6[%c1_259, %c0_260, %c0_261] : memref<3x32x32xbf16, #tpu.memory_space<vmem>>, vector<1x32x32xbf16>
    %376 = vector.shape_cast %375 : vector<1x32x32xbf16> to vector<32x32xbf16>
    %cst_262 = arith.constant dense<0.000000e+00> : vector<16x32xf32>
    %377 = tpu.matmul %374, %376, %cst_262 {dimension_numbers = #tpu.dot_dimension_numbers<[1], [0], [0], [1], [0, 0, 1, 1], [], []>} : vector<16x32xbf16>, vector<32x32xbf16>, vector<16x32xf32> -> vector<16x32xf32>
    %c1_263 = arith.constant 1 : index
    %c0_264 = arith.constant 0 : index
    %c0_265 = arith.constant 0 : index
    %378 = vector.load %arg7[%c1_263, %c0_264, %c0_265] : memref<3x1x32xf32, #tpu.memory_space<vmem>>, vector<1x1x32xf32>
    %379 = vector.shape_cast %378 : vector<1x1x32xf32> to vector<1x32xf32>
    %380 = vector.broadcast %379 : vector<1x32xf32> to vector<16x32xf32>
    %381 = arith.addf %377, %380 : vector<16x32xf32>
    %382 = arith.addf %361, %381 : vector<16x32xf32>
    %c14 = arith.constant 14 : index
    %c0_266 = arith.constant 0 : index
    %c0_267 = arith.constant 0 : index
    %383 = vector.load %arg3[%c14, %c0_266, %c0_267] : memref<24x1x32xf32, #tpu.memory_space<vmem>>, vector<1x1x32xf32>
    %384 = vector.shape_cast %383 : vector<1x1x32xf32> to vector<1x32xf32>
    %385 = vector.broadcast %384 : vector<1x32xf32> to vector<16x32xf32>
    %386 = arith.addf %382, %385 : vector<16x32xf32>
    %cst_268 = arith.constant 0.000000e+00 : f32
    %387 = vector.broadcast %cst_268 : f32 to vector<16x32xf32>
    %388 = arith.maximumf %386, %387 : vector<16x32xf32>
    %389 = arith.truncf %388 : vector<16x32xf32> to vector<16x32xbf16>
    %c2_269 = arith.constant 2 : index
    %c0_270 = arith.constant 0 : index
    %c0_271 = arith.constant 0 : index
    %390 = vector.load %arg4[%c2_269, %c0_270, %c0_271] : memref<3x32x32xbf16, #tpu.memory_space<vmem>>, vector<1x32x32xbf16>
    %391 = vector.shape_cast %390 : vector<1x32x32xbf16> to vector<32x32xbf16>
    %cst_272 = arith.constant dense<0.000000e+00> : vector<16x32xf32>
    %392 = tpu.matmul %389, %391, %cst_272 {dimension_numbers = #tpu.dot_dimension_numbers<[1], [0], [0], [1], [0, 0, 1, 1], [], []>} : vector<16x32xbf16>, vector<32x32xbf16>, vector<16x32xf32> -> vector<16x32xf32>
    %c2_273 = arith.constant 2 : index
    %c0_274 = arith.constant 0 : index
    %c0_275 = arith.constant 0 : index
    %393 = vector.load %arg5[%c2_273, %c0_274, %c0_275] : memref<3x1x32xf32, #tpu.memory_space<vmem>>, vector<1x1x32xf32>
    %394 = vector.shape_cast %393 : vector<1x1x32xf32> to vector<1x32xf32>
    %395 = vector.broadcast %394 : vector<1x32xf32> to vector<16x32xf32>
    %396 = arith.addf %392, %395 : vector<16x32xf32>
    %cst_276 = arith.constant 0.000000e+00 : f32
    %397 = vector.broadcast %cst_276 : f32 to vector<16x32xf32>
    %398 = arith.maximumf %396, %397 : vector<16x32xf32>
    %399 = arith.truncf %398 : vector<16x32xf32> to vector<16x32xbf16>
    %c2_277 = arith.constant 2 : index
    %c0_278 = arith.constant 0 : index
    %c0_279 = arith.constant 0 : index
    %400 = vector.load %arg6[%c2_277, %c0_278, %c0_279] : memref<3x32x32xbf16, #tpu.memory_space<vmem>>, vector<1x32x32xbf16>
    %401 = vector.shape_cast %400 : vector<1x32x32xbf16> to vector<32x32xbf16>
    %cst_280 = arith.constant dense<0.000000e+00> : vector<16x32xf32>
    %402 = tpu.matmul %399, %401, %cst_280 {dimension_numbers = #tpu.dot_dimension_numbers<[1], [0], [0], [1], [0, 0, 1, 1], [], []>} : vector<16x32xbf16>, vector<32x32xbf16>, vector<16x32xf32> -> vector<16x32xf32>
    %c2_281 = arith.constant 2 : index
    %c0_282 = arith.constant 0 : index
    %c0_283 = arith.constant 0 : index
    %403 = vector.load %arg7[%c2_281, %c0_282, %c0_283] : memref<3x1x32xf32, #tpu.memory_space<vmem>>, vector<1x1x32xf32>
    %404 = vector.shape_cast %403 : vector<1x1x32xf32> to vector<1x32xf32>
    %405 = vector.broadcast %404 : vector<1x32xf32> to vector<16x32xf32>
    %406 = arith.addf %402, %405 : vector<16x32xf32>
    %407 = arith.addf %386, %406 : vector<16x32xf32>
    %cst_284 = arith.constant 0.000000e+00 : f32
    %408 = vector.broadcast %cst_284 : f32 to vector<16x32xf32>
    %409 = arith.maximumf %407, %408 : vector<16x32xf32>
    %410 = arith.truncf %409 : vector<16x32xf32> to vector<16x32xbf16>
    %cst_285 = arith.constant dense<0.000000e+00> : vector<16x16xf32>
    %411 = tpu.matmul %410, %2, %cst_285 {dimension_numbers = #tpu.dot_dimension_numbers<[1], [0], [0], [1], [0, 0, 1, 1], [], []>} : vector<16x32xbf16>, vector<32x16xbf16>, vector<16x16xf32> -> vector<16x16xf32>
    %412 = vector.broadcast %3 : vector<1x16xf32> to vector<16x16xf32>
    %413 = arith.addf %411, %412 : vector<16x16xf32>
    %c15 = arith.constant 15 : index
    %c0_286 = arith.constant 0 : index
    %c0_287 = arith.constant 0 : index
    %414 = vector.load %arg3[%c15, %c0_286, %c0_287] : memref<24x1x32xf32, #tpu.memory_space<vmem>>, vector<1x1x32xf32>
    %415 = vector.shape_cast %414 : vector<1x1x32xf32> to vector<1x32xf32>
    %416 = vector.broadcast %1 : vector<16x1xf32> to vector<16x32xf32>
    %417 = vector.broadcast %415 : vector<1x32xf32> to vector<16x32xf32>
    %418 = arith.addf %416, %417 : vector<16x32xf32>
    %cst_288 = arith.constant 0.000000e+00 : f32
    %419 = vector.broadcast %cst_288 : f32 to vector<16x32xf32>
    %420 = arith.maximumf %418, %419 : vector<16x32xf32>
    %421 = arith.truncf %420 : vector<16x32xf32> to vector<16x32xbf16>
    %c0_289 = arith.constant 0 : index
    %c0_290 = arith.constant 0 : index
    %c0_291 = arith.constant 0 : index
    %422 = vector.load %arg4[%c0_289, %c0_290, %c0_291] : memref<3x32x32xbf16, #tpu.memory_space<vmem>>, vector<1x32x32xbf16>
    %423 = vector.shape_cast %422 : vector<1x32x32xbf16> to vector<32x32xbf16>
    %cst_292 = arith.constant dense<0.000000e+00> : vector<16x32xf32>
    %424 = tpu.matmul %421, %423, %cst_292 {dimension_numbers = #tpu.dot_dimension_numbers<[1], [0], [0], [1], [0, 0, 1, 1], [], []>} : vector<16x32xbf16>, vector<32x32xbf16>, vector<16x32xf32> -> vector<16x32xf32>
    %c0_293 = arith.constant 0 : index
    %c0_294 = arith.constant 0 : index
    %c0_295 = arith.constant 0 : index
    %425 = vector.load %arg5[%c0_293, %c0_294, %c0_295] : memref<3x1x32xf32, #tpu.memory_space<vmem>>, vector<1x1x32xf32>
    %426 = vector.shape_cast %425 : vector<1x1x32xf32> to vector<1x32xf32>
    %427 = vector.broadcast %426 : vector<1x32xf32> to vector<16x32xf32>
    %428 = arith.addf %424, %427 : vector<16x32xf32>
    %cst_296 = arith.constant 0.000000e+00 : f32
    %429 = vector.broadcast %cst_296 : f32 to vector<16x32xf32>
    %430 = arith.maximumf %428, %429 : vector<16x32xf32>
    %431 = arith.truncf %430 : vector<16x32xf32> to vector<16x32xbf16>
    %c0_297 = arith.constant 0 : index
    %c0_298 = arith.constant 0 : index
    %c0_299 = arith.constant 0 : index
    %432 = vector.load %arg6[%c0_297, %c0_298, %c0_299] : memref<3x32x32xbf16, #tpu.memory_space<vmem>>, vector<1x32x32xbf16>
    %433 = vector.shape_cast %432 : vector<1x32x32xbf16> to vector<32x32xbf16>
    %cst_300 = arith.constant dense<0.000000e+00> : vector<16x32xf32>
    %434 = tpu.matmul %431, %433, %cst_300 {dimension_numbers = #tpu.dot_dimension_numbers<[1], [0], [0], [1], [0, 0, 1, 1], [], []>} : vector<16x32xbf16>, vector<32x32xbf16>, vector<16x32xf32> -> vector<16x32xf32>
    %c0_301 = arith.constant 0 : index
    %c0_302 = arith.constant 0 : index
    %c0_303 = arith.constant 0 : index
    %435 = vector.load %arg7[%c0_301, %c0_302, %c0_303] : memref<3x1x32xf32, #tpu.memory_space<vmem>>, vector<1x1x32xf32>
    %436 = vector.shape_cast %435 : vector<1x1x32xf32> to vector<1x32xf32>
    %437 = vector.broadcast %436 : vector<1x32xf32> to vector<16x32xf32>
    %438 = arith.addf %434, %437 : vector<16x32xf32>
    %439 = arith.addf %418, %438 : vector<16x32xf32>
    %c16 = arith.constant 16 : index
    %c0_304 = arith.constant 0 : index
    %c0_305 = arith.constant 0 : index
    %440 = vector.load %arg3[%c16, %c0_304, %c0_305] : memref<24x1x32xf32, #tpu.memory_space<vmem>>, vector<1x1x32xf32>
    %441 = vector.shape_cast %440 : vector<1x1x32xf32> to vector<1x32xf32>
    %442 = vector.broadcast %441 : vector<1x32xf32> to vector<16x32xf32>
    %443 = arith.addf %439, %442 : vector<16x32xf32>
    %cst_306 = arith.constant 0.000000e+00 : f32
    %444 = vector.broadcast %cst_306 : f32 to vector<16x32xf32>
    %445 = arith.maximumf %443, %444 : vector<16x32xf32>
    %446 = arith.truncf %445 : vector<16x32xf32> to vector<16x32xbf16>
    %c1_307 = arith.constant 1 : index
    %c0_308 = arith.constant 0 : index
    %c0_309 = arith.constant 0 : index
    %447 = vector.load %arg4[%c1_307, %c0_308, %c0_309] : memref<3x32x32xbf16, #tpu.memory_space<vmem>>, vector<1x32x32xbf16>
    %448 = vector.shape_cast %447 : vector<1x32x32xbf16> to vector<32x32xbf16>
    %cst_310 = arith.constant dense<0.000000e+00> : vector<16x32xf32>
    %449 = tpu.matmul %446, %448, %cst_310 {dimension_numbers = #tpu.dot_dimension_numbers<[1], [0], [0], [1], [0, 0, 1, 1], [], []>} : vector<16x32xbf16>, vector<32x32xbf16>, vector<16x32xf32> -> vector<16x32xf32>
    %c1_311 = arith.constant 1 : index
    %c0_312 = arith.constant 0 : index
    %c0_313 = arith.constant 0 : index
    %450 = vector.load %arg5[%c1_311, %c0_312, %c0_313] : memref<3x1x32xf32, #tpu.memory_space<vmem>>, vector<1x1x32xf32>
    %451 = vector.shape_cast %450 : vector<1x1x32xf32> to vector<1x32xf32>
    %452 = vector.broadcast %451 : vector<1x32xf32> to vector<16x32xf32>
    %453 = arith.addf %449, %452 : vector<16x32xf32>
    %cst_314 = arith.constant 0.000000e+00 : f32
    %454 = vector.broadcast %cst_314 : f32 to vector<16x32xf32>
    %455 = arith.maximumf %453, %454 : vector<16x32xf32>
    %456 = arith.truncf %455 : vector<16x32xf32> to vector<16x32xbf16>
    %c1_315 = arith.constant 1 : index
    %c0_316 = arith.constant 0 : index
    %c0_317 = arith.constant 0 : index
    %457 = vector.load %arg6[%c1_315, %c0_316, %c0_317] : memref<3x32x32xbf16, #tpu.memory_space<vmem>>, vector<1x32x32xbf16>
    %458 = vector.shape_cast %457 : vector<1x32x32xbf16> to vector<32x32xbf16>
    %cst_318 = arith.constant dense<0.000000e+00> : vector<16x32xf32>
    %459 = tpu.matmul %456, %458, %cst_318 {dimension_numbers = #tpu.dot_dimension_numbers<[1], [0], [0], [1], [0, 0, 1, 1], [], []>} : vector<16x32xbf16>, vector<32x32xbf16>, vector<16x32xf32> -> vector<16x32xf32>
    %c1_319 = arith.constant 1 : index
    %c0_320 = arith.constant 0 : index
    %c0_321 = arith.constant 0 : index
    %460 = vector.load %arg7[%c1_319, %c0_320, %c0_321] : memref<3x1x32xf32, #tpu.memory_space<vmem>>, vector<1x1x32xf32>
    %461 = vector.shape_cast %460 : vector<1x1x32xf32> to vector<1x32xf32>
    %462 = vector.broadcast %461 : vector<1x32xf32> to vector<16x32xf32>
    %463 = arith.addf %459, %462 : vector<16x32xf32>
    %464 = arith.addf %443, %463 : vector<16x32xf32>
    %c17 = arith.constant 17 : index
    %c0_322 = arith.constant 0 : index
    %c0_323 = arith.constant 0 : index
    %465 = vector.load %arg3[%c17, %c0_322, %c0_323] : memref<24x1x32xf32, #tpu.memory_space<vmem>>, vector<1x1x32xf32>
    %466 = vector.shape_cast %465 : vector<1x1x32xf32> to vector<1x32xf32>
    %467 = vector.broadcast %466 : vector<1x32xf32> to vector<16x32xf32>
    %468 = arith.addf %464, %467 : vector<16x32xf32>
    %cst_324 = arith.constant 0.000000e+00 : f32
    %469 = vector.broadcast %cst_324 : f32 to vector<16x32xf32>
    %470 = arith.maximumf %468, %469 : vector<16x32xf32>
    %471 = arith.truncf %470 : vector<16x32xf32> to vector<16x32xbf16>
    %c2_325 = arith.constant 2 : index
    %c0_326 = arith.constant 0 : index
    %c0_327 = arith.constant 0 : index
    %472 = vector.load %arg4[%c2_325, %c0_326, %c0_327] : memref<3x32x32xbf16, #tpu.memory_space<vmem>>, vector<1x32x32xbf16>
    %473 = vector.shape_cast %472 : vector<1x32x32xbf16> to vector<32x32xbf16>
    %cst_328 = arith.constant dense<0.000000e+00> : vector<16x32xf32>
    %474 = tpu.matmul %471, %473, %cst_328 {dimension_numbers = #tpu.dot_dimension_numbers<[1], [0], [0], [1], [0, 0, 1, 1], [], []>} : vector<16x32xbf16>, vector<32x32xbf16>, vector<16x32xf32> -> vector<16x32xf32>
    %c2_329 = arith.constant 2 : index
    %c0_330 = arith.constant 0 : index
    %c0_331 = arith.constant 0 : index
    %475 = vector.load %arg5[%c2_329, %c0_330, %c0_331] : memref<3x1x32xf32, #tpu.memory_space<vmem>>, vector<1x1x32xf32>
    %476 = vector.shape_cast %475 : vector<1x1x32xf32> to vector<1x32xf32>
    %477 = vector.broadcast %476 : vector<1x32xf32> to vector<16x32xf32>
    %478 = arith.addf %474, %477 : vector<16x32xf32>
    %cst_332 = arith.constant 0.000000e+00 : f32
    %479 = vector.broadcast %cst_332 : f32 to vector<16x32xf32>
    %480 = arith.maximumf %478, %479 : vector<16x32xf32>
    %481 = arith.truncf %480 : vector<16x32xf32> to vector<16x32xbf16>
    %c2_333 = arith.constant 2 : index
    %c0_334 = arith.constant 0 : index
    %c0_335 = arith.constant 0 : index
    %482 = vector.load %arg6[%c2_333, %c0_334, %c0_335] : memref<3x32x32xbf16, #tpu.memory_space<vmem>>, vector<1x32x32xbf16>
    %483 = vector.shape_cast %482 : vector<1x32x32xbf16> to vector<32x32xbf16>
    %cst_336 = arith.constant dense<0.000000e+00> : vector<16x32xf32>
    %484 = tpu.matmul %481, %483, %cst_336 {dimension_numbers = #tpu.dot_dimension_numbers<[1], [0], [0], [1], [0, 0, 1, 1], [], []>} : vector<16x32xbf16>, vector<32x32xbf16>, vector<16x32xf32> -> vector<16x32xf32>
    %c2_337 = arith.constant 2 : index
    %c0_338 = arith.constant 0 : index
    %c0_339 = arith.constant 0 : index
    %485 = vector.load %arg7[%c2_337, %c0_338, %c0_339] : memref<3x1x32xf32, #tpu.memory_space<vmem>>, vector<1x1x32xf32>
    %486 = vector.shape_cast %485 : vector<1x1x32xf32> to vector<1x32xf32>
    %487 = vector.broadcast %486 : vector<1x32xf32> to vector<16x32xf32>
    %488 = arith.addf %484, %487 : vector<16x32xf32>
    %489 = arith.addf %468, %488 : vector<16x32xf32>
    %cst_340 = arith.constant 0.000000e+00 : f32
    %490 = vector.broadcast %cst_340 : f32 to vector<16x32xf32>
    %491 = arith.maximumf %489, %490 : vector<16x32xf32>
    %492 = arith.truncf %491 : vector<16x32xf32> to vector<16x32xbf16>
    %cst_341 = arith.constant dense<0.000000e+00> : vector<16x16xf32>
    %493 = tpu.matmul %492, %2, %cst_341 {dimension_numbers = #tpu.dot_dimension_numbers<[1], [0], [0], [1], [0, 0, 1, 1], [], []>} : vector<16x32xbf16>, vector<32x16xbf16>, vector<16x16xf32> -> vector<16x16xf32>
    %494 = vector.broadcast %3 : vector<1x16xf32> to vector<16x16xf32>
    %495 = arith.addf %493, %494 : vector<16x16xf32>
    %c18 = arith.constant 18 : index
    %c0_342 = arith.constant 0 : index
    %c0_343 = arith.constant 0 : index
    %496 = vector.load %arg3[%c18, %c0_342, %c0_343] : memref<24x1x32xf32, #tpu.memory_space<vmem>>, vector<1x1x32xf32>
    %497 = vector.shape_cast %496 : vector<1x1x32xf32> to vector<1x32xf32>
    %498 = vector.broadcast %1 : vector<16x1xf32> to vector<16x32xf32>
    %499 = vector.broadcast %497 : vector<1x32xf32> to vector<16x32xf32>
    %500 = arith.addf %498, %499 : vector<16x32xf32>
    %cst_344 = arith.constant 0.000000e+00 : f32
    %501 = vector.broadcast %cst_344 : f32 to vector<16x32xf32>
    %502 = arith.maximumf %500, %501 : vector<16x32xf32>
    %503 = arith.truncf %502 : vector<16x32xf32> to vector<16x32xbf16>
    %c0_345 = arith.constant 0 : index
    %c0_346 = arith.constant 0 : index
    %c0_347 = arith.constant 0 : index
    %504 = vector.load %arg4[%c0_345, %c0_346, %c0_347] : memref<3x32x32xbf16, #tpu.memory_space<vmem>>, vector<1x32x32xbf16>
    %505 = vector.shape_cast %504 : vector<1x32x32xbf16> to vector<32x32xbf16>
    %cst_348 = arith.constant dense<0.000000e+00> : vector<16x32xf32>
    %506 = tpu.matmul %503, %505, %cst_348 {dimension_numbers = #tpu.dot_dimension_numbers<[1], [0], [0], [1], [0, 0, 1, 1], [], []>} : vector<16x32xbf16>, vector<32x32xbf16>, vector<16x32xf32> -> vector<16x32xf32>
    %c0_349 = arith.constant 0 : index
    %c0_350 = arith.constant 0 : index
    %c0_351 = arith.constant 0 : index
    %507 = vector.load %arg5[%c0_349, %c0_350, %c0_351] : memref<3x1x32xf32, #tpu.memory_space<vmem>>, vector<1x1x32xf32>
    %508 = vector.shape_cast %507 : vector<1x1x32xf32> to vector<1x32xf32>
    %509 = vector.broadcast %508 : vector<1x32xf32> to vector<16x32xf32>
    %510 = arith.addf %506, %509 : vector<16x32xf32>
    %cst_352 = arith.constant 0.000000e+00 : f32
    %511 = vector.broadcast %cst_352 : f32 to vector<16x32xf32>
    %512 = arith.maximumf %510, %511 : vector<16x32xf32>
    %513 = arith.truncf %512 : vector<16x32xf32> to vector<16x32xbf16>
    %c0_353 = arith.constant 0 : index
    %c0_354 = arith.constant 0 : index
    %c0_355 = arith.constant 0 : index
    %514 = vector.load %arg6[%c0_353, %c0_354, %c0_355] : memref<3x32x32xbf16, #tpu.memory_space<vmem>>, vector<1x32x32xbf16>
    %515 = vector.shape_cast %514 : vector<1x32x32xbf16> to vector<32x32xbf16>
    %cst_356 = arith.constant dense<0.000000e+00> : vector<16x32xf32>
    %516 = tpu.matmul %513, %515, %cst_356 {dimension_numbers = #tpu.dot_dimension_numbers<[1], [0], [0], [1], [0, 0, 1, 1], [], []>} : vector<16x32xbf16>, vector<32x32xbf16>, vector<16x32xf32> -> vector<16x32xf32>
    %c0_357 = arith.constant 0 : index
    %c0_358 = arith.constant 0 : index
    %c0_359 = arith.constant 0 : index
    %517 = vector.load %arg7[%c0_357, %c0_358, %c0_359] : memref<3x1x32xf32, #tpu.memory_space<vmem>>, vector<1x1x32xf32>
    %518 = vector.shape_cast %517 : vector<1x1x32xf32> to vector<1x32xf32>
    %519 = vector.broadcast %518 : vector<1x32xf32> to vector<16x32xf32>
    %520 = arith.addf %516, %519 : vector<16x32xf32>
    %521 = arith.addf %500, %520 : vector<16x32xf32>
    %c19 = arith.constant 19 : index
    %c0_360 = arith.constant 0 : index
    %c0_361 = arith.constant 0 : index
    %522 = vector.load %arg3[%c19, %c0_360, %c0_361] : memref<24x1x32xf32, #tpu.memory_space<vmem>>, vector<1x1x32xf32>
    %523 = vector.shape_cast %522 : vector<1x1x32xf32> to vector<1x32xf32>
    %524 = vector.broadcast %523 : vector<1x32xf32> to vector<16x32xf32>
    %525 = arith.addf %521, %524 : vector<16x32xf32>
    %cst_362 = arith.constant 0.000000e+00 : f32
    %526 = vector.broadcast %cst_362 : f32 to vector<16x32xf32>
    %527 = arith.maximumf %525, %526 : vector<16x32xf32>
    %528 = arith.truncf %527 : vector<16x32xf32> to vector<16x32xbf16>
    %c1_363 = arith.constant 1 : index
    %c0_364 = arith.constant 0 : index
    %c0_365 = arith.constant 0 : index
    %529 = vector.load %arg4[%c1_363, %c0_364, %c0_365] : memref<3x32x32xbf16, #tpu.memory_space<vmem>>, vector<1x32x32xbf16>
    %530 = vector.shape_cast %529 : vector<1x32x32xbf16> to vector<32x32xbf16>
    %cst_366 = arith.constant dense<0.000000e+00> : vector<16x32xf32>
    %531 = tpu.matmul %528, %530, %cst_366 {dimension_numbers = #tpu.dot_dimension_numbers<[1], [0], [0], [1], [0, 0, 1, 1], [], []>} : vector<16x32xbf16>, vector<32x32xbf16>, vector<16x32xf32> -> vector<16x32xf32>
    %c1_367 = arith.constant 1 : index
    %c0_368 = arith.constant 0 : index
    %c0_369 = arith.constant 0 : index
    %532 = vector.load %arg5[%c1_367, %c0_368, %c0_369] : memref<3x1x32xf32, #tpu.memory_space<vmem>>, vector<1x1x32xf32>
    %533 = vector.shape_cast %532 : vector<1x1x32xf32> to vector<1x32xf32>
    %534 = vector.broadcast %533 : vector<1x32xf32> to vector<16x32xf32>
    %535 = arith.addf %531, %534 : vector<16x32xf32>
    %cst_370 = arith.constant 0.000000e+00 : f32
    %536 = vector.broadcast %cst_370 : f32 to vector<16x32xf32>
    %537 = arith.maximumf %535, %536 : vector<16x32xf32>
    %538 = arith.truncf %537 : vector<16x32xf32> to vector<16x32xbf16>
    %c1_371 = arith.constant 1 : index
    %c0_372 = arith.constant 0 : index
    %c0_373 = arith.constant 0 : index
    %539 = vector.load %arg6[%c1_371, %c0_372, %c0_373] : memref<3x32x32xbf16, #tpu.memory_space<vmem>>, vector<1x32x32xbf16>
    %540 = vector.shape_cast %539 : vector<1x32x32xbf16> to vector<32x32xbf16>
    %cst_374 = arith.constant dense<0.000000e+00> : vector<16x32xf32>
    %541 = tpu.matmul %538, %540, %cst_374 {dimension_numbers = #tpu.dot_dimension_numbers<[1], [0], [0], [1], [0, 0, 1, 1], [], []>} : vector<16x32xbf16>, vector<32x32xbf16>, vector<16x32xf32> -> vector<16x32xf32>
    %c1_375 = arith.constant 1 : index
    %c0_376 = arith.constant 0 : index
    %c0_377 = arith.constant 0 : index
    %542 = vector.load %arg7[%c1_375, %c0_376, %c0_377] : memref<3x1x32xf32, #tpu.memory_space<vmem>>, vector<1x1x32xf32>
    %543 = vector.shape_cast %542 : vector<1x1x32xf32> to vector<1x32xf32>
    %544 = vector.broadcast %543 : vector<1x32xf32> to vector<16x32xf32>
    %545 = arith.addf %541, %544 : vector<16x32xf32>
    %546 = arith.addf %525, %545 : vector<16x32xf32>
    %c20 = arith.constant 20 : index
    %c0_378 = arith.constant 0 : index
    %c0_379 = arith.constant 0 : index
    %547 = vector.load %arg3[%c20, %c0_378, %c0_379] : memref<24x1x32xf32, #tpu.memory_space<vmem>>, vector<1x1x32xf32>
    %548 = vector.shape_cast %547 : vector<1x1x32xf32> to vector<1x32xf32>
    %549 = vector.broadcast %548 : vector<1x32xf32> to vector<16x32xf32>
    %550 = arith.addf %546, %549 : vector<16x32xf32>
    %cst_380 = arith.constant 0.000000e+00 : f32
    %551 = vector.broadcast %cst_380 : f32 to vector<16x32xf32>
    %552 = arith.maximumf %550, %551 : vector<16x32xf32>
    %553 = arith.truncf %552 : vector<16x32xf32> to vector<16x32xbf16>
    %c2_381 = arith.constant 2 : index
    %c0_382 = arith.constant 0 : index
    %c0_383 = arith.constant 0 : index
    %554 = vector.load %arg4[%c2_381, %c0_382, %c0_383] : memref<3x32x32xbf16, #tpu.memory_space<vmem>>, vector<1x32x32xbf16>
    %555 = vector.shape_cast %554 : vector<1x32x32xbf16> to vector<32x32xbf16>
    %cst_384 = arith.constant dense<0.000000e+00> : vector<16x32xf32>
    %556 = tpu.matmul %553, %555, %cst_384 {dimension_numbers = #tpu.dot_dimension_numbers<[1], [0], [0], [1], [0, 0, 1, 1], [], []>} : vector<16x32xbf16>, vector<32x32xbf16>, vector<16x32xf32> -> vector<16x32xf32>
    %c2_385 = arith.constant 2 : index
    %c0_386 = arith.constant 0 : index
    %c0_387 = arith.constant 0 : index
    %557 = vector.load %arg5[%c2_385, %c0_386, %c0_387] : memref<3x1x32xf32, #tpu.memory_space<vmem>>, vector<1x1x32xf32>
    %558 = vector.shape_cast %557 : vector<1x1x32xf32> to vector<1x32xf32>
    %559 = vector.broadcast %558 : vector<1x32xf32> to vector<16x32xf32>
    %560 = arith.addf %556, %559 : vector<16x32xf32>
    %cst_388 = arith.constant 0.000000e+00 : f32
    %561 = vector.broadcast %cst_388 : f32 to vector<16x32xf32>
    %562 = arith.maximumf %560, %561 : vector<16x32xf32>
    %563 = arith.truncf %562 : vector<16x32xf32> to vector<16x32xbf16>
    %c2_389 = arith.constant 2 : index
    %c0_390 = arith.constant 0 : index
    %c0_391 = arith.constant 0 : index
    %564 = vector.load %arg6[%c2_389, %c0_390, %c0_391] : memref<3x32x32xbf16, #tpu.memory_space<vmem>>, vector<1x32x32xbf16>
    %565 = vector.shape_cast %564 : vector<1x32x32xbf16> to vector<32x32xbf16>
    %cst_392 = arith.constant dense<0.000000e+00> : vector<16x32xf32>
    %566 = tpu.matmul %563, %565, %cst_392 {dimension_numbers = #tpu.dot_dimension_numbers<[1], [0], [0], [1], [0, 0, 1, 1], [], []>} : vector<16x32xbf16>, vector<32x32xbf16>, vector<16x32xf32> -> vector<16x32xf32>
    %c2_393 = arith.constant 2 : index
    %c0_394 = arith.constant 0 : index
    %c0_395 = arith.constant 0 : index
    %567 = vector.load %arg7[%c2_393, %c0_394, %c0_395] : memref<3x1x32xf32, #tpu.memory_space<vmem>>, vector<1x1x32xf32>
    %568 = vector.shape_cast %567 : vector<1x1x32xf32> to vector<1x32xf32>
    %569 = vector.broadcast %568 : vector<1x32xf32> to vector<16x32xf32>
    %570 = arith.addf %566, %569 : vector<16x32xf32>
    %571 = arith.addf %550, %570 : vector<16x32xf32>
    %cst_396 = arith.constant 0.000000e+00 : f32
    %572 = vector.broadcast %cst_396 : f32 to vector<16x32xf32>
    %573 = arith.maximumf %571, %572 : vector<16x32xf32>
    %574 = arith.truncf %573 : vector<16x32xf32> to vector<16x32xbf16>
    %cst_397 = arith.constant dense<0.000000e+00> : vector<16x16xf32>
    %575 = tpu.matmul %574, %2, %cst_397 {dimension_numbers = #tpu.dot_dimension_numbers<[1], [0], [0], [1], [0, 0, 1, 1], [], []>} : vector<16x32xbf16>, vector<32x16xbf16>, vector<16x16xf32> -> vector<16x16xf32>
    %576 = vector.broadcast %3 : vector<1x16xf32> to vector<16x16xf32>
    %577 = arith.addf %575, %576 : vector<16x16xf32>
    %c21 = arith.constant 21 : index
    %c0_398 = arith.constant 0 : index
    %c0_399 = arith.constant 0 : index
    %578 = vector.load %arg3[%c21, %c0_398, %c0_399] : memref<24x1x32xf32, #tpu.memory_space<vmem>>, vector<1x1x32xf32>
    %579 = vector.shape_cast %578 : vector<1x1x32xf32> to vector<1x32xf32>
    %580 = vector.broadcast %1 : vector<16x1xf32> to vector<16x32xf32>
    %581 = vector.broadcast %579 : vector<1x32xf32> to vector<16x32xf32>
    %582 = arith.addf %580, %581 : vector<16x32xf32>
    %cst_400 = arith.constant 0.000000e+00 : f32
    %583 = vector.broadcast %cst_400 : f32 to vector<16x32xf32>
    %584 = arith.maximumf %582, %583 : vector<16x32xf32>
    %585 = arith.truncf %584 : vector<16x32xf32> to vector<16x32xbf16>
    %c0_401 = arith.constant 0 : index
    %c0_402 = arith.constant 0 : index
    %c0_403 = arith.constant 0 : index
    %586 = vector.load %arg4[%c0_401, %c0_402, %c0_403] : memref<3x32x32xbf16, #tpu.memory_space<vmem>>, vector<1x32x32xbf16>
    %587 = vector.shape_cast %586 : vector<1x32x32xbf16> to vector<32x32xbf16>
    %cst_404 = arith.constant dense<0.000000e+00> : vector<16x32xf32>
    %588 = tpu.matmul %585, %587, %cst_404 {dimension_numbers = #tpu.dot_dimension_numbers<[1], [0], [0], [1], [0, 0, 1, 1], [], []>} : vector<16x32xbf16>, vector<32x32xbf16>, vector<16x32xf32> -> vector<16x32xf32>
    %c0_405 = arith.constant 0 : index
    %c0_406 = arith.constant 0 : index
    %c0_407 = arith.constant 0 : index
    %589 = vector.load %arg5[%c0_405, %c0_406, %c0_407] : memref<3x1x32xf32, #tpu.memory_space<vmem>>, vector<1x1x32xf32>
    %590 = vector.shape_cast %589 : vector<1x1x32xf32> to vector<1x32xf32>
    %591 = vector.broadcast %590 : vector<1x32xf32> to vector<16x32xf32>
    %592 = arith.addf %588, %591 : vector<16x32xf32>
    %cst_408 = arith.constant 0.000000e+00 : f32
    %593 = vector.broadcast %cst_408 : f32 to vector<16x32xf32>
    %594 = arith.maximumf %592, %593 : vector<16x32xf32>
    %595 = arith.truncf %594 : vector<16x32xf32> to vector<16x32xbf16>
    %c0_409 = arith.constant 0 : index
    %c0_410 = arith.constant 0 : index
    %c0_411 = arith.constant 0 : index
    %596 = vector.load %arg6[%c0_409, %c0_410, %c0_411] : memref<3x32x32xbf16, #tpu.memory_space<vmem>>, vector<1x32x32xbf16>
    %597 = vector.shape_cast %596 : vector<1x32x32xbf16> to vector<32x32xbf16>
    %cst_412 = arith.constant dense<0.000000e+00> : vector<16x32xf32>
    %598 = tpu.matmul %595, %597, %cst_412 {dimension_numbers = #tpu.dot_dimension_numbers<[1], [0], [0], [1], [0, 0, 1, 1], [], []>} : vector<16x32xbf16>, vector<32x32xbf16>, vector<16x32xf32> -> vector<16x32xf32>
    %c0_413 = arith.constant 0 : index
    %c0_414 = arith.constant 0 : index
    %c0_415 = arith.constant 0 : index
    %599 = vector.load %arg7[%c0_413, %c0_414, %c0_415] : memref<3x1x32xf32, #tpu.memory_space<vmem>>, vector<1x1x32xf32>
    %600 = vector.shape_cast %599 : vector<1x1x32xf32> to vector<1x32xf32>
    %601 = vector.broadcast %600 : vector<1x32xf32> to vector<16x32xf32>
    %602 = arith.addf %598, %601 : vector<16x32xf32>
    %603 = arith.addf %582, %602 : vector<16x32xf32>
    %c22 = arith.constant 22 : index
    %c0_416 = arith.constant 0 : index
    %c0_417 = arith.constant 0 : index
    %604 = vector.load %arg3[%c22, %c0_416, %c0_417] : memref<24x1x32xf32, #tpu.memory_space<vmem>>, vector<1x1x32xf32>
    %605 = vector.shape_cast %604 : vector<1x1x32xf32> to vector<1x32xf32>
    %606 = vector.broadcast %605 : vector<1x32xf32> to vector<16x32xf32>
    %607 = arith.addf %603, %606 : vector<16x32xf32>
    %cst_418 = arith.constant 0.000000e+00 : f32
    %608 = vector.broadcast %cst_418 : f32 to vector<16x32xf32>
    %609 = arith.maximumf %607, %608 : vector<16x32xf32>
    %610 = arith.truncf %609 : vector<16x32xf32> to vector<16x32xbf16>
    %c1_419 = arith.constant 1 : index
    %c0_420 = arith.constant 0 : index
    %c0_421 = arith.constant 0 : index
    %611 = vector.load %arg4[%c1_419, %c0_420, %c0_421] : memref<3x32x32xbf16, #tpu.memory_space<vmem>>, vector<1x32x32xbf16>
    %612 = vector.shape_cast %611 : vector<1x32x32xbf16> to vector<32x32xbf16>
    %cst_422 = arith.constant dense<0.000000e+00> : vector<16x32xf32>
    %613 = tpu.matmul %610, %612, %cst_422 {dimension_numbers = #tpu.dot_dimension_numbers<[1], [0], [0], [1], [0, 0, 1, 1], [], []>} : vector<16x32xbf16>, vector<32x32xbf16>, vector<16x32xf32> -> vector<16x32xf32>
    %c1_423 = arith.constant 1 : index
    %c0_424 = arith.constant 0 : index
    %c0_425 = arith.constant 0 : index
    %614 = vector.load %arg5[%c1_423, %c0_424, %c0_425] : memref<3x1x32xf32, #tpu.memory_space<vmem>>, vector<1x1x32xf32>
    %615 = vector.shape_cast %614 : vector<1x1x32xf32> to vector<1x32xf32>
    %616 = vector.broadcast %615 : vector<1x32xf32> to vector<16x32xf32>
    %617 = arith.addf %613, %616 : vector<16x32xf32>
    %cst_426 = arith.constant 0.000000e+00 : f32
    %618 = vector.broadcast %cst_426 : f32 to vector<16x32xf32>
    %619 = arith.maximumf %617, %618 : vector<16x32xf32>
    %620 = arith.truncf %619 : vector<16x32xf32> to vector<16x32xbf16>
    %c1_427 = arith.constant 1 : index
    %c0_428 = arith.constant 0 : index
    %c0_429 = arith.constant 0 : index
    %621 = vector.load %arg6[%c1_427, %c0_428, %c0_429] : memref<3x32x32xbf16, #tpu.memory_space<vmem>>, vector<1x32x32xbf16>
    %622 = vector.shape_cast %621 : vector<1x32x32xbf16> to vector<32x32xbf16>
    %cst_430 = arith.constant dense<0.000000e+00> : vector<16x32xf32>
    %623 = tpu.matmul %620, %622, %cst_430 {dimension_numbers = #tpu.dot_dimension_numbers<[1], [0], [0], [1], [0, 0, 1, 1], [], []>} : vector<16x32xbf16>, vector<32x32xbf16>, vector<16x32xf32> -> vector<16x32xf32>
    %c1_431 = arith.constant 1 : index
    %c0_432 = arith.constant 0 : index
    %c0_433 = arith.constant 0 : index
    %624 = vector.load %arg7[%c1_431, %c0_432, %c0_433] : memref<3x1x32xf32, #tpu.memory_space<vmem>>, vector<1x1x32xf32>
    %625 = vector.shape_cast %624 : vector<1x1x32xf32> to vector<1x32xf32>
    %626 = vector.broadcast %625 : vector<1x32xf32> to vector<16x32xf32>
    %627 = arith.addf %623, %626 : vector<16x32xf32>
    %628 = arith.addf %607, %627 : vector<16x32xf32>
    %c23 = arith.constant 23 : index
    %c0_434 = arith.constant 0 : index
    %c0_435 = arith.constant 0 : index
    %629 = vector.load %arg3[%c23, %c0_434, %c0_435] : memref<24x1x32xf32, #tpu.memory_space<vmem>>, vector<1x1x32xf32>
    %630 = vector.shape_cast %629 : vector<1x1x32xf32> to vector<1x32xf32>
    %631 = vector.broadcast %630 : vector<1x32xf32> to vector<16x32xf32>
    %632 = arith.addf %628, %631 : vector<16x32xf32>
    %cst_436 = arith.constant 0.000000e+00 : f32
    %633 = vector.broadcast %cst_436 : f32 to vector<16x32xf32>
    %634 = arith.maximumf %632, %633 : vector<16x32xf32>
    %635 = arith.truncf %634 : vector<16x32xf32> to vector<16x32xbf16>
    %c2_437 = arith.constant 2 : index
    %c0_438 = arith.constant 0 : index
    %c0_439 = arith.constant 0 : index
    %636 = vector.load %arg4[%c2_437, %c0_438, %c0_439] : memref<3x32x32xbf16, #tpu.memory_space<vmem>>, vector<1x32x32xbf16>
    %637 = vector.shape_cast %636 : vector<1x32x32xbf16> to vector<32x32xbf16>
    %cst_440 = arith.constant dense<0.000000e+00> : vector<16x32xf32>
    %638 = tpu.matmul %635, %637, %cst_440 {dimension_numbers = #tpu.dot_dimension_numbers<[1], [0], [0], [1], [0, 0, 1, 1], [], []>} : vector<16x32xbf16>, vector<32x32xbf16>, vector<16x32xf32> -> vector<16x32xf32>
    %c2_441 = arith.constant 2 : index
    %c0_442 = arith.constant 0 : index
    %c0_443 = arith.constant 0 : index
    %639 = vector.load %arg5[%c2_441, %c0_442, %c0_443] : memref<3x1x32xf32, #tpu.memory_space<vmem>>, vector<1x1x32xf32>
    %640 = vector.shape_cast %639 : vector<1x1x32xf32> to vector<1x32xf32>
    %641 = vector.broadcast %640 : vector<1x32xf32> to vector<16x32xf32>
    %642 = arith.addf %638, %641 : vector<16x32xf32>
    %cst_444 = arith.constant 0.000000e+00 : f32
    %643 = vector.broadcast %cst_444 : f32 to vector<16x32xf32>
    %644 = arith.maximumf %642, %643 : vector<16x32xf32>
    %645 = arith.truncf %644 : vector<16x32xf32> to vector<16x32xbf16>
    %c2_445 = arith.constant 2 : index
    %c0_446 = arith.constant 0 : index
    %c0_447 = arith.constant 0 : index
    %646 = vector.load %arg6[%c2_445, %c0_446, %c0_447] : memref<3x32x32xbf16, #tpu.memory_space<vmem>>, vector<1x32x32xbf16>
    %647 = vector.shape_cast %646 : vector<1x32x32xbf16> to vector<32x32xbf16>
    %cst_448 = arith.constant dense<0.000000e+00> : vector<16x32xf32>
    %648 = tpu.matmul %645, %647, %cst_448 {dimension_numbers = #tpu.dot_dimension_numbers<[1], [0], [0], [1], [0, 0, 1, 1], [], []>} : vector<16x32xbf16>, vector<32x32xbf16>, vector<16x32xf32> -> vector<16x32xf32>
    %c2_449 = arith.constant 2 : index
    %c0_450 = arith.constant 0 : index
    %c0_451 = arith.constant 0 : index
    %649 = vector.load %arg7[%c2_449, %c0_450, %c0_451] : memref<3x1x32xf32, #tpu.memory_space<vmem>>, vector<1x1x32xf32>
    %650 = vector.shape_cast %649 : vector<1x1x32xf32> to vector<1x32xf32>
    %651 = vector.broadcast %650 : vector<1x32xf32> to vector<16x32xf32>
    %652 = arith.addf %648, %651 : vector<16x32xf32>
    %653 = arith.addf %632, %652 : vector<16x32xf32>
    %cst_452 = arith.constant 0.000000e+00 : f32
    %654 = vector.broadcast %cst_452 : f32 to vector<16x32xf32>
    %655 = arith.maximumf %653, %654 : vector<16x32xf32>
    %656 = arith.truncf %655 : vector<16x32xf32> to vector<16x32xbf16>
    %cst_453 = arith.constant dense<0.000000e+00> : vector<16x16xf32>
    %657 = tpu.matmul %656, %2, %cst_453 {dimension_numbers = #tpu.dot_dimension_numbers<[1], [0], [0], [1], [0, 0, 1, 1], [], []>} : vector<16x32xbf16>, vector<32x16xbf16>, vector<16x16xf32> -> vector<16x16xf32>
    %658 = vector.broadcast %3 : vector<1x16xf32> to vector<16x16xf32>
    %659 = arith.addf %657, %658 : vector<16x16xf32>
    %660 = tpu.concatenate %85, %167, %249, %331, %413, %495, %577, %659 in 1 : vector<16x16xf32>, vector<16x16xf32>, vector<16x16xf32>, vector<16x16xf32>, vector<16x16xf32>, vector<16x16xf32>, vector<16x16xf32>, vector<16x16xf32> -> vector<16x128xf32>
    %c0_454 = arith.constant 0 : index
    %c0_455 = arith.constant 0 : index
    %c0_456 = arith.constant 0 : index
    %661 = vector.load %arg10[%c0_454, %c0_455, %c0_456] : memref<1x16x128xf32, #tpu.memory_space<vmem>>, vector<1x16x128xf32>
    %662 = vector.shape_cast %661 : vector<1x16x128xf32> to vector<16x128xf32>
    %663 = vector.shape_cast %660 : vector<16x128xf32> to vector<1x16x128xf32>
    tpu.vector_store %arg10[%c0_454, %c0_455, %c0_456], %663 {strides = array<i32>} : memref<1x16x128xf32, #tpu.memory_space<vmem>>, vector<1x16x128xf32>,
    return
  }
  func.func @transform_0(%arg0: i32, %arg1: i32) -> (i32, i32, i32) {
    %c0_i32 = arith.constant 0 : i32
    %c0_i32_0 = arith.constant 0 : i32
    return %arg0, %arg1, %c0_i32 : i32, i32, i32
  }
  func.func @transform_1(%arg0: i32, %arg1: i32) -> (i32, i32, i32) {
    %c0_i32 = arith.constant 0 : i32
    %c0_i32_0 = arith.constant 0 : i32
    %c0_i32_1 = arith.constant 0 : i32
    return %arg0, %c0_i32, %c0_i32_0 : i32, i32, i32
  }
  func.func @transform_2(%arg0: i32, %arg1: i32) -> (i32, i32, i32) {
    %c0_i32 = arith.constant 0 : i32
    %c0_i32_0 = arith.constant 0 : i32
    %c0_i32_1 = arith.constant 0 : i32
    %c0_i32_2 = arith.constant 0 : i32
    return %c0_i32, %c0_i32_0, %c0_i32_1 : i32, i32, i32
  }
  func.func @transform_3(%arg0: i32, %arg1: i32) -> (i32, i32, i32) {
    %c0_i32 = arith.constant 0 : i32
    %c0_i32_0 = arith.constant 0 : i32
    %c0_i32_1 = arith.constant 0 : i32
    %c0_i32_2 = arith.constant 0 : i32
    return %c0_i32, %c0_i32_0, %c0_i32_1 : i32, i32, i32
  }
  func.func @transform_4(%arg0: i32, %arg1: i32) -> (i32, i32, i32) {
    %c0_i32 = arith.constant 0 : i32
    %c0_i32_0 = arith.constant 0 : i32
    %c0_i32_1 = arith.constant 0 : i32
    %c0_i32_2 = arith.constant 0 : i32
    return %c0_i32, %c0_i32_0, %c0_i32_1 : i32, i32, i32
  }
  func.func @transform_5(%arg0: i32, %arg1: i32) -> (i32, i32, i32) {
    %c0_i32 = arith.constant 0 : i32
    %c0_i32_0 = arith.constant 0 : i32
    %c0_i32_1 = arith.constant 0 : i32
    %c0_i32_2 = arith.constant 0 : i32
    return %c0_i32, %c0_i32_0, %c0_i32_1 : i32, i32, i32
  }
  func.func @transform_6(%arg0: i32, %arg1: i32) -> (i32, i32) {
    %c0_i32 = arith.constant 0 : i32
    %c0_i32_0 = arith.constant 0 : i32
    %c0_i32_1 = arith.constant 0 : i32
    return %c0_i32, %c0_i32_0 : i32, i32
  }
  func.func @transform_7(%arg0: i32, %arg1: i32) -> (i32, i32) {
    %c0_i32 = arith.constant 0 : i32
    %c0_i32_0 = arith.constant 0 : i32
    %c0_i32_1 = arith.constant 0 : i32
    return %c0_i32, %c0_i32_0 : i32, i32
  }
  func.func @transform_8(%arg0: i32, %arg1: i32) -> (i32, i32, i32) {
    %c0_i32 = arith.constant 0 : i32
    %c0_i32_0 = arith.constant 0 : i32
    return %arg0, %arg1, %c0_i32 : i32, i32, i32
  }
}

</mosaic_0001>

<bundles_post_ra>
// kernel: tpu_custom_call.1
= control target key start
LH: loop header
LB: loop body
LE: loop exit
PB: predicated region body
PF: predicated region fallthrough
CT: control target
= control target key end

     0   :  { %13 = vsyncpa [#allocation3], 0  ;;  %s5586_s0 = inlined_call_operand.vmem [shape: f32[2,16,1], index: 0, kind: input, shape index: {}]   ;;  %s5587_s1 = inlined_call_operand.vmem [shape: f32[48,1,32], index: 1, kind: input, shape index: {}]   ;;  %s5588_s2 = inlined_call_operand.vmem [shape: bf16[3,32,32], index: 2, kind: input, shape index: {}]   ;;  %s5589_s3 = inlined_call_operand.vmem [shape: f32[3,1,32], index: 3, kind: input, shape index: {}]   ;;  %s5590_s4 = inlined_call_operand.vmem [shape: bf16[3,32,32], index: 4, kind: input, shape index: {}]   ;;  %s5591_s5 = inlined_call_operand.vmem [shape: f32[3,1,32], index: 5, kind: input, shape index: {}]   ;;  %s5592_s6 = inlined_call_operand.vmem [shape: bf16[32,16], index: 6, kind: input, shape index: {}]   ;;  %s5593_s7 = inlined_call_operand.vmem [shape: f32[1,16], index: 7, kind: input, shape index: {}]   ;;  %s5594_s8 = inlined_call_operand.hbm [shape: f32[2,16,128], index: 8, kind: output, shape index: {}]  }
   0x1   :  { %15 = vsyncpa [#allocation3 + $0x1], 0  ;;  %s4652_s27 = smov 0   ;;  %s4654_s28 = smov 0  }
   0x2   :  { %s4656_s29 = smov 0   ;;  %s4658_s30 = smov 0  }
   0x3   :  { %s4660_s9 = smov 0   ;;  %s4662_s10 = smov 0  }
   0x4 LB: > { %s3638_s11 = sadd.s32 4294967295, %s4592_s10   ;;  %s3639_s12 = sadd.s32 4294967294, %s4592_s10   ;;  %s4592_s10 = sphi %s4662_s10, %s21_s10   ;;  %s4588_s9 = sphi %s4660_s9, %s5601_s9   ;;  %s4584_s30 = sphi %s4658_s30, %s5600_s30   ;;  %s4580_s29 = sphi %s4656_s29, %s5599_s29   ;;  %s4576_s28 = sphi %s4654_s28, %s5598_s28   ;;  %s4572_s27 = sphi %s4652_s27, %s5597_s27  }
   0x5   : > { %s33_s13 = sadd.s32 1, %s4588_s9  ;;  %s222_s14 = sadd.s32 1, %s4580_s29 }
   0x6   : > { %p35_p0 = scmp.ge.s32.totalorder %s33_s13, 2  ;;  %p232_p1 = scmp.ne.s32.totalorder %s4580_s29, %s4576_s28 }
   0x7   : > { %p233_p2 = scmp.eq.s32.totalorder %s3638_s11, 1  ;;  %p238_p3 = scmp.ne.s32.totalorder %s4576_s28, %s4572_s27 }
   0x8   : > { %s5603_s13 = smov (%p35_p0, %s33_s13), 0  ;;  %p239_p5 = scmp.eq.s32.totalorder %s3639_s12, 1 }
   0x9   : > { %p4692_p4 = por %p233_p2, %p232_p1  ;;  %s217_s16 = ssub.s32 %s4588_s9, %s5603_s13 }
   0xa   : > { %p3642_p6 = scmp.ge.s32.totalorder %s4592_s10, 1  ;;  %p220_p7 = scmp.eq.s32.totalorder %s217_s16, 0 }
   0xb   : > { %p4699_p8 = por %p239_p5, %p238_p3  ;;  %p296_p9 = scmp.lt.s32.totalorder %s4592_s10, 3 }
   0xc   : > { %s4705_s18 = scalar_select %p220_p7, %s4580_s29, %s222_s14  }
   0xd   : > { %p297_p10 = pnand %p3642_p6, %p296_p9 }
   0xe   : > { %p339_p11 = scmp.lt.s32.totalorder (!%p297_p10), %s4584_s30, 1  ;;  %s348_s12 = smul.u32 (!%p297_p10), 24, %s4584_s30 }
   0xf   : > { %300 = sbr.rel (%p297_p10) target bundleno = 8947 (0x22f3), region = 52  ;;  %s4598_s26 = smov (!%p297_p10), 32  }
  0x10   : > { %p349_p12 = scmp.lt.s32.totalorder (!%p297_p10), %s348_s12, 47  ;;  %s4599_s20 = smov (!%p297_p10), 48  }
  0x11   : > { %s4600_s24 = smov (!%p297_p10), 64   ;;  %s335_s14 = sand.u32 (!%p297_p10), 1, %s4576_s28  }
  0x12   : > { %s3643_s16 = sshll.u32 (!%p297_p10), %s335_s14, 4  ;;  %s4604_s11 = smov (!%p297_p10), [#allocation2]  }
  0x14   : > { %v4594_v0 = vmov 0   ;;  %s340_s19 = scalar_select %p339_p11, %s4584_s30, 1  ;;  %v4712_v1 = vld [vmem:[%s5588_s2 + $0x8] sm:$0xff]   ;;  %v4595_v2 = vmov 0.0   ;;  %v4724_v5 = vld [vmem:[%s5588_s2] sm:$0xff]   ;;  %vm4596_vm0 = vmmov 0  }
  0x15   : > { %4480 = vset.pattern.permute.xlu0 %v4594_v0  ;;  %3965 = vmatprep.subr.bf16.mxu0 %v4595_v2  ;;  %s5605_s12 = smov (!%p349_p12, %s348_s12), 47  ;;  %vm407_vm1 = vcmask 261120   ;;  %v4751_v14 = vld [vmem:[%s5590_s4 + $0x8] sm:$0xff]   ;;  %v4758_v15 = vld [vmem:[%s5590_s4] sm:$0xff]   ;;  %v4775_v26 = vld [vmem:[%s5588_s2 + $0x18] sm:$0xff]   ;;  %vm3512_vm2 = vcmask 130048  }
  0x16   : > { %3973 = vmatprep.subr.bf16.mxu1 %v4595_v2  ;;  %s3795_s22 = sshll.u32 %s340_s19, 4  ;;  %3966 = vmatpush3.bf16.msra.mxu0 %v4712_v1  ;;  %s4736_s19 = scalar_lea.vmem %s5587_s1, %s5605_s12  ;;  %v4765_v16 = vld [vmem:[%s5589_s3] ss:$0 sm:$0xff]  ;;  %v4782_v27 = vld [vmem:[%s5588_s2 + $0x10] sm:$0xff]   ;;  %v4800_v43 = vld [vmem:[%s5590_s4 + $0x18] sm:$0xff]   ;;  %vm3517_vm3 = vcmask 392192  }
  0x17   : > { %s346_s25 = scalar_lea.vmem %s5586_s0, %s3795_s22  ;;  %3967 = vmatprep.subr.bf16.mxu0 %v4595_v2  ;;  %3969 = vmatprep.mubr.msk.bf16.mxu0 %vm4596_vm0, %v4595_v2  ;;  %v3646_v7 = vld [vmem:[%s4736_s19] ss:$0 sm:$0xff]  ;;  %v3656_v33 = vld [vmem:[%s4736_s19 + $0x1] ss:$0 sm:$0xff]  ;;  %v4807_v44 = vld [vmem:[%s5590_s4 + $0x10] sm:$0xff]   ;;  %s4602_s12 = smov 96  }
  0x18   : > { %v355_v3 = vld [vmem:[%s346_s25] sm:$0xff]  ;;  %v356_v4 = vld [vmem:[%s346_s25 + $0x8] sm:$0xff]  ;;  %3977 = vmatprep.mubr.msk.bf16.mxu1 %vm4596_vm0, %v4595_v2  ;;  %3974 = vmatpush3.bf16.msra.mxu1 %v4751_v14  ;;  %s4597_s25 = smov 16   ;;  %vm3520_vm4 = vcmask 523264   ;;  %vm3523_vm5 = vcmask 654336   ;;  %vm3526_vm6 = vcmask 785408  }
  0x19   : > { %365 = vperm.xlu0 %4480, %v355_v3   ;;  %3975 = vmatprep.subr.bf16.mxu1 %v4595_v2  ;;  %v4789_v28 = vld [vmem:[%s5591_s5] ss:$0 sm:$0xff]  ;;  %v4814_v45 = vld [vmem:[%s5589_s3 + $0x1] ss:$0 sm:$0xff]  ;;  %v4824_v55 = vld [vmem:[%s5588_s2 + $0x28] sm:$0xff]   ;;  %vm3529_vm7 = vcmask 916480  }
  0x1a   : > { %3968 = vmatpush3.bf16.msra.mxu0 %v4724_v5  ;;  %v4831_v56 = vld [vmem:[%s5588_s2 + $0x20] sm:$0xff]   ;;  %s3796_s22 = sshll.u32 %s4584_s30, 8  ;;  %s5541_s30 = scalar_lea.sflag [#allocation3], %s335_s14 }
  0x1b   : > { %3981 = vmatprep.subr.bf16.mxu0 %v4595_v2  ;;  %v4838_v57 = vld [vmem:[%s5591_s5 + $0x1] ss:$0 sm:$0xff]  ;;  %v3676_v62 = vld [vmem:[%s4736_s19 + $0x2] ss:$0 sm:$0xff] }
  0x1c   : > { %3976 = vmatpush3.bf16.msra.mxu1 %v4758_v15 }
  0x1d   : > { %370 = vperm.xlu0 %4480, %v356_v4   ;;  %3989 = vmatprep.subr.bf16.mxu1 %v4595_v2 }
  0x94   : > { %v4738_v6 = vpop.permute.xlu0 %365 }
  0x95   : > { %v379_v8 = vadd.f32 %v3646_v7, %v4738_v6 }
  0x97   : > { %v381_v11 = vmax.f32 %v379_v8, 0.0 }
  0x98   : > { %v4742_v9 = vpop.permute.xlu0 %370 }
  0x99   : > { %v380_v10 = vadd.f32 %v3646_v7, %v4742_v9 }
  0x9b   : > { %v382_v12 = vmax.f32 %v380_v10, 0.0 }
  0x9d   : > { %v383_v13 = vpack.c.bf16 %v382_v12, %v381_v11 }
  0x9f   : > { %3970 = vmatmul.mubr.msk.bf16.vlgmr.msra.gmra.mxu0 %vm407_vm1, %v383_v13  ;;  %v4849_v13 = vld [vmem:[%s5590_s4 + $0x28] sm:$0xff]  }
  0xa0   : > { %3985 = vmatprep.mubr.msk.bf16.mxu0 %vm4596_vm0, %v4595_v2  ;;  %3982 = vmatpush3.bf16.msra.mxu0 %v4775_v26 }
  0xa1   : > { %3983 = vmatprep.subr.bf16.mxu0 %v4595_v2 }
  0xa4   : > { %3984 = vmatpush3.bf16.msra.mxu0 %v4782_v27 }
  0xa5   : > { %3997 = vmatprep.subr.bf16.mxu0 %v4595_v2 }
 0x15f   : > { %v445_v17 = vpop.f32.mrf.mxu0 }
 0x160   : > { %v446_v19 = vadd.f32 %v4765_v16, %v445_v17  ;;  %v4856_v17 = vld [vmem:[%s5590_s4 + $0x20] sm:$0xff]  }
 0x161   : > { %v3971_v18 = vpop.f32.mrf.mxu0 }
 0x162   : > { %v452_v23 = vmax.f32 %v446_v19, 0.0  ;;  %v4863_v18 = vld [vmem:[%s5589_s3 + $0x2] ss:$0 sm:$0xff] }
 0x163   : > { %v448_v20 = vpop.f32.mrf.mxu0 }
 0x164   : > { %v449_v21 = vadd.f32 %v4765_v16, %v448_v20 }
 0x165   : > { %v3972_v22 = vpop.f32.mrf.mxu0 }
 0x166   : > { %v453_v24 = vmax.f32 %v449_v21, 0.0 }
 0x168   : > { %v454_v25 = vpack.c.bf16 %v453_v24, %v452_v23 }
 0x16a   : > { %3978 = vmatmul.mubr.msk.bf16.vlgmr.msra.gmra.mxu1 %vm407_vm1, %v454_v25 }
 0x16b   : > { %3993 = vmatprep.mubr.msk.bf16.mxu1 %vm4596_vm0, %v4595_v2  ;;  %3990 = vmatpush3.bf16.msra.mxu1 %v4800_v43 }
 0x16c   : > { %3991 = vmatprep.subr.bf16.mxu1 %v4595_v2 }
 0x16f   : > { %3992 = vmatpush3.bf16.msra.mxu1 %v4807_v44 }
 0x170   : > { %4005 = vmatprep.subr.bf16.mxu1 %v4595_v2 }
 0x22a   : > { %v515_v29 = vpop.f32.mrf.mxu1 }
 0x22b   : > { %v516_v30 = vadd.f32 %v4789_v28, %v515_v29 }
 0x22c   : > { %v3979_v31 = vpop.f32.mrf.mxu1 }
 0x22d   : > { %v522_v32 = vadd.f32 %v516_v30, %v379_v8  ;;  %v3700_v30 = vld [vmem:[%s4736_s19 + $0x3] ss:$0 sm:$0xff] }
 0x22e   : > { %v518_v34 = vpop.f32.mrf.mxu1 }
 0x22f   : > { %v519_v35 = vadd.f32 %v4789_v28, %v518_v34  ;;  %v532_v37 = vadd.f32 %v3656_v33, %v522_v32  ;;  %v4869_v32 = vadd.f32 %v3700_v30, %v4742_v9 }
 0x230   : > { %v3980_v36 = vpop.f32.mrf.mxu1 }
 0x231   : > { %v523_v38 = vadd.f32 %v519_v35, %v380_v10  ;;  %v534_v40 = vmax.f32 %v532_v37, 0.0  ;;  %v912_v34 = vmax.f32 %v4869_v32, 0.0 }
 0x233   : > { %v533_v39 = vadd.f32 %v3656_v33, %v523_v38  ;;  %v909_v33 = vadd.f32 %v3700_v30, %v4738_v6  ;;  %v4897_v38 = vld [vmem:[%s5592_s6] sm:$0xff]  }
 0x235   : > { %v535_v41 = vmax.f32 %v533_v39, 0.0  ;;  %v911_v35 = vmax.f32 %v909_v33, 0.0 }
 0x237   : > { %v536_v42 = vpack.c.bf16 %v535_v41, %v534_v40  ;;  %v913_v36 = vpack.c.bf16 %v912_v34, %v911_v35 }
 0x239   : > { %3986 = vmatmul.mubr.msk.bf16.vlgmr.msra.gmra.mxu0 %vm407_vm1, %v536_v42 }
 0x23a   : > { %4001 = vmatprep.mubr.msk.bf16.mxu0 %vm4596_vm0, %v4595_v2  ;;  %3998 = vmatpush3.bf16.msra.mxu0 %v4824_v55 }
 0x23b   : > { %3999 = vmatprep.subr.bf16.mxu0 %v4595_v2 }
 0x23e   : > { %4000 = vmatpush3.bf16.msra.mxu0 %v4831_v56 }
 0x23f   : > { %4013 = vmatprep.subr.bf16.mxu0 %v4595_v2 }
 0x2f9   : > { %v599_v46 = vpop.f32.mrf.mxu0 }
 0x2fa   : > { %v600_v48 = vadd.f32 %v4814_v45, %v599_v46 }
 0x2fb   : > { %v3987_v47 = vpop.f32.mrf.mxu0 }
 0x2fc   : > { %v606_v52 = vmax.f32 %v600_v48, 0.0 }
 0x2fd   : > { %v602_v49 = vpop.f32.mrf.mxu0 }
 0x2fe   : > { %v603_v50 = vadd.f32 %v4814_v45, %v602_v49 }
 0x2ff   : > { %v3988_v51 = vpop.f32.mrf.mxu0 }
 0x300   : > { %v607_v53 = vmax.f32 %v603_v50, 0.0 }
 0x302   : > { %v608_v54 = vpack.c.bf16 %v607_v53, %v606_v52 }
 0x304   : > { %3994 = vmatmul.mubr.msk.bf16.vlgmr.msra.gmra.mxu1 %vm407_vm1, %v608_v54 }
 0x305   : > { %4009 = vmatprep.mubr.msk.bf16.mxu1 %vm4596_vm0, %v4595_v2  ;;  %4006 = vmatpush3.bf16.msra.mxu1 %v4849_v13 }
 0x306   : > { %4007 = vmatprep.subr.bf16.mxu1 %v4595_v2 }
 0x309   : > { %4008 = vmatpush3.bf16.msra.mxu1 %v4856_v17 }
 0x30a   : > { %4021 = vmatprep.subr.bf16.mxu1 %v4595_v2 }
 0x3c4   : > { %v671_v58 = vpop.f32.mrf.mxu1 }
 0x3c5   : > { %v672_v59 = vadd.f32 %v4838_v57, %v671_v58 }
 0x3c6   : > { %v3995_v60 = vpop.f32.mrf.mxu1 }
 0x3c7   : > { %v678_v61 = vadd.f32 %v672_v59, %v532_v37  ;;  %v4890_v37 = vld [vmem:[%s5592_s6 + $0x8] sm:$0xff]  }
 0x3c8   : > { %v674_v63 = vpop.f32.mrf.mxu1 }
 0x3c9   : > { %v675_v0 = vadd.f32 %v4838_v57, %v674_v63  ;;  %v688_v4 = vadd.f32 %v3676_v62, %v678_v61 }
 0x3ca   : > { %v3996_v3 = vpop.f32.mrf.mxu1 }
 0x3cb   : > { %v679_v7 = vadd.f32 %v675_v0, %v533_v39  ;;  %v690_v10 = vmax.f32 %v688_v4, 0.0  ;;  %v4904_v39 = vld [vmem:[%s5591_s5 + $0x2] ss:$0 sm:$0xff] }
 0x3cd   : > { %v689_v8 = vadd.f32 %v3676_v62, %v679_v7 }
 0x3cf   : > { %v691_v11 = vmax.f32 %v689_v8, 0.0 }
 0x3d1   : > { %v692_v12 = vpack.c.bf16 %v691_v11, %v690_v10 }
 0x3d3   : > { %4002 = vmatmul.mubr.msk.bf16.vlgmr.msra.gmra.mxu0 %vm407_vm1, %v692_v12 }
 0x3d4   : > { %4017 = vmatprep.mubr.msk.bf16.mxu0 %vm4596_vm0, %v4595_v2  ;;  %4014 = vmatpush3.bf16.msra.mxu0 %v4890_v37 }
 0x3d5   : > { %4015 = vmatprep.subr.bf16.mxu0 %v4595_v2 }
 0x3d8   : > { %4016 = vmatpush3.bf16.msra.mxu0 %v4897_v38 }
 0x3d9   : > { %4029 = vmatprep.subr.bf16.mxu0 %v4595_v2 }
 0x493   : > { %v755_v19 = vpop.f32.mrf.mxu0 }
 0x494   : > { %v756_v21 = vadd.f32 %v4863_v18, %v755_v19 }
 0x495   : > { %v4003_v20 = vpop.f32.mrf.mxu0 }
 0x496   : > { %v762_v25 = vmax.f32 %v756_v21, 0.0  ;;  %v3704_v21 = vld [vmem:[%s4736_s19 + $0x4] ss:$0 sm:$0xff] }
 0x497   : > { %v758_v22 = vpop.f32.mrf.mxu0 }
 0x498   : > { %v759_v23 = vadd.f32 %v4863_v18, %v758_v22 }
 0x499   : > { %v4004_v24 = vpop.f32.mrf.mxu0 }
 0x49a   : > { %v763_v29 = vmax.f32 %v759_v23, 0.0 }
 0x49c   : > { %v764_v31 = vpack.c.bf16 %v763_v29, %v762_v25 }
 0x49e   : > { %4010 = vmatmul.mubr.msk.bf16.vlgmr.msra.gmra.mxu1 %vm407_vm1, %v764_v31 }
 0x49f   : > { %4022 = vmatpush3.bf16.msra.mxu1 %v4712_v1  ;;  %4025 = vmatprep.mubr.msk.bf16.mxu1 %vm4596_vm0, %v4595_v2 }
 0x4a0   : > { %4023 = vmatprep.subr.bf16.mxu1 %v4595_v2 }
 0x4a3   : > { %4024 = vmatpush3.bf16.msra.mxu1 %v4724_v5 }
 0x4a4   : > { %4037 = vmatprep.subr.bf16.mxu1 %v4595_v2 }
 0x4a6   : > { %4026 = vmatmul.mubr.msk.bf16.vlgmr.msra.gmra.mxu1 %vm407_vm1, %v913_v36 }
 0x4a7   : > { %4038 = vmatpush3.bf16.msra.mxu1 %v4775_v26  ;;  %4041 = vmatprep.mubr.msk.bf16.mxu1 %vm4596_vm0, %v4595_v2 }
 0x4a8   : > { %4039 = vmatprep.subr.bf16.mxu1 %v4595_v2 }
 0x4ab   : > { %4040 = vmatpush3.bf16.msra.mxu1 %v4782_v27 }
 0x4ac   : > { %4053 = vmatprep.subr.bf16.mxu1 %v4595_v2 }
 0x55e   : > { %v827_v40 = vpop.f32.mrf.mxu1 }
 0x55f   : > { %v828_v41 = vadd.f32 %v4904_v39, %v827_v40 }
 0x560   : > { %v4011_v42 = vpop.f32.mrf.mxu1 }
 0x561   : > { %v834_v47 = vadd.f32 %v828_v41, %v688_v4 }
 0x562   : > { %v830_v46 = vpop.f32.mrf.mxu1 }
 0x563   : > { %v831_v48 = vadd.f32 %v4904_v39, %v830_v46  ;;  %v836_v52 = vmax.f32 %v834_v47, 0.0 }
 0x564   : > { %v4012_v49 = vpop.f32.mrf.mxu1 }
 0x565   : > { %v835_v50 = vadd.f32 %v831_v48, %v689_v8 }
 0x566   : > { %v951_v51 = vpop.f32.mrf.mxu1 }
 0x567   : > { %v837_v53 = vmax.f32 %v835_v50, 0.0  ;;  %v952_v60 = vadd.f32 %v4765_v16, %v951_v51 }
 0x568   : > { %v4027_v54 = vpop.f32.mrf.mxu1 }
 0x569   : > { %v838_v58 = vpack.c.bf16 %v837_v53, %v836_v52  ;;  %v958_v0 = vmax.f32 %v952_v60, 0.0  ;;  %v3708_v53 = vld [vmem:[%s4736_s19 + $0x5] ss:$0 sm:$0xff] }
 0x56a   : > { %v954_v59 = vpop.f32.mrf.mxu1 }
 0x56b   : > { %v955_v61 = vadd.f32 %v4765_v16, %v954_v59  ;;  %4018 = vmatmul.mubr.msk.bf16.vlgmr.msra.gmra.mxu0 %vm407_vm1, %v838_v58 }
 0x56c   : > { %4030 = vmatpush3.bf16.msra.mxu0 %v4751_v14  ;;  %v4028_v62 = vpop.f32.mrf.mxu1  ;;  %4033 = vmatprep.mubr.msk.bf16.mxu0 %vm4596_vm0, %v4595_v2 }
 0x56d   : > { %v959_v63 = vmax.f32 %v955_v61, 0.0  ;;  %4031 = vmatprep.subr.bf16.mxu0 %v4595_v2 }
 0x56f   : > { %v960_v3 = vpack.c.bf16 %v959_v63, %v958_v0 }
 0x570   : > { %4032 = vmatpush3.bf16.msra.mxu0 %v4758_v15 }
 0x571   : > { %4045 = vmatprep.subr.bf16.mxu0 %v4595_v2 }
 0x573   : > { %4034 = vmatmul.mubr.msk.bf16.vlgmr.msra.gmra.mxu0 %vm407_vm1, %v960_v3 }
 0x574   : > { %4046 = vmatpush3.bf16.msra.mxu0 %v4800_v43  ;;  %4049 = vmatprep.mubr.msk.bf16.mxu0 %vm4596_vm0, %v4595_v2 }
 0x575   : > { %4047 = vmatprep.subr.bf16.mxu0 %v4595_v2 }
 0x578   : > { %4048 = vmatpush3.bf16.msra.mxu0 %v4807_v44 }
 0x579   : > { %4061 = vmatprep.subr.bf16.mxu0 %v4595_v2 }
 0x62b   : > { %v4924_v4 = vpop.f32.mrf.mxu0 }
 0x62d   : > { %v4019_v7 = vpop.f32.mrf.mxu0 }
 0x62f   : > { %v4926_v8 = vpop.f32.mrf.mxu0 }
 0x631   : > { %v4020_v10 = vpop.f32.mrf.mxu0 }
 0x633   : > { %v998_v11 = vpop.f32.mrf.mxu0 }
 0x634   : > { %v999_v12 = vadd.f32 %v4789_v28, %v998_v11 }
 0x635   : > { %v4035_v19 = vpop.f32.mrf.mxu0 }
 0x636   : > { %v1005_v20 = vadd.f32 %v999_v12, %v909_v33 }
 0x637   : > { %v1001_v22 = vpop.f32.mrf.mxu0 }
 0x638   : > { %v1002_v23 = vadd.f32 %v4789_v28, %v1001_v22  ;;  %v1015_v25 = vadd.f32 %v3704_v21, %v1005_v20 }
 0x639   : > { %v4036_v24 = vpop.f32.mrf.mxu0 }
 0x63a   : > { %v1006_v29 = vadd.f32 %v1002_v23, %v4869_v32  ;;  %v1017_v31 = vmax.f32 %v1015_v25, 0.0  ;;  %v3713_v23 = vld [vmem:[%s4736_s19 + $0x6] ss:$0 sm:$0xff] }
 0x63c   : > { %v1016_v30 = vadd.f32 %v3704_v21, %v1006_v29  ;;  %v1274_v29 = vadd.f32 %v3713_v23, %v4738_v6 }
 0x63e   : > { %v1018_v34 = vmax.f32 %v1016_v30, 0.0 }
 0x640   : > { %v1019_v35 = vpack.c.bf16 %v1018_v34, %v1017_v31  ;;  %v1276_v31 = vmax.f32 %v1274_v29, 0.0 }
 0x642   : > { %4042 = vmatmul.mubr.msk.bf16.vlgmr.msra.gmra.mxu1 %vm407_vm1, %v1019_v35 }
 0x643   : > { %4054 = vmatpush3.bf16.msra.mxu1 %v4824_v55  ;;  %4057 = vmatprep.mubr.msk.bf16.mxu1 %vm4596_vm0, %v4595_v2 }
 0x644   : > { %4055 = vmatprep.subr.bf16.mxu1 %v4595_v2 }
 0x647   : > { %4056 = vmatpush3.bf16.msra.mxu1 %v4831_v56 }
 0x648   : > { %4069 = vmatprep.subr.bf16.mxu1 %v4595_v2 }
 0x702   : > { %v1057_v33 = vpop.f32.mrf.mxu1 }
 0x703   : > { %v1058_v32 = vadd.f32 %v4814_v45, %v1057_v33 }
 0x704   : > { %v4043_v36 = vpop.f32.mrf.mxu1 }
 0x705   : > { %v1064_v46 = vmax.f32 %v1058_v32, 0.0 }
 0x706   : > { %v1060_v40 = vpop.f32.mrf.mxu1 }
 0x707   : > { %v1061_v41 = vadd.f32 %v4814_v45, %v1060_v40 }
 0x708   : > { %v4044_v42 = vpop.f32.mrf.mxu1 }
 0x709   : > { %v1065_v47 = vmax.f32 %v1061_v41, 0.0 }
 0x70b   : > { %v1066_v48 = vpack.c.bf16 %v1065_v47, %v1064_v46 }
 0x70d   : > { %4050 = vmatmul.mubr.msk.bf16.vlgmr.msra.gmra.mxu0 %vm407_vm1, %v1066_v48 }
 0x70e   : > { %4062 = vmatpush3.bf16.msra.mxu0 %v4849_v13  ;;  %4065 = vmatprep.mubr.msk.bf16.mxu0 %vm4596_vm0, %v4595_v2 }
 0x70f   : > { %4063 = vmatprep.subr.bf16.mxu0 %v4595_v2 }
 0x712   : > { %4064 = vmatpush3.bf16.msra.mxu0 %v4856_v17 }
 0x713   : > { %4077 = vmatprep.subr.bf16.mxu0 %v4595_v2 }
 0x7cd   : > { %v1104_v49 = vpop.f32.mrf.mxu0 }
 0x7ce   : > { %v1105_v50 = vadd.f32 %v4838_v57, %v1104_v49 }
 0x7cf   : > { %v4051_v51 = vpop.f32.mrf.mxu0 }
 0x7d0   : > { %v1111_v52 = vadd.f32 %v1105_v50, %v1015_v25  ;;  %v4962_v25 = vadd.f32 %v3713_v23, %v4742_v9 }
 0x7d1   : > { %v1107_v54 = vpop.f32.mrf.mxu0 }
 0x7d2   : > { %v1108_v58 = vadd.f32 %v4838_v57, %v1107_v54  ;;  %v1121_v60 = vadd.f32 %v3708_v53, %v1111_v52 }
 0x7d3   : > { %v4052_v59 = vpop.f32.mrf.mxu0 }
 0x7d4   : > { %v1112_v61 = vadd.f32 %v1108_v58, %v1016_v30  ;;  %v1123_v63 = vmax.f32 %v1121_v60, 0.0  ;;  %v1277_v30 = vmax.f32 %v4962_v25, 0.0 }
 0x7d6   : > { %v1122_v62 = vadd.f32 %v3708_v53, %v1112_v61  ;;  %v1278_v34 = vpack.c.bf16 %v1277_v30, %v1276_v31 }
 0x7d8   : > { %v1124_v0 = vmax.f32 %v1122_v62, 0.0 }
 0x7da   : > { %v1125_v3 = vpack.c.bf16 %v1124_v0, %v1123_v63 }
 0x7dc   : > { %4058 = vmatmul.mubr.msk.bf16.vlgmr.msra.gmra.mxu1 %vm407_vm1, %v1125_v3 }
 0x7dd   : > { %4070 = vmatpush3.bf16.msra.mxu1 %v4890_v37  ;;  %4073 = vmatprep.mubr.msk.bf16.mxu1 %vm4596_vm0, %v4595_v2 }
 0x7de   : > { %4071 = vmatprep.subr.bf16.mxu1 %v4595_v2 }
 0x7e1   : > { %4072 = vmatpush3.bf16.msra.mxu1 %v4897_v38 }
 0x7e2   : > { %4085 = vmatprep.subr.bf16.mxu1 %v4595_v2 }
 0x89c   : > { %v1163_v7 = vpop.f32.mrf.mxu1 }
 0x89d   : > { %v1164_v11 = vadd.f32 %v4863_v18, %v1163_v7 }
 0x89e   : > { %v4059_v10 = vpop.f32.mrf.mxu1 }
 0x89f   : > { %v1170_v21 = vmax.f32 %v1164_v11, 0.0 }
 0x8a0   : > { %v1166_v12 = vpop.f32.mrf.mxu1 }
 0x8a1   : > { %v1167_v19 = vadd.f32 %v4863_v18, %v1166_v12 }
 0x8a2   : > { %v4060_v20 = vpop.f32.mrf.mxu1 }
 0x8a3   : > { %v1171_v22 = vmax.f32 %v1167_v19, 0.0 }
 0x8a5   : > { %v1172_v24 = vpack.c.bf16 %v1171_v22, %v1170_v21  ;;  %v3717_v22 = vld [vmem:[%s4736_s19 + $0x7] ss:$0 sm:$0xff] }
 0x8a7   : > { %4066 = vmatmul.mubr.msk.bf16.vlgmr.msra.gmra.mxu0 %vm407_vm1, %v1172_v24 }
 0x8a8   : > { %4078 = vmatpush3.bf16.msra.mxu0 %v4712_v1  ;;  %4081 = vmatprep.mubr.msk.bf16.mxu0 %vm4596_vm0, %v4595_v2 }
 0x8a9   : > { %4079 = vmatprep.subr.bf16.mxu0 %v4595_v2 }
 0x8ac   : > { %4080 = vmatpush3.bf16.msra.mxu0 %v4724_v5 }
 0x8ad   : > { %4093 = vmatprep.subr.bf16.mxu0 %v4595_v2 }
 0x8af   : > { %4082 = vmatmul.mubr.msk.bf16.vlgmr.msra.gmra.mxu0 %vm407_vm1, %v1278_v34 }
 0x8b0   : > { %4094 = vmatpush3.bf16.msra.mxu0 %v4775_v26  ;;  %4097 = vmatprep.mubr.msk.bf16.mxu0 %vm4596_vm0, %v4595_v2 }
 0x8b1   : > { %4095 = vmatprep.subr.bf16.mxu0 %v4595_v2 }
 0x8b4   : > { %4096 = vmatpush3.bf16.msra.mxu0 %v4782_v27 }
 0x8b5   : > { %4109 = vmatprep.subr.bf16.mxu0 %v4595_v2 }
 0x967   : > { %v1210_v35 = vpop.f32.mrf.mxu0 }
 0x968   : > { %v1211_v33 = vadd.f32 %v4904_v39, %v1210_v35 }
 0x969   : > { %v4067_v36 = vpop.f32.mrf.mxu0 }
 0x96a   : > { %v1217_v40 = vadd.f32 %v1211_v33, %v1121_v60 }
 0x96b   : > { %v1213_v32 = vpop.f32.mrf.mxu0 }
 0x96c   : > { %v1214_v41 = vadd.f32 %v4904_v39, %v1213_v32  ;;  %v1219_v48 = vmax.f32 %v1217_v40, 0.0 }
 0x96d   : > { %v4068_v42 = vpop.f32.mrf.mxu0 }
 0x96e   : > { %v1218_v46 = vadd.f32 %v1214_v41, %v1122_v62  ;;  %v5001_v62 = vld [vmem:[%s5593_s7] ss:$0 sm:$0xff] }
 0x96f   : > { %v1316_v47 = vpop.f32.mrf.mxu0 }
 0x970   : > { %v1220_v49 = vmax.f32 %v1218_v46, 0.0  ;;  %v1317_v53 = vadd.f32 %v4765_v16, %v1316_v47 }
 0x971   : > { %v4083_v50 = vpop.f32.mrf.mxu0 }
 0x972   : > { %v1221_v51 = vpack.c.bf16 %v1220_v49, %v1219_v48  ;;  %v1323_v60 = vmax.f32 %v1317_v53, 0.0 }
 0x973   : > { %v1319_v52 = vpop.f32.mrf.mxu0 }
 0x974   : > { %v1320_v54 = vadd.f32 %v4765_v16, %v1319_v52  ;;  %4074 = vmatmul.mubr.msk.bf16.vlgmr.msra.gmra.mxu1 %vm407_vm1, %v1221_v51 }
 0x975   : > { %4086 = vmatpush3.bf16.msra.mxu1 %v4751_v14  ;;  %v4084_v58 = vpop.f32.mrf.mxu0  ;;  %4089 = vmatprep.mubr.msk.bf16.mxu1 %vm4596_vm0, %v4595_v2 }
 0x976   : > { %v1324_v59 = vmax.f32 %v1320_v54, 0.0  ;;  %4087 = vmatprep.subr.bf16.mxu1 %v4595_v2  ;;  %v3721_v54 = vld [vmem:[%s4736_s19 + $0x8] ss:$0 sm:$0xff] }
 0x978   : > { %v1325_v61 = vpack.c.bf16 %v1324_v59, %v1323_v60 }
 0x979   : > { %4088 = vmatpush3.bf16.msra.mxu1 %v4758_v15 }
 0x97a   : > { %4101 = vmatprep.subr.bf16.mxu1 %v4595_v2 }
 0x97c   : > { %4090 = vmatmul.mubr.msk.bf16.vlgmr.msra.gmra.mxu1 %vm407_vm1, %v1325_v61 }
 0x97d   : > { %4102 = vmatpush3.bf16.msra.mxu1 %v4800_v43  ;;  %4105 = vmatprep.mubr.msk.bf16.mxu1 %vm4596_vm0, %v4595_v2 }
 0x97e   : > { %4103 = vmatprep.subr.bf16.mxu1 %v4595_v2 }
 0x981   : > { %4104 = vmatpush3.bf16.msra.mxu1 %v4807_v44 }
 0x982   : > { %4117 = vmatprep.subr.bf16.mxu1 %v4595_v2 }
 0xa34   : > { %v1259_v63 = vpop.f32.mrf.mxu1 }
 0xa35   : > { %v1260_v0 = vadd.f32 %v5001_v62, %v1259_v63 }
 0xa36   : > { %v4075_v3 = vpop.f32.mrf.mxu1 }
 0xa37   : > { %3458 = vrot.lane.b32.xlu1 %v1260_v0, %s4597_s25 }
 0xa38   : > { %v1262_v7 = vpop.f32.mrf.mxu1 }
 0xa39   : > { %v1263_v10 = vadd.f32 %v5001_v62, %v1262_v7 }
 0xa3a   : > { %v4076_v11 = vpop.f32.mrf.mxu1 }
 0xa3b   : > { %3460 = vrot.lane.b32.xlu1 %v1263_v10, %s4597_s25  ;;  %s4601_s25 = smov 80  }
 0xa3c   : > { %v1363_v12 = vpop.f32.mrf.mxu1 }
 0xa3d   : > { %v1364_v19 = vadd.f32 %v4789_v28, %v1363_v12 }
 0xa3e   : > { %v4091_v20 = vpop.f32.mrf.mxu1 }
 0xa3f   : > { %v1370_v21 = vadd.f32 %v1364_v19, %v1274_v29 }
 0xa40   : > { %v1366_v23 = vpop.f32.mrf.mxu1 }
 0xa41   : > { %v1367_v24 = vadd.f32 %v4789_v28, %v1366_v23  ;;  %v1380_v31 = vadd.f32 %v3717_v22, %v1370_v21 }
 0xa42   : > { %v4092_v30 = vpop.f32.mrf.mxu1 }
 0xa43   : > { %v1371_v34 = vadd.f32 %v1367_v24, %v4962_v25  ;;  %v1382_v33 = vmax.f32 %v1380_v31, 0.0  ;;  %v3726_v30 = vld [vmem:[%s4736_s19 + $0x9] ss:$0 sm:$0xff] }
 0xa45   : > { %v1381_v35 = vadd.f32 %v3717_v22, %v1371_v34  ;;  %v5039_v34 = vadd.f32 %v3726_v30, %v4742_v9 }
 0xa47   : > { %v1383_v36 = vmax.f32 %v1381_v35, 0.0 }
 0xa49   : > { %v1384_v32 = vpack.c.bf16 %v1383_v36, %v1382_v33  ;;  %v1642_v33 = vmax.f32 %v5039_v34, 0.0 }
 0xa4b   : > { %4098 = vmatmul.mubr.msk.bf16.vlgmr.msra.gmra.mxu0 %vm407_vm1, %v1384_v32 }
 0xa4c   : > { %4110 = vmatpush3.bf16.msra.mxu0 %v4824_v55  ;;  %4113 = vmatprep.mubr.msk.bf16.mxu0 %vm4596_vm0, %v4595_v2 }
 0xa4d   : > { %4111 = vmatprep.subr.bf16.mxu0 %v4595_v2 }
 0xa50   : > { %4112 = vmatpush3.bf16.msra.mxu0 %v4831_v56 }
 0xa51   : > { %4125 = vmatprep.subr.bf16.mxu0 %v4595_v2 }
 0xb0b   : > { %v1422_v29 = vpop.f32.mrf.mxu0 }
 0xb0c   : > { %v1423_v25 = vadd.f32 %v4814_v45, %v1422_v29 }
 0xb0d   : > { %v4099_v40 = vpop.f32.mrf.mxu0 }
 0xb0e   : > { %v1429_v47 = vmax.f32 %v1423_v25, 0.0 }
 0xb0f   : > { %v1425_v41 = vpop.f32.mrf.mxu0 }
 0xb10   : > { %v1426_v42 = vadd.f32 %v4814_v45, %v1425_v41 }
 0xb11   : > { %v4100_v46 = vpop.f32.mrf.mxu0 }
 0xb12   : > { %v1430_v48 = vmax.f32 %v1426_v42, 0.0 }
 0xb14   : > { %v1431_v49 = vpack.c.bf16 %v1430_v48, %v1429_v47 }
 0xb16   : > { %4106 = vmatmul.mubr.msk.bf16.vlgmr.msra.gmra.mxu1 %vm407_vm1, %v1431_v49 }
 0xb17   : > { %4118 = vmatpush3.bf16.msra.mxu1 %v4849_v13  ;;  %4121 = vmatprep.mubr.msk.bf16.mxu1 %vm4596_vm0, %v4595_v2 }
 0xb18   : > { %4119 = vmatprep.subr.bf16.mxu1 %v4595_v2 }
 0xb1b   : > { %4120 = vmatpush3.bf16.msra.mxu1 %v4856_v17 }
 0xb1c   : > { %4133 = vmatprep.subr.bf16.mxu1 %v4595_v2 }
 0xbd6   : > { %v1469_v50 = vpop.f32.mrf.mxu1 }
 0xbd7   : > { %v1470_v51 = vadd.f32 %v4838_v57, %v1469_v50 }
 0xbd8   : > { %v4107_v52 = vpop.f32.mrf.mxu1 }
 0xbd9   : > { %v1476_v53 = vadd.f32 %v1470_v51, %v1380_v31 }
 0xbda   : > { %v1472_v58 = vpop.f32.mrf.mxu1 }
 0xbdb   : > { %v1473_v59 = vadd.f32 %v4838_v57, %v1472_v58  ;;  %v1486_v61 = vadd.f32 %v3721_v54, %v1476_v53 }
 0xbdc   : > { %v4108_v60 = vpop.f32.mrf.mxu1 }
 0xbdd   : > { %v1477_v63 = vadd.f32 %v1473_v59, %v1381_v35  ;;  %v1488_v3 = vmax.f32 %v1486_v61, 0.0  ;;  %v1639_v35 = vadd.f32 %v3726_v30, %v4738_v6 }
 0xbdf   : > { %v1487_v0 = vadd.f32 %v3721_v54, %v1477_v63  ;;  %v1641_v36 = vmax.f32 %v1639_v35, 0.0 }
 0xbe1   : > { %v1489_v7 = vmax.f32 %v1487_v0, 0.0  ;;  %v1643_v32 = vpack.c.bf16 %v1642_v33, %v1641_v36 }
 0xbe3   : > { %v1490_v10 = vpack.c.bf16 %v1489_v7, %v1488_v3 }
 0xbe5   : > { %4114 = vmatmul.mubr.msk.bf16.vlgmr.msra.gmra.mxu0 %vm407_vm1, %v1490_v10 }
 0xbe6   : > { %4126 = vmatpush3.bf16.msra.mxu0 %v4890_v37  ;;  %4129 = vmatprep.mubr.msk.bf16.mxu0 %vm4596_vm0, %v4595_v2 }
 0xbe7   : > { %4127 = vmatprep.subr.bf16.mxu0 %v4595_v2 }
 0xbea   : > { %4128 = vmatpush3.bf16.msra.mxu0 %v4897_v38 }
 0xbeb   : > { %4141 = vmatprep.subr.bf16.mxu0 %v4595_v2 }
 0xca5   : > { %v1528_v11 = vpop.f32.mrf.mxu0 }
 0xca6   : > { %v1529_v19 = vadd.f32 %v4863_v18, %v1528_v11 }
 0xca7   : > { %v4115_v12 = vpop.f32.mrf.mxu0 }
 0xca8   : > { %v1535_v23 = vmax.f32 %v1529_v19, 0.0 }
 0xca9   : > { %v1531_v20 = vpop.f32.mrf.mxu0 }
 0xcaa   : > { %v1532_v21 = vadd.f32 %v4863_v18, %v1531_v20 }
 0xcab   : > { %v4116_v22 = vpop.f32.mrf.mxu0 }
 0xcac   : > { %v1536_v24 = vmax.f32 %v1532_v21, 0.0  ;;  %v3730_v22 = vld [vmem:[%s4736_s19 + $0xa] ss:$0 sm:$0xff] }
 0xcae   : > { %v1537_v31 = vpack.c.bf16 %v1536_v24, %v1535_v23 }
 0xcb0   : > { %4122 = vmatmul.mubr.msk.bf16.vlgmr.msra.gmra.mxu1 %vm407_vm1, %v1537_v31 }
 0xcb1   : > { %4134 = vmatpush3.bf16.msra.mxu1 %v4712_v1  ;;  %4137 = vmatprep.mubr.msk.bf16.mxu1 %vm4596_vm0, %v4595_v2 }
 0xcb2   : > { %4135 = vmatprep.subr.bf16.mxu1 %v4595_v2 }
 0xcb5   : > { %4136 = vmatpush3.bf16.msra.mxu1 %v4724_v5 }
 0xcb6   : > { %4149 = vmatprep.subr.bf16.mxu1 %v4595_v2 }
 0xcb8   : > { %4138 = vmatmul.mubr.msk.bf16.vlgmr.msra.gmra.mxu1 %vm407_vm1, %v1643_v32 }
 0xcb9   : > { %4150 = vmatpush3.bf16.msra.mxu1 %v4775_v26  ;;  %4153 = vmatprep.mubr.msk.bf16.mxu1 %vm4596_vm0, %v4595_v2 }
 0xcba   : > { %4151 = vmatprep.subr.bf16.mxu1 %v4595_v2 }
 0xcbd   : > { %4152 = vmatpush3.bf16.msra.mxu1 %v4782_v27 }
 0xcbe   : > { %4165 = vmatprep.subr.bf16.mxu1 %v4595_v2 }
 0xd70   : > { %v1575_v1 = vpop.f32.mrf.mxu1 }
 0xd71   : > { %v1576_v29 = vadd.f32 %v4904_v39, %v1575_v1 }
 0xd72   : > { %v4123_v5 = vpop.f32.mrf.mxu1 }
 0xd73   : > { %v1582_v25 = vadd.f32 %v1576_v29, %v1486_v61 }
 0xd74   : > { %v1578_v40 = vpop.f32.mrf.mxu1 }
 0xd75   : > { %v1579_v41 = vadd.f32 %v4904_v39, %v1578_v40  ;;  %v1584_v48 = vmax.f32 %v1582_v25, 0.0 }
 0xd76   : > { %v4124_v42 = vpop.f32.mrf.mxu1 }
 0xd77   : > { %v1583_v46 = vadd.f32 %v1579_v41, %v1487_v0 }
 0xd78   : > { %v1681_v47 = vpop.f32.mrf.mxu1 }
 0xd79   : > { %v1585_v49 = vmax.f32 %v1583_v46, 0.0  ;;  %v1682_v53 = vadd.f32 %v4765_v16, %v1681_v47 }
 0xd7a   : > { %v4139_v50 = vpop.f32.mrf.mxu1 }
 0xd7b   : > { %v1586_v51 = vpack.c.bf16 %v1585_v49, %v1584_v48  ;;  %v1688_v60 = vmax.f32 %v1682_v53, 0.0 }
 0xd7c   : > { %v1684_v52 = vpop.f32.mrf.mxu1 }
 0xd7d   : > { %v1685_v54 = vadd.f32 %v4765_v16, %v1684_v52  ;;  %4130 = vmatmul.mubr.msk.bf16.vlgmr.msra.gmra.mxu0 %vm407_vm1, %v1586_v51  ;;  %v3734_v52 = vld [vmem:[%s4736_s19 + $0xb] ss:$0 sm:$0xff] }
 0xd7e   : > { %4142 = vmatpush3.bf16.msra.mxu0 %v4751_v14  ;;  %v4140_v58 = vpop.f32.mrf.mxu1  ;;  %4145 = vmatprep.mubr.msk.bf16.mxu0 %vm4596_vm0, %v4595_v2 }
 0xd7f   : > { %v1689_v59 = vmax.f32 %v1685_v54, 0.0  ;;  %4143 = vmatprep.subr.bf16.mxu0 %v4595_v2 }
 0xd81   : > { %v1690_v61 = vpack.c.bf16 %v1689_v59, %v1688_v60 }
 0xd82   : > { %4144 = vmatpush3.bf16.msra.mxu0 %v4758_v15 }
 0xd83   : > { %4157 = vmatprep.subr.bf16.mxu0 %v4595_v2 }
 0xd85   : > { %4146 = vmatmul.mubr.msk.bf16.vlgmr.msra.gmra.mxu0 %vm407_vm1, %v1690_v61 }
 0xd86   : > { %4158 = vmatpush3.bf16.msra.mxu0 %v4800_v43  ;;  %4161 = vmatprep.mubr.msk.bf16.mxu0 %vm4596_vm0, %v4595_v2 }
 0xd87   : > { %4159 = vmatprep.subr.bf16.mxu0 %v4595_v2 }
 0xd8a   : > { %4160 = vmatpush3.bf16.msra.mxu0 %v4807_v44 }
 0xd8b   : > { %4173 = vmatprep.subr.bf16.mxu0 %v4595_v2 }
 0xe3d   : > { %v1624_v63 = vpop.f32.mrf.mxu0 }
 0xe3e   : > { %v1625_v0 = vadd.f32 %v5001_v62, %v1624_v63 }
 0xe3f   : > { %v4131_v3 = vpop.f32.mrf.mxu0 }
 0xe40   : > { %3466 = vrot.lane.b32.xlu0 %v1625_v0, %s4598_s26 }
 0xe41   : > { %v1627_v7 = vpop.f32.mrf.mxu0 }
 0xe42   : > { %v1628_v10 = vadd.f32 %v5001_v62, %v1627_v7 }
 0xe43   : > { %v4132_v11 = vpop.f32.mrf.mxu0 }
 0xe44   : > { %3468 = vrot.lane.b32.xlu1 %v1628_v10, %s4598_s26 }
 0xe45   : > { %v1728_v12 = vpop.f32.mrf.mxu0 }
 0xe46   : > { %v1729_v19 = vadd.f32 %v4789_v28, %v1728_v12 }
 0xe47   : > { %v4147_v20 = vpop.f32.mrf.mxu0 }
 0xe48   : > { %v1735_v21 = vadd.f32 %v1729_v19, %v1639_v35 }
 0xe49   : > { %v1731_v23 = vpop.f32.mrf.mxu0 }
 0xe4a   : > { %v1732_v24 = vadd.f32 %v4789_v28, %v1731_v23  ;;  %v1745_v31 = vadd.f32 %v3730_v22, %v1735_v21  ;;  %v3739_v23 = vld [vmem:[%s4736_s19 + $0xc] ss:$0 sm:$0xff] }
 0xe4b   : > { %v4148_v30 = vpop.f32.mrf.mxu0 }
 0xe4c   : > { %v1736_v33 = vadd.f32 %v1732_v24, %v5039_v34  ;;  %v1747_v32 = vmax.f32 %v1745_v31, 0.0  ;;  %v5111_v30 = vadd.f32 %v3739_v23, %v4742_v9 }
 0xe4e   : > { %v1746_v36 = vadd.f32 %v3730_v22, %v1736_v33  ;;  %v5118_v33 = vld [vmem:[%s5588_s2 + $0x8] sm:$0xff]  }
 0xe50   : > { %v1748_v1 = vmax.f32 %v1746_v36, 0.0 }
 0xe52   : > { %v1749_v29 = vpack.c.bf16 %v1748_v1, %v1747_v32  ;;  %v5128_v1 = vld [vmem:[%s5588_s2] sm:$0xff]  }
 0xe54   : > { %4154 = vmatmul.mubr.msk.bf16.vlgmr.msra.gmra.mxu1 %vm407_vm1, %v1749_v29 }
 0xe55   : > { %4166 = vmatpush3.bf16.msra.mxu1 %v4824_v55  ;;  %4169 = vmatprep.mubr.msk.bf16.mxu1 %vm4596_vm0, %v4595_v2 }
 0xe56   : > { %4167 = vmatprep.subr.bf16.mxu1 %v4595_v2 }
 0xe59   : > { %4168 = vmatpush3.bf16.msra.mxu1 %v4831_v56 }
 0xe5a   : > { %4181 = vmatprep.subr.bf16.mxu1 %v4595_v2 }
 0xf14   : > { %v1787_v35 = vpop.f32.mrf.mxu1 }
 0xf15   : > { %v1788_v34 = vadd.f32 %v4814_v45, %v1787_v35 }
 0xf16   : > { %v4155_v5 = vpop.f32.mrf.mxu1 }
 0xf17   : > { %v1794_v42 = vmax.f32 %v1788_v34, 0.0 }
 0xf18   : > { %v1790_v40 = vpop.f32.mrf.mxu1 }
 0xf19   : > { %v1791_v25 = vadd.f32 %v4814_v45, %v1790_v40 }
 0xf1a   : > { %v4156_v41 = vpop.f32.mrf.mxu1 }
 0xf1b   : > { %v1795_v46 = vmax.f32 %v1791_v25, 0.0 }
 0xf1d   : > { %v1796_v47 = vpack.c.bf16 %v1795_v46, %v1794_v42 }
 0xf1f   : > { %4162 = vmatmul.mubr.msk.bf16.vlgmr.msra.gmra.mxu0 %vm407_vm1, %v1796_v47 }
 0xf20   : > { %4174 = vmatpush3.bf16.msra.mxu0 %v4849_v13  ;;  %4177 = vmatprep.mubr.msk.bf16.mxu0 %vm4596_vm0, %v4595_v2 }
 0xf21   : > { %4175 = vmatprep.subr.bf16.mxu0 %v4595_v2 }
 0xf24   : > { %4176 = vmatpush3.bf16.msra.mxu0 %v4856_v17 }
 0xf25   : > { %4189 = vmatprep.subr.bf16.mxu0 %v4595_v2 }
 0xfdf   : > { %v1834_v48 = vpop.f32.mrf.mxu0 }
 0xfe0   : > { %v1835_v49 = vadd.f32 %v4838_v57, %v1834_v48 }
 0xfe1   : > { %v4163_v50 = vpop.f32.mrf.mxu0 }
 0xfe2   : > { %v1841_v51 = vadd.f32 %v1835_v49, %v1745_v31  ;;  %v2004_v31 = vadd.f32 %v3739_v23, %v4738_v6 }
 0xfe3   : > { %v1837_v53 = vpop.f32.mrf.mxu0 }
 0xfe4   : > { %v1838_v54 = vadd.f32 %v4838_v57, %v1837_v53  ;;  %v1851_v59 = vadd.f32 %v3734_v52, %v1841_v51  ;;  %v2006_v32 = vmax.f32 %v2004_v31, 0.0 }
 0xfe5   : > { %v4164_v58 = vpop.f32.mrf.mxu0 }
 0xfe6   : > { %v1842_v60 = vadd.f32 %v1838_v54, %v1746_v36  ;;  %v1853_v63 = vmax.f32 %v1851_v59, 0.0  ;;  %v2007_v36 = vmax.f32 %v5111_v30, 0.0 }
 0xfe8   : > { %v1852_v61 = vadd.f32 %v3734_v52, %v1842_v60  ;;  %v2008_v29 = vpack.c.bf16 %v2007_v36, %v2006_v32 }
 0xfea   : > { %v1854_v0 = vmax.f32 %v1852_v61, 0.0 }
 0xfec   : > { %v1855_v3 = vpack.c.bf16 %v1854_v0, %v1853_v63 }
 0xfee   : > { %4170 = vmatmul.mubr.msk.bf16.vlgmr.msra.gmra.mxu1 %vm407_vm1, %v1855_v3 }
 0xfef   : > { %4182 = vmatpush3.bf16.msra.mxu1 %v4890_v37  ;;  %4185 = vmatprep.mubr.msk.bf16.mxu1 %vm4596_vm0, %v4595_v2 }
 0xff0   : > { %4183 = vmatprep.subr.bf16.mxu1 %v4595_v2 }
 0xff3   : > { %4184 = vmatpush3.bf16.msra.mxu1 %v4897_v38 }
 0xff4   : > { %4197 = vmatprep.subr.bf16.mxu1 %v4595_v2 }
0x10ae   : > { %v1893_v7 = vpop.f32.mrf.mxu1 }
0x10af   : > { %v1894_v11 = vadd.f32 %v4863_v18, %v1893_v7 }
0x10b0   : > { %v4171_v10 = vpop.f32.mrf.mxu1 }
0x10b1   : > { %v1900_v21 = vmax.f32 %v1894_v11, 0.0  ;;  %v3743_v10 = vld [vmem:[%s4736_s19 + $0xd] ss:$0 sm:$0xff] }
0x10b2   : > { %v1896_v12 = vpop.f32.mrf.mxu1 }
0x10b3   : > { %v1897_v19 = vadd.f32 %v4863_v18, %v1896_v12 }
0x10b4   : > { %v4172_v20 = vpop.f32.mrf.mxu1 }
0x10b5   : > { %v1901_v22 = vmax.f32 %v1897_v19, 0.0 }
0x10b7   : > { %v1902_v24 = vpack.c.bf16 %v1901_v22, %v1900_v21 }
0x10b9   : > { %4178 = vmatmul.mubr.msk.bf16.vlgmr.msra.gmra.mxu0 %vm407_vm1, %v1902_v24 }
0x10ba   : > { %4190 = vmatpush3.bf16.msra.mxu0 %v5118_v33  ;;  %4193 = vmatprep.mubr.msk.bf16.mxu0 %vm4596_vm0, %v4595_v2 }
0x10bb   : > { %4191 = vmatprep.subr.bf16.mxu0 %v4595_v2 }
0x10be   : > { %4192 = vmatpush3.bf16.msra.mxu0 %v5128_v1 }
0x10bf   : > { %4205 = vmatprep.subr.bf16.mxu0 %v4595_v2 }
0x10c1   : > { %4194 = vmatmul.mubr.msk.bf16.vlgmr.msra.gmra.mxu0 %vm407_vm1, %v2008_v29 }
0x10c2   : > { %4206 = vmatpush3.bf16.msra.mxu0 %v4775_v26  ;;  %4209 = vmatprep.mubr.msk.bf16.mxu0 %vm4596_vm0, %v4595_v2 }
0x10c3   : > { %4207 = vmatprep.subr.bf16.mxu0 %v4595_v2 }
0x10c6   : > { %4208 = vmatpush3.bf16.msra.mxu0 %v4782_v27 }
0x10c7   : > { %4221 = vmatprep.subr.bf16.mxu0 %v4595_v2 }
0x1179   : > { %v1940_v35 = vpop.f32.mrf.mxu0 }
0x117a   : > { %v1941_v5 = vadd.f32 %v4904_v39, %v1940_v35 }
0x117b   : > { %v4179_v34 = vpop.f32.mrf.mxu0 }
0x117c   : > { %v1947_v25 = vadd.f32 %v1941_v5, %v1851_v59 }
0x117d   : > { %v1943_v40 = vpop.f32.mrf.mxu0 }
0x117e   : > { %v1944_v41 = vadd.f32 %v4904_v39, %v1943_v40  ;;  %v1949_v47 = vmax.f32 %v1947_v25, 0.0  ;;  %v3747_v25 = vld [vmem:[%s4736_s19 + $0xe] ss:$0 sm:$0xff] }
0x117f   : > { %v4180_v42 = vpop.f32.mrf.mxu0 }
0x1180   : > { %v1948_v46 = vadd.f32 %v1944_v41, %v1852_v61 }
0x1181   : > { %v2046_v26 = vpop.f32.mrf.mxu0 }
0x1182   : > { %v1950_v48 = vmax.f32 %v1948_v46, 0.0  ;;  %v2047_v27 = vadd.f32 %v4765_v16, %v2046_v26 }
0x1183   : > { %v4195_v49 = vpop.f32.mrf.mxu0 }
0x1184   : > { %v1951_v50 = vpack.c.bf16 %v1950_v48, %v1949_v47  ;;  %v2053_v58 = vmax.f32 %v2047_v27, 0.0 }
0x1185   : > { %v2049_v51 = vpop.f32.mrf.mxu0 }
0x1186   : > { %v2050_v52 = vadd.f32 %v4765_v16, %v2049_v51  ;;  %4186 = vmatmul.mubr.msk.bf16.vlgmr.msra.gmra.mxu1 %vm407_vm1, %v1951_v50 }
0x1187   : > { %4198 = vmatpush3.bf16.msra.mxu1 %v4751_v14  ;;  %v4196_v53 = vpop.f32.mrf.mxu0  ;;  %4201 = vmatprep.mubr.msk.bf16.mxu1 %vm4596_vm0, %v4595_v2 }
0x1188   : > { %v2054_v54 = vmax.f32 %v2050_v52, 0.0  ;;  %4199 = vmatprep.subr.bf16.mxu1 %v4595_v2 }
0x118a   : > { %v2055_v59 = vpack.c.bf16 %v2054_v54, %v2053_v58 }
0x118b   : > { %4200 = vmatpush3.bf16.msra.mxu1 %v4758_v15 }
0x118c   : > { %4213 = vmatprep.subr.bf16.mxu1 %v4595_v2 }
0x118e   : > { %4202 = vmatmul.mubr.msk.bf16.vlgmr.msra.gmra.mxu1 %vm407_vm1, %v2055_v59 }
0x118f   : > { %4214 = vmatpush3.bf16.msra.mxu1 %v4800_v43  ;;  %4217 = vmatprep.mubr.msk.bf16.mxu1 %vm4596_vm0, %v4595_v2 }
0x1190   : > { %4215 = vmatprep.subr.bf16.mxu1 %v4595_v2 }
0x1193   : > { %4216 = vmatpush3.bf16.msra.mxu1 %v4807_v44 }
0x1194   : > { %4229 = vmatprep.subr.bf16.mxu1 %v4595_v2 }
0x1246   : > { %v1989_v14 = vpop.f32.mrf.mxu1 }
0x1247   : > { %v1990_v15 = vadd.f32 %v5001_v62, %v1989_v14 }
0x1248   : > { %v4187_v16 = vpop.f32.mrf.mxu1 }
0x1249   : > { %3474 = vrot.lane.b32.xlu0 %v1990_v15, %s4599_s20 }
0x124a   : > { %v1992_v60 = vpop.f32.mrf.mxu1 }
0x124b   : > { %v1993_v61 = vadd.f32 %v5001_v62, %v1992_v60  ;;  %v5211_v60 = vld [vmem:[%s5588_s2 + $0x18] sm:$0xff]  }
0x124c   : > { %v4188_v43 = vpop.f32.mrf.mxu1 }
0x124d   : > { %3476 = vrot.lane.b32.xlu1 %v1993_v61, %s4599_s20  ;;  %v5220_v61 = vld [vmem:[%s5588_s2 + $0x10] sm:$0xff]   ;;  %s337_s20 = scalar_lea.vmem [#allocation2], %s3643_s16 }
0x124e   : > { %v2093_v63 = vpop.f32.mrf.mxu1  ;;  %s3550_s21 = sshll.u32 %s337_s20, 4  ;;  %s5530_s21 = int_to_ptr.vmem [resolvable:$true] %s3550_s21 }
0x124f   : > { %v2094_v0 = vadd.f32 %v4789_v28, %v2093_v63  ;;  %s4516_s26 = scalar_lea.vmem %s5530_s21, 256 }
0x1250   : > { %v4203_v3 = vpop.f32.mrf.mxu1  ;;  %p4517_p13 = scmp.ne.s32.totalorder %s5530_s21, %s4516_s26 }
0x1251   : > { %v2100_v7 = vadd.f32 %v2094_v0, %v2004_v31 }
0x1252   : > { %v2096_v44 = vpop.f32.mrf.mxu1  ;;  %p4518_p0 = pnand %p4517_p13, %p4692_p4 }
0x1253   : > { %v2097_v11 = vadd.f32 %v4789_v28, %v2096_v44  ;;  %v2110_v19 = vadd.f32 %v3743_v10, %v2100_v7 }
0x1254   : > { %v4204_v12 = vpop.f32.mrf.mxu1  ;;  %p4519_p1 = pneg %p4518_p0 }
0x1255   : > { %v2101_v20 = vadd.f32 %v2097_v11, %v5111_v30  ;;  %v2112_v22 = vmax.f32 %v2110_v19, 0.0 }
0x1257   : > { %v2111_v21 = vadd.f32 %v3743_v10, %v2101_v20 }
0x1259   : > { %v2113_v23 = vmax.f32 %v2111_v21, 0.0 }
0x125b   : > { %v2114_v24 = vpack.c.bf16 %v2113_v23, %v2112_v22 }
0x125d   : > { %4210 = vmatmul.mubr.msk.bf16.vlgmr.msra.gmra.mxu0 %vm407_vm1, %v2114_v24  ;;  %v5229_v24 = vld [vmem:[%s5589_s3] ss:$0 sm:$0xff] }
0x125e   : > { %4222 = vmatpush3.bf16.msra.mxu0 %v4824_v55  ;;  %4225 = vmatprep.mubr.msk.bf16.mxu0 %vm4596_vm0, %v4595_v2 }
0x125f   : > { %4223 = vmatprep.subr.bf16.mxu0 %v4595_v2 }
0x1262   : > { %4224 = vmatpush3.bf16.msra.mxu0 %v4831_v56 }
0x1263   : > { %4237 = vmatprep.subr.bf16.mxu0 %v4595_v2 }
0x131d   : > { %v2152_v28 = vpop.f32.mrf.mxu0 }
0x131e   : > { %v2153_v30 = vadd.f32 %v4814_v45, %v2152_v28 }
0x131f   : > { %v4211_v31 = vpop.f32.mrf.mxu0 }
0x1320   : > { %v2159_v35 = vmax.f32 %v2153_v30, 0.0 }
0x1321   : > { %v2155_v36 = vpop.f32.mrf.mxu0 }
0x1322   : > { %v2156_v32 = vadd.f32 %v4814_v45, %v2155_v36 }
0x1323   : > { %v4212_v29 = vpop.f32.mrf.mxu0 }
0x1324   : > { %v2160_v55 = vmax.f32 %v2156_v32, 0.0  ;;  %v5246_v29 = vld [vmem:[%s5590_s4] sm:$0xff]  }
0x1326   : > { %v2161_v5 = vpack.c.bf16 %v2160_v55, %v2159_v35  ;;  %v5254_v55 = vld [vmem:[%s5590_s4 + $0x18] sm:$0xff]  }
0x1328   : > { %4218 = vmatmul.mubr.msk.bf16.vlgmr.msra.gmra.mxu1 %vm407_vm1, %v2161_v5  ;;  %v5263_v5 = vld [vmem:[%s5590_s4 + $0x10] sm:$0xff]  }
0x1329   : > { %4230 = vmatpush3.bf16.msra.mxu1 %v4849_v13  ;;  %4233 = vmatprep.mubr.msk.bf16.mxu1 %vm4596_vm0, %v4595_v2 }
0x132a   : > { %4231 = vmatprep.subr.bf16.mxu1 %v4595_v2 }
0x132d   : > { %4232 = vmatpush3.bf16.msra.mxu1 %v4856_v17 }
0x132e   : > { %4245 = vmatprep.subr.bf16.mxu1 %v4595_v2 }
0x13e8   : > { %v2199_v56 = vpop.f32.mrf.mxu1 }
0x13e9   : > { %v2200_v45 = vadd.f32 %v4838_v57, %v2199_v56 }
0x13ea   : > { %v4219_v34 = vpop.f32.mrf.mxu1 }
0x13eb   : > { %v2206_v40 = vadd.f32 %v2200_v45, %v2110_v19 }
0x13ec   : > { %v2202_v41 = vpop.f32.mrf.mxu1 }
0x13ed   : > { %v2203_v42 = vadd.f32 %v4838_v57, %v2202_v41  ;;  %v2216_v13 = vadd.f32 %v3747_v25, %v2206_v40 }
0x13ee   : > { %v4220_v46 = vpop.f32.mrf.mxu1 }
0x13ef   : > { %v2207_v26 = vadd.f32 %v2203_v42, %v2111_v21  ;;  %v2218_v48 = vmax.f32 %v2216_v13, 0.0  ;;  %v5272_v46 = vld [vmem:[%s5591_s5] ss:$0 sm:$0xff] }
0x13f1   : > { %v2217_v47 = vadd.f32 %v3747_v25, %v2207_v26 }
0x13f3   : > { %v2219_v49 = vmax.f32 %v2217_v47, 0.0 }
0x13f5   : > { %v2220_v50 = vpack.c.bf16 %v2219_v49, %v2218_v48  ;;  %v3756_v48 = vld [vmem:[%s4736_s19 + $0x10] ss:$0 sm:$0xff] }
0x13f7   : > { %4226 = vmatmul.mubr.msk.bf16.vlgmr.msra.gmra.mxu0 %vm407_vm1, %v2220_v50 }
0x13f8   : > { %4238 = vmatpush3.bf16.msra.mxu0 %v4890_v37  ;;  %4241 = vmatprep.mubr.msk.bf16.mxu0 %vm4596_vm0, %v4595_v2  ;;  %v3752_v37 = vld [vmem:[%s4736_s19 + $0xf] ss:$0 sm:$0xff] }
0x13f9   : > { %4239 = vmatprep.subr.bf16.mxu0 %v4595_v2  ;;  %v5193_v14 = vadd.f32 %v3752_v37, %v4742_v9 }
0x13fc   : > { %4240 = vmatpush3.bf16.msra.mxu0 %v4897_v38  ;;  %v5197_v38 = vadd.f32 %v3752_v37, %v4738_v6  ;;  %v5292_v37 = vld [vmem:[%s5588_s2 + $0x20] sm:$0xff]  }
0x13fd   : > { %4253 = vmatprep.subr.bf16.mxu0 %v4595_v2 }
0x13fe   : > { %v2371_v15 = vmax.f32 %v5197_v38, 0.0 }
0x14b7   : > { %v2258_v57 = vpop.f32.mrf.mxu0 }
0x14b8   : > { %v2259_v51 = vadd.f32 %v4863_v18, %v2258_v57 }
0x14b9   : > { %v4227_v17 = vpop.f32.mrf.mxu0 }
0x14ba   : > { %v2265_v54 = vmax.f32 %v2259_v51, 0.0 }
0x14bb   : > { %v2261_v27 = vpop.f32.mrf.mxu0 }
0x14bc   : > { %v2262_v52 = vadd.f32 %v4863_v18, %v2261_v27  ;;  %v2372_v18 = vmax.f32 %v5193_v14, 0.0 }
0x14bd   : > { %v4228_v53 = vpop.f32.mrf.mxu0 }
0x14be   : > { %v2266_v58 = vmax.f32 %v2262_v52, 0.0  ;;  %v2373_v16 = vpack.c.bf16 %v2372_v18, %v2371_v15 }
0x14c0   : > { %v2267_v59 = vpack.c.bf16 %v2266_v58, %v2265_v54  ;;  %v5283_v58 = vld [vmem:[%s5588_s2 + $0x28] sm:$0xff]  }
0x14c2   : > { %4234 = vmatmul.mubr.msk.bf16.vlgmr.msra.gmra.mxu1 %vm407_vm1, %v2267_v59 }
0x14c3   : > { %4246 = vmatpush3.bf16.msra.mxu1 %v5118_v33  ;;  %4249 = vmatprep.mubr.msk.bf16.mxu1 %vm4596_vm0, %v4595_v2 }
0x14c4   : > { %4247 = vmatprep.subr.bf16.mxu1 %v4595_v2 }
0x14c7   : > { %4248 = vmatpush3.bf16.msra.mxu1 %v5128_v1 }
0x14c8   : > { %4261 = vmatprep.subr.bf16.mxu1 %v4595_v2 }
0x14ca   : > { %4250 = vmatmul.mubr.msk.bf16.vlgmr.msra.gmra.mxu1 %vm407_vm1, %v2373_v16 }
0x14cb   : > { %4262 = vmatpush3.bf16.msra.mxu1 %v5211_v60  ;;  %4265 = vmatprep.mubr.msk.bf16.mxu1 %vm4596_vm0, %v4595_v2 }
0x14cc   : > { %4263 = vmatprep.subr.bf16.mxu1 %v4595_v2 }
0x14cf   : > { %4264 = vmatpush3.bf16.msra.mxu1 %v5220_v61 }
0x14d0   : > { %4277 = vmatprep.subr.bf16.mxu1 %v4595_v2 }
0x1582   : > { %v2305_v43 = vpop.f32.mrf.mxu1 }
0x1583   : > { %v2306_v63 = vadd.f32 %v4904_v39, %v2305_v43 }
0x1584   : > { %v4235_v0 = vpop.f32.mrf.mxu1 }
0x1585   : > { %v2312_v7 = vadd.f32 %v2306_v63, %v2216_v13 }
0x1586   : > { %v2308_v3 = vpop.f32.mrf.mxu1 }
0x1587   : > { %v2309_v10 = vadd.f32 %v4904_v39, %v2308_v3  ;;  %v2314_v19 = vmax.f32 %v2312_v7, 0.0  ;;  %v5237_v39 = vld [vmem:[%s5590_s4 + $0x8] sm:$0xff]  }
0x1588   : > { %v4236_v44 = vpop.f32.mrf.mxu1  ;;  %v5307_v7 = vld [vmem:[%s5590_s4 + $0x28] sm:$0xff]  }
0x1589   : > { %v2313_v11 = vadd.f32 %v2309_v10, %v2217_v47  ;;  %v5316_v10 = vld [vmem:[%s5590_s4 + $0x20] sm:$0xff]  }
0x158a   : > { %v2411_v12 = vpop.f32.mrf.mxu1 }
0x158b   : > { %v2315_v20 = vmax.f32 %v2313_v11, 0.0  ;;  %v2412_v28 = vadd.f32 %v5229_v24, %v2411_v12  ;;  %v5323_v11 = vld [vmem:[%s5591_s5 + $0x1] ss:$0 sm:$0xff] }
0x158c   : > { %v4251_v21 = vpop.f32.mrf.mxu1 }
0x158d   : > { %v2316_v22 = vpack.c.bf16 %v2315_v20, %v2314_v19  ;;  %v2418_v32 = vmax.f32 %v2412_v28, 0.0  ;;  %v3760_v21 = vld [vmem:[%s4736_s19 + $0x11] ss:$0 sm:$0xff] }
0x158e   : > { %v2414_v23 = vpop.f32.mrf.mxu1 }
0x158f   : > { %v2415_v31 = vadd.f32 %v5229_v24, %v2414_v23  ;;  %4242 = vmatmul.mubr.msk.bf16.vlgmr.msra.gmra.mxu0 %vm407_vm1, %v2316_v22 }
0x1590   : > { %4254 = vmatpush3.bf16.msra.mxu0 %v5237_v39  ;;  %v4252_v30 = vpop.f32.mrf.mxu1  ;;  %4257 = vmatprep.mubr.msk.bf16.mxu0 %vm4596_vm0, %v4595_v2 }
0x1591   : > { %v2419_v36 = vmax.f32 %v2415_v31, 0.0  ;;  %4255 = vmatprep.subr.bf16.mxu0 %v4595_v2 }
0x1593   : > { %v2420_v35 = vpack.c.bf16 %v2419_v36, %v2418_v32 }
0x1594   : > { %4256 = vmatpush3.bf16.msra.mxu0 %v5246_v29 }
0x1595   : > { %4269 = vmatprep.subr.bf16.mxu0 %v4595_v2 }
0x1597   : > { %4258 = vmatmul.mubr.msk.bf16.vlgmr.msra.gmra.mxu0 %vm407_vm1, %v2420_v35 }
0x1598   : > { %4270 = vmatpush3.bf16.msra.mxu0 %v5254_v55  ;;  %4273 = vmatprep.mubr.msk.bf16.mxu0 %vm4596_vm0, %v4595_v2 }
0x1599   : > { %4271 = vmatprep.subr.bf16.mxu0 %v4595_v2 }
0x159c   : > { %4272 = vmatpush3.bf16.msra.mxu0 %v5263_v5 }
0x159d   : > { %4285 = vmatprep.subr.bf16.mxu0 %v4595_v2 }
0x164f   : > { %v2354_v56 = vpop.f32.mrf.mxu0 }
0x1650   : > { %v2355_v45 = vadd.f32 %v5001_v62, %v2354_v56 }
0x1651   : > { %v4243_v34 = vpop.f32.mrf.mxu0 }
0x1652   : > { %3482 = vrot.lane.b32.xlu0 %v2355_v45, %s4600_s24  ;;  %v5332_v45 = vld [vmem:[%s5592_s6 + $0x8] sm:$0xff]   ;;  %v5341_v34 = vld [vmem:[%s5592_s6] sm:$0xff]  }
0x1653   : > { %v2357_v40 = vpop.f32.mrf.mxu0 }
0x1654   : > { %v2358_v25 = vadd.f32 %v5001_v62, %v2357_v40 }
0x1655   : > { %v4244_v41 = vpop.f32.mrf.mxu0 }
0x1656   : > { %3484 = vrot.lane.b32.xlu1 %v2358_v25, %s4600_s24  ;;  %v5348_v41 = vld [vmem:[%s5589_s3 + $0x2] ss:$0 sm:$0xff] }
0x1657   : > { %v2458_v42 = vpop.f32.mrf.mxu0 }
0x1658   : > { %v2459_v13 = vadd.f32 %v5272_v46, %v2458_v42 }
0x1659   : > { %v4259_v26 = vpop.f32.mrf.mxu0 }
0x165a   : > { %v2465_v47 = vadd.f32 %v2459_v13, %v5197_v38  ;;  %v5299_v38 = vld [vmem:[%s5589_s3 + $0x1] ss:$0 sm:$0xff] }
0x165b   : > { %v2461_v49 = vpop.f32.mrf.mxu0 }
0x165c   : > { %v2462_v50 = vadd.f32 %v5272_v46, %v2461_v49  ;;  %v2475_v17 = vadd.f32 %v3756_v48, %v2465_v47 }
0x165d   : > { %v4260_v57 = vpop.f32.mrf.mxu0 }
0x165e   : > { %v2466_v51 = vadd.f32 %v2462_v50, %v5193_v14  ;;  %v2477_v52 = vmax.f32 %v2475_v17, 0.0  ;;  %v3765_v50 = vld [vmem:[%s4736_s19 + $0x12] ss:$0 sm:$0xff] }
0x1660   : > { %v2476_v27 = vadd.f32 %v3756_v48, %v2466_v51  ;;  %v2734_v51 = vadd.f32 %v3765_v50, %v4738_v6 }
0x1662   : > { %v2478_v53 = vmax.f32 %v2476_v27, 0.0 }
0x1664   : > { %v2479_v54 = vpack.c.bf16 %v2478_v53, %v2477_v52  ;;  %v2736_v52 = vmax.f32 %v2734_v51, 0.0 }
0x1666   : > { %4266 = vmatmul.mubr.msk.bf16.vlgmr.msra.gmra.mxu1 %vm407_vm1, %v2479_v54 }
0x1667   : > { %4278 = vmatpush3.bf16.msra.mxu1 %v5283_v58  ;;  %4281 = vmatprep.mubr.msk.bf16.mxu1 %vm4596_vm0, %v4595_v2 }
0x1668   : > { %4279 = vmatprep.subr.bf16.mxu1 %v4595_v2 }
0x166b   : > { %4280 = vmatpush3.bf16.msra.mxu1 %v5292_v37 }
0x166c   : > { %4293 = vmatprep.subr.bf16.mxu1 %v4595_v2 }
0x1726   : > { %v2517_v59 = vpop.f32.mrf.mxu1 }
0x1727   : > { %v2518_v18 = vadd.f32 %v5299_v38, %v2517_v59  ;;  %v5375_v59 = vld [vmem:[%s5591_s5 + $0x2] ss:$0 sm:$0xff] }
0x1728   : > { %v4267_v14 = vpop.f32.mrf.mxu1 }
0x1729   : > { %v2524_v63 = vmax.f32 %v2518_v18, 0.0 }
0x172a   : > { %v2520_v15 = vpop.f32.mrf.mxu1 }
0x172b   : > { %v2521_v16 = vadd.f32 %v5299_v38, %v2520_v15 }
0x172c   : > { %v4268_v43 = vpop.f32.mrf.mxu1 }
0x172d   : > { %v2525_v0 = vmax.f32 %v2521_v16, 0.0 }
0x172f   : > { %v2526_v3 = vpack.c.bf16 %v2525_v0, %v2524_v63 }
0x1731   : > { %4274 = vmatmul.mubr.msk.bf16.vlgmr.msra.gmra.mxu0 %vm407_vm1, %v2526_v3 }
0x1732   : > { %4286 = vmatpush3.bf16.msra.mxu0 %v5307_v7  ;;  %4289 = vmatprep.mubr.msk.bf16.mxu0 %vm4596_vm0, %v4595_v2 }
0x1733   : > { %4287 = vmatprep.subr.bf16.mxu0 %v4595_v2 }
0x1736   : > { %4288 = vmatpush3.bf16.msra.mxu0 %v5316_v10 }
0x1737   : > { %4301 = vmatprep.subr.bf16.mxu0 %v4595_v2 }
0x17f1   : > { %v2564_v44 = vpop.f32.mrf.mxu0 }
0x17f2   : > { %v2565_v12 = vadd.f32 %v5323_v11, %v2564_v44 }
0x17f3   : > { %v4275_v19 = vpop.f32.mrf.mxu0 }
0x17f4   : > { %v2571_v20 = vadd.f32 %v2565_v12, %v2475_v17  ;;  %v5354_v17 = vadd.f32 %v3765_v50, %v4742_v9 }
0x17f5   : > { %v2567_v22 = vpop.f32.mrf.mxu0 }
0x17f6   : > { %v2568_v23 = vadd.f32 %v5323_v11, %v2567_v22  ;;  %v2581_v31 = vadd.f32 %v3760_v21, %v2571_v20 }
0x17f7   : > { %v4276_v28 = vpop.f32.mrf.mxu0 }
0x17f8   : > { %v2572_v30 = vadd.f32 %v2568_v23, %v2476_v27  ;;  %v2583_v32 = vmax.f32 %v2581_v31, 0.0  ;;  %v2737_v27 = vmax.f32 %v5354_v17, 0.0 }
0x17fa   : > { %v2582_v36 = vadd.f32 %v3760_v21, %v2572_v30  ;;  %v2738_v53 = vpack.c.bf16 %v2737_v27, %v2736_v52 }
0x17fc   : > { %v2584_v35 = vmax.f32 %v2582_v36, 0.0 }
0x17fe   : > { %v2585_v56 = vpack.c.bf16 %v2584_v35, %v2583_v32 }
0x1800   : > { %4282 = vmatmul.mubr.msk.bf16.vlgmr.msra.gmra.mxu1 %vm407_vm1, %v2585_v56 }
0x1801   : > { %4294 = vmatpush3.bf16.msra.mxu1 %v5332_v45  ;;  %4297 = vmatprep.mubr.msk.bf16.mxu1 %vm4596_vm0, %v4595_v2 }
0x1802   : > { %4295 = vmatprep.subr.bf16.mxu1 %v4595_v2 }
0x1805   : > { %4296 = vmatpush3.bf16.msra.mxu1 %v5341_v34 }
0x1806   : > { %4309 = vmatprep.subr.bf16.mxu1 %v4595_v2 }
0x18c0   : > { %v2623_v40 = vpop.f32.mrf.mxu1 }
0x18c1   : > { %v2624_v42 = vadd.f32 %v5348_v41, %v2623_v40 }
0x18c2   : > { %v4283_v25 = vpop.f32.mrf.mxu1 }
0x18c3   : > { %v2630_v48 = vmax.f32 %v2624_v42, 0.0 }
0x18c4   : > { %v2626_v13 = vpop.f32.mrf.mxu1 }
0x18c5   : > { %v2627_v26 = vadd.f32 %v5348_v41, %v2626_v13 }
0x18c6   : > { %v4284_v47 = vpop.f32.mrf.mxu1 }
0x18c7   : > { %v2631_v49 = vmax.f32 %v2627_v26, 0.0 }
0x18c9   : > { %v2632_v57 = vpack.c.bf16 %v2631_v49, %v2630_v48  ;;  %v3769_v49 = vld [vmem:[%s4736_s19 + $0x13] ss:$0 sm:$0xff] }
0x18cb   : > { %4290 = vmatmul.mubr.msk.bf16.vlgmr.msra.gmra.mxu0 %vm407_vm1, %v2632_v57 }
0x18cc   : > { %4302 = vmatpush3.bf16.msra.mxu0 %v5118_v33  ;;  %4305 = vmatprep.mubr.msk.bf16.mxu0 %vm4596_vm0, %v4595_v2 }
0x18cd   : > { %4303 = vmatprep.subr.bf16.mxu0 %v4595_v2 }
0x18d0   : > { %4304 = vmatpush3.bf16.msra.mxu0 %v5128_v1 }
0x18d1   : > { %4317 = vmatprep.subr.bf16.mxu0 %v4595_v2 }
0x18d3   : > { %4306 = vmatmul.mubr.msk.bf16.vlgmr.msra.gmra.mxu0 %vm407_vm1, %v2738_v53 }
0x18d4   : > { %4318 = vmatpush3.bf16.msra.mxu0 %v5211_v60  ;;  %4321 = vmatprep.mubr.msk.bf16.mxu0 %vm4596_vm0, %v4595_v2 }
0x18d5   : > { %4319 = vmatprep.subr.bf16.mxu0 %v4595_v2 }
0x18d8   : > { %4320 = vmatpush3.bf16.msra.mxu0 %v5220_v61 }
0x18d9   : > { %4333 = vmatprep.subr.bf16.mxu0 %v4595_v2 }
0x198b   : > { %v2670_v54 = vpop.f32.mrf.mxu0 }
0x198c   : > { %v2671_v14 = vadd.f32 %v5375_v59, %v2670_v54 }
0x198d   : > { %v4291_v18 = vpop.f32.mrf.mxu0 }
0x198e   : > { %v2677_v16 = vadd.f32 %v2671_v14, %v2581_v31 }
0x198f   : > { %v2673_v15 = vpop.f32.mrf.mxu0 }
0x1990   : > { %v2674_v43 = vadd.f32 %v5375_v59, %v2673_v15  ;;  %v2679_v44 = vmax.f32 %v2677_v16, 0.0 }
0x1991   : > { %v4292_v63 = vpop.f32.mrf.mxu0 }
0x1992   : > { %v2678_v0 = vadd.f32 %v2674_v43, %v2582_v36 }
0x1993   : > { %v2776_v3 = vpop.f32.mrf.mxu0 }
0x1994   : > { %v2680_v12 = vmax.f32 %v2678_v0, 0.0  ;;  %v2777_v22 = vadd.f32 %v5229_v24, %v2776_v3 }
0x1995   : > { %v4307_v19 = vpop.f32.mrf.mxu0 }
0x1996   : > { %v2681_v20 = vpack.c.bf16 %v2680_v12, %v2679_v44  ;;  %v2783_v30 = vmax.f32 %v2777_v22, 0.0  ;;  %v3773_v22 = vld [vmem:[%s4736_s19 + $0x14] ss:$0 sm:$0xff] }
0x1997   : > { %v2779_v21 = vpop.f32.mrf.mxu0 }
0x1998   : > { %v2780_v23 = vadd.f32 %v5229_v24, %v2779_v21  ;;  %4298 = vmatmul.mubr.msk.bf16.vlgmr.msra.gmra.mxu1 %vm407_vm1, %v2681_v20 }
0x1999   : > { %4310 = vmatpush3.bf16.msra.mxu1 %v5237_v39  ;;  %v4308_v28 = vpop.f32.mrf.mxu0  ;;  %4313 = vmatprep.mubr.msk.bf16.mxu1 %vm4596_vm0, %v4595_v2 }
0x199a   : > { %v2784_v31 = vmax.f32 %v2780_v23, 0.0  ;;  %4311 = vmatprep.subr.bf16.mxu1 %v4595_v2 }
0x199c   : > { %v2785_v36 = vpack.c.bf16 %v2784_v31, %v2783_v30 }
0x199d   : > { %4312 = vmatpush3.bf16.msra.mxu1 %v5246_v29 }
0x199e   : > { %4325 = vmatprep.subr.bf16.mxu1 %v4595_v2 }
0x19a0   : > { %4314 = vmatmul.mubr.msk.bf16.vlgmr.msra.gmra.mxu1 %vm407_vm1, %v2785_v36 }
0x19a1   : > { %4326 = vmatpush3.bf16.msra.mxu1 %v5254_v55  ;;  %4329 = vmatprep.mubr.msk.bf16.mxu1 %vm4596_vm0, %v4595_v2 }
0x19a2   : > { %4327 = vmatprep.subr.bf16.mxu1 %v4595_v2 }
0x19a5   : > { %4328 = vmatpush3.bf16.msra.mxu1 %v5263_v5 }
0x19a6   : > { %4341 = vmatprep.subr.bf16.mxu1 %v4595_v2 }
0x1a58   : > { %v2719_v32 = vpop.f32.mrf.mxu1 }
0x1a59   : > { %v2720_v35 = vadd.f32 %v5001_v62, %v2719_v32 }
0x1a5a   : > { %v4299_v56 = vpop.f32.mrf.mxu1 }
0x1a5b   : > { %3490 = vrot.lane.b32.xlu0 %v2720_v35, %s4601_s25 }
0x1a5c   : > { %v2722_v40 = vpop.f32.mrf.mxu1 }
0x1a5d   : > { %v2723_v25 = vadd.f32 %v5001_v62, %v2722_v40 }
0x1a5e   : > { %v4300_v42 = vpop.f32.mrf.mxu1 }
0x1a5f   : > { %3492 = vrot.lane.b32.xlu1 %v2723_v25, %s4601_s25  ;;  %s5536_s25 = scalar_lea.hbm %s5594_s8, %s3796_s22 }
0x1a60   : > { %v2823_v13 = vpop.f32.mrf.mxu1 }
0x1a61   : > { %v2824_v26 = vadd.f32 %v5272_v46, %v2823_v13 }
0x1a62   : > { %v4315_v47 = vpop.f32.mrf.mxu1 }
0x1a63   : > { %v2830_v48 = vadd.f32 %v2824_v26, %v2734_v51 }
0x1a64   : > { %v2826_v50 = vpop.f32.mrf.mxu1 }
0x1a65   : > { %v2827_v57 = vadd.f32 %v5272_v46, %v2826_v50  ;;  %v2840_v52 = vadd.f32 %v3769_v49, %v2830_v48 }
0x1a66   : > { %v4316_v27 = vpop.f32.mrf.mxu1 }
0x1a67   : > { %v2831_v53 = vadd.f32 %v2827_v57, %v5354_v17  ;;  %v2842_v14 = vmax.f32 %v2840_v52, 0.0  ;;  %v3778_v57 = vld [vmem:[%s4736_s19 + $0x15] ss:$0 sm:$0xff] }
0x1a69   : > { %v2841_v54 = vadd.f32 %v3769_v49, %v2831_v53  ;;  %v3099_v53 = vadd.f32 %v3778_v57, %v4738_v6 }
0x1a6b   : > { %v2843_v18 = vmax.f32 %v2841_v54, 0.0 }
0x1a6d   : > { %v2844_v15 = vpack.c.bf16 %v2843_v18, %v2842_v14  ;;  %v3101_v14 = vmax.f32 %v3099_v53, 0.0 }
0x1a6f   : > { %4322 = vmatmul.mubr.msk.bf16.vlgmr.msra.gmra.mxu0 %vm407_vm1, %v2844_v15 }
0x1a70   : > { %4334 = vmatpush3.bf16.msra.mxu0 %v5283_v58  ;;  %4337 = vmatprep.mubr.msk.bf16.mxu0 %vm4596_vm0, %v4595_v2 }
0x1a71   : > { %4335 = vmatprep.subr.bf16.mxu0 %v4595_v2 }
0x1a74   : > { %4336 = vmatpush3.bf16.msra.mxu0 %v5292_v37 }
0x1a75   : > { %4349 = vmatprep.subr.bf16.mxu0 %v4595_v2 }
0x1b2f   : > { %v2882_v62 = vpop.f32.mrf.mxu0 }
0x1b30   : > { %v2883_v17 = vadd.f32 %v5299_v38, %v2882_v62 }
0x1b31   : > { %v4323_v51 = vpop.f32.mrf.mxu0 }
0x1b32   : > { %v2889_v0 = vmax.f32 %v2883_v17, 0.0 }
0x1b33   : > { %v2885_v16 = vpop.f32.mrf.mxu0 }
0x1b34   : > { %v2886_v43 = vadd.f32 %v5299_v38, %v2885_v16 }
0x1b35   : > { %v4324_v63 = vpop.f32.mrf.mxu0 }
0x1b36   : > { %v2890_v3 = vmax.f32 %v2886_v43, 0.0 }
0x1b38   : > { %v2891_v44 = vpack.c.bf16 %v2890_v3, %v2889_v0 }
0x1b3a   : > { %4330 = vmatmul.mubr.msk.bf16.vlgmr.msra.gmra.mxu1 %vm407_vm1, %v2891_v44 }
0x1b3b   : > { %4342 = vmatpush3.bf16.msra.mxu1 %v5307_v7  ;;  %4345 = vmatprep.mubr.msk.bf16.mxu1 %vm4596_vm0, %v4595_v2 }
0x1b3c   : > { %4343 = vmatprep.subr.bf16.mxu1 %v4595_v2 }
0x1b3f   : > { %4344 = vmatpush3.bf16.msra.mxu1 %v5316_v10 }
0x1b40   : > { %4357 = vmatprep.subr.bf16.mxu1 %v4595_v2 }
0x1bfa   : > { %v2929_v12 = vpop.f32.mrf.mxu1 }
0x1bfb   : > { %v2930_v19 = vadd.f32 %v5323_v11, %v2929_v12 }
0x1bfc   : > { %v4331_v20 = vpop.f32.mrf.mxu1 }
0x1bfd   : > { %v2936_v21 = vadd.f32 %v2930_v19, %v2840_v52  ;;  %v5431_v52 = vadd.f32 %v3778_v57, %v4742_v9 }
0x1bfe   : > { %v2932_v23 = vpop.f32.mrf.mxu1 }
0x1bff   : > { %v2933_v28 = vadd.f32 %v5323_v11, %v2932_v23  ;;  %v2946_v30 = vadd.f32 %v3773_v22, %v2936_v21 }
0x1c00   : > { %v4332_v31 = vpop.f32.mrf.mxu1 }
0x1c01   : > { %v2937_v36 = vadd.f32 %v2933_v28, %v2841_v54  ;;  %v2948_v35 = vmax.f32 %v2946_v30, 0.0  ;;  %v3102_v54 = vmax.f32 %v5431_v52, 0.0 }
0x1c03   : > { %v2947_v32 = vadd.f32 %v3773_v22, %v2937_v36  ;;  %v3103_v18 = vpack.c.bf16 %v3102_v54, %v3101_v14 }
0x1c05   : > { %v2949_v56 = vmax.f32 %v2947_v32, 0.0 }
0x1c07   : > { %v2950_v40 = vpack.c.bf16 %v2949_v56, %v2948_v35 }
0x1c09   : > { %4338 = vmatmul.mubr.msk.bf16.vlgmr.msra.gmra.mxu0 %vm407_vm1, %v2950_v40 }
0x1c0a   : > { %4350 = vmatpush3.bf16.msra.mxu0 %v5332_v45  ;;  %4353 = vmatprep.mubr.msk.bf16.mxu0 %vm4596_vm0, %v4595_v2 }
0x1c0b   : > { %4351 = vmatprep.subr.bf16.mxu0 %v4595_v2 }
0x1c0e   : > { %4352 = vmatpush3.bf16.msra.mxu0 %v5341_v34 }
0x1c0f   : > { %4365 = vmatprep.subr.bf16.mxu0 %v4595_v2 }
0x1cc9   : > { %v2988_v25 = vpop.f32.mrf.mxu0 }
0x1cca   : > { %v2989_v13 = vadd.f32 %v5348_v41, %v2988_v25 }
0x1ccb   : > { %v4339_v42 = vpop.f32.mrf.mxu0 }
0x1ccc   : > { %v2995_v49 = vmax.f32 %v2989_v13, 0.0 }
0x1ccd   : > { %v2991_v26 = vpop.f32.mrf.mxu0 }
0x1cce   : > { %v2992_v47 = vadd.f32 %v5348_v41, %v2991_v26 }
0x1ccf   : > { %v4340_v48 = vpop.f32.mrf.mxu0 }
0x1cd0   : > { %v2996_v50 = vmax.f32 %v2992_v47, 0.0 }
0x1cd2   : > { %v2997_v27 = vpack.c.bf16 %v2996_v50, %v2995_v49 }
0x1cd4   : > { %4346 = vmatmul.mubr.msk.bf16.vlgmr.msra.gmra.mxu1 %vm407_vm1, %v2997_v27 }
0x1cd5   : > { %4358 = vmatpush3.bf16.msra.mxu1 %v5118_v33  ;;  %4361 = vmatprep.mubr.msk.bf16.mxu1 %vm4596_vm0, %v4595_v2 }
0x1cd6   : > { %4359 = vmatprep.subr.bf16.mxu1 %v4595_v2 }
0x1cd9   : > { %4360 = vmatpush3.bf16.msra.mxu1 %v5128_v1 }
0x1cda   : > { %4373 = vmatprep.subr.bf16.mxu1 %v4595_v2 }
0x1cdc   : > { %4362 = vmatmul.mubr.msk.bf16.vlgmr.msra.gmra.mxu1 %vm407_vm1, %v3103_v18 }
0x1cdd   : > { %4374 = vmatpush3.bf16.msra.mxu1 %v5211_v60  ;;  %4377 = vmatprep.mubr.msk.bf16.mxu1 %vm4596_vm0, %v4595_v2 }
0x1cde   : > { %4375 = vmatprep.subr.bf16.mxu1 %v4595_v2 }
0x1ce1   : > { %4376 = vmatpush3.bf16.msra.mxu1 %v5220_v61 }
0x1ce2   : > { %4389 = vmatprep.subr.bf16.mxu1 %v4595_v2 }
0x1d94   : > { %v3035_v6 = vpop.f32.mrf.mxu1 }
0x1d95   : > { %v3036_v9 = vadd.f32 %v5375_v59, %v3035_v6  ;;  %v3786_v6 = vld [vmem:[%s4736_s19 + $0x17] ss:$0 sm:$0xff] }
0x1d96   : > { %v4347_v33 = vpop.f32.mrf.mxu1 }
0x1d97   : > { %v3042_v15 = vadd.f32 %v3036_v9, %v2946_v30 }
0x1d98   : > { %v3038_v1 = vpop.f32.mrf.mxu1 }
0x1d99   : > { %v3039_v62 = vadd.f32 %v5375_v59, %v3038_v1  ;;  %v3044_v16 = vmax.f32 %v3042_v15, 0.0 }
0x1d9a   : > { %v4348_v51 = vpop.f32.mrf.mxu1 }
0x1d9b   : > { %v3043_v17 = vadd.f32 %v3039_v62, %v2947_v32  ;;  %v3782_v32 = vld [vmem:[%s4736_s19 + $0x16] ss:$0 sm:$0xff]  ;;  %s4603_s19 = smov 112  }
0x1d9c   : > { %v3141_v60 = vpop.f32.mrf.mxu1 }
0x1d9d   : > { %v3045_v43 = vmax.f32 %v3043_v17, 0.0  ;;  %v3142_v61 = vadd.f32 %v5229_v24, %v3141_v60 }
0x1d9e   : > { %v4363_v63 = vpop.f32.mrf.mxu1 }
0x1d9f   : > { %v3046_v0 = vpack.c.bf16 %v3045_v43, %v3044_v16  ;;  %v3148_v20 = vmax.f32 %v3142_v61, 0.0 }
0x1da0   : > { %v3144_v3 = vpop.f32.mrf.mxu1 }
0x1da1   : > { %v3145_v44 = vadd.f32 %v5229_v24, %v3144_v3  ;;  %4354 = vmatmul.mubr.msk.bf16.vlgmr.msra.gmra.mxu0 %vm407_vm1, %v3046_v0 }
0x1da2   : > { %4366 = vmatpush3.bf16.msra.mxu0 %v5237_v39  ;;  %v4364_v12 = vpop.f32.mrf.mxu1  ;;  %4369 = vmatprep.mubr.msk.bf16.mxu0 %vm4596_vm0, %v4595_v2  ;;  %v5470_v39 = vld [vmem:[%s5593_s7] ss:$0 sm:$0xff] }
0x1da3   : > { %v3149_v19 = vmax.f32 %v3145_v44, 0.0  ;;  %4367 = vmatprep.subr.bf16.mxu0 %v4595_v2 }
0x1da5   : > { %v3150_v21 = vpack.c.bf16 %v3149_v19, %v3148_v20 }
0x1da6   : > { %4368 = vmatpush3.bf16.msra.mxu0 %v5246_v29 }
0x1da7   : > { %4381 = vmatprep.subr.bf16.mxu0 %v4595_v2 }
0x1da9   : > { %4370 = vmatmul.mubr.msk.bf16.vlgmr.msra.gmra.mxu0 %vm407_vm1, %v3150_v21 }
0x1daa   : > { %4382 = vmatpush3.bf16.msra.mxu0 %v5254_v55  ;;  %4385 = vmatprep.mubr.msk.bf16.mxu0 %vm4596_vm0, %v4595_v2 }
0x1dab   : > { %4383 = vmatprep.subr.bf16.mxu0 %v4595_v2 }
0x1dae   : > { %4384 = vmatpush3.bf16.msra.mxu0 %v5263_v5 }
0x1daf   : > { %4397 = vmatprep.subr.bf16.mxu0 %v4595_v2 }
0x1e61   : > { %v3084_v24 = vpop.f32.mrf.mxu0 }
0x1e62   : > { %v3085_v29 = vadd.f32 %v5470_v39, %v3084_v24 }
0x1e63   : > { %v4355_v22 = vpop.f32.mrf.mxu0 }
0x1e64   : > { %3498 = vrot.lane.b32.xlu0 %v3085_v29, %s4602_s12 }
0x1e65   : > { %v3087_v55 = vpop.f32.mrf.mxu0 }
0x1e66   : > { %v3088_v23 = vadd.f32 %v5470_v39, %v3087_v55 }
0x1e67   : > { %v4356_v28 = vpop.f32.mrf.mxu0 }
0x1e68   : > { %3500 = vrot.lane.b32.xlu1 %v3088_v23, %s4602_s12  ;;  %s4520_s12 = sshll.u32 %s4604_s11, 4  ;;  %s4521_s12 = int_to_ptr.vmem [resolvable:$false] %s4520_s12 }
0x1e69   : > { %v3188_v5 = vpop.f32.mrf.mxu0  ;;  %p4523_p2 = scmp.lt.s32.totalorder %s5530_s21, %s4521_s12 }
0x1e6a   : > { %v3189_v31 = vadd.f32 %v5272_v46, %v3188_v5 }
0x1e6b   : > { %v4371_v30 = vpop.f32.mrf.mxu0 }
0x1e6c   : > { %v3195_v36 = vadd.f32 %v3189_v31, %v3099_v53 }
0x1e6d   : > { %v3191_v35 = vpop.f32.mrf.mxu0 }
0x1e6e   : > { %v3192_v56 = vadd.f32 %v5272_v46, %v3191_v35  ;;  %v3205_v25 = vadd.f32 %v3782_v32, %v3195_v36 }
0x1e6f   : > { %v4372_v40 = vpop.f32.mrf.mxu0 }
0x1e70   : > { %v3196_v42 = vadd.f32 %v3192_v56, %v5431_v52  ;;  %v3207_v26 = vmax.f32 %v3205_v25, 0.0 }
0x1e72   : > { %v3206_v13 = vadd.f32 %v3782_v32, %v3196_v42  ;;  %v3467_v32 = vpop.permute.xlu0 %3466 }
0x1e74   : > { %v3208_v47 = vmax.f32 %v3206_v13, 0.0 }
0x1e76   : > { %v3209_v48 = vpack.c.bf16 %v3208_v47, %v3207_v26  ;;  %v3475_v56 = vpop.permute.xlu0 %3474  ;;  %v895_v26 = vadd.f32 %v5470_v39, %v4924_v4 }
0x1e78   : > { %4378 = vmatmul.mubr.msk.bf16.vlgmr.msra.gmra.mxu1 %vm407_vm1, %v3209_v48 }
0x1e79   : > { %4390 = vmatpush3.bf16.msra.mxu1 %v5283_v58  ;;  %4393 = vmatprep.mubr.msk.bf16.mxu1 %vm4596_vm0, %v4595_v2 }
0x1e7a   : > { %4391 = vmatprep.subr.bf16.mxu1 %v4595_v2 }
0x1e7d   : > { %4392 = vmatpush3.bf16.msra.mxu1 %v5292_v37 }
0x1e7e   : > { %4405 = vmatprep.subr.bf16.mxu1 %v4595_v2 }
0x1f38   : > { %v3247_v46 = vpop.f32.mrf.mxu1 }
0x1f39   : > { %v3248_v50 = vadd.f32 %v5299_v38, %v3247_v46 }
0x1f3a   : > { %v4379_v49 = vpop.f32.mrf.mxu1 }
0x1f3b   : > { %v3254_v53 = vmax.f32 %v3248_v50, 0.0  ;;  %v898_v50 = vadd.f32 %v5470_v39, %v4926_v8 }
0x1f3c   : > { %v3250_v57 = vpop.f32.mrf.mxu1 }
0x1f3d   : > { %v3251_v27 = vadd.f32 %v5299_v38, %v3250_v57 }
0x1f3e   : > { %v4380_v52 = vpop.f32.mrf.mxu1 }
0x1f3f   : > { %v3255_v58 = vmax.f32 %v3251_v27, 0.0 }
0x1f41   : > { %v3256_v54 = vpack.c.bf16 %v3255_v58, %v3254_v53 }
0x1f43   : > { %4386 = vmatmul.mubr.msk.bf16.vlgmr.msra.gmra.mxu0 %vm407_vm1, %v3256_v54 }
0x1f44   : > { %4398 = vmatpush3.bf16.msra.mxu0 %v5307_v7  ;;  %4401 = vmatprep.mubr.msk.bf16.mxu0 %vm4596_vm0, %v4595_v2 }
0x1f45   : > { %4399 = vmatprep.subr.bf16.mxu0 %v4595_v2 }
0x1f48   : > { %4400 = vmatpush3.bf16.msra.mxu0 %v5316_v10 }
0x2003   : > { %v3294_v37 = vpop.f32.mrf.mxu0 }
0x2004   : > { %v3295_v14 = vadd.f32 %v5323_v11, %v3294_v37 }
0x2005   : > { %v4387_v18 = vpop.f32.mrf.mxu0 }
0x2006   : > { %v3301_v38 = vadd.f32 %v3295_v14, %v3205_v25  ;;  %v3483_v25 = vpop.permute.xlu0 %3482 }
0x2007   : > { %v3297_v9 = vpop.f32.mrf.mxu0 }
0x2008   : > { %v3298_v33 = vadd.f32 %v5323_v11, %v3297_v9  ;;  %v3311_v15 = vadd.f32 %v3786_v6, %v3301_v38 }
0x2009   : > { %v4388_v1 = vpop.f32.mrf.mxu0 }
0x200a   : > { %v3302_v62 = vadd.f32 %v3298_v33, %v3206_v13  ;;  %v3313_v51 = vmax.f32 %v3311_v15, 0.0  ;;  %v3491_v13 = vpop.permute.xlu0 %3490 }
0x200c   : > { %v3312_v7 = vadd.f32 %v3786_v6, %v3302_v62 }
0x200e   : > { %v3314_v17 = vmax.f32 %v3312_v7, 0.0  ;;  %v3499_v49 = vpop.permute.xlu0 %3498 }
0x2010   : > { %v3315_v60 = vpack.c.bf16 %v3314_v17, %v3313_v51 }
0x2012   : > { %4394 = vmatmul.mubr.msk.bf16.vlgmr.msra.gmra.mxu1 %vm407_vm1, %v3315_v60 }
0x2013   : > { %4406 = vmatpush3.bf16.msra.mxu1 %v5332_v45  ;;  %4409 = vmatprep.mubr.msk.bf16.mxu1 %vm4596_vm0, %v4595_v2 }
0x2014   : > { %4407 = vmatprep.subr.bf16.mxu1 %v4595_v2 }
0x2017   : > { %4408 = vmatpush3.bf16.msra.mxu1 %v5341_v34 }
0x20d2   : > { %v3353_v10 = vpop.f32.mrf.mxu1 }
0x20d3   : > { %v3354_v16 = vadd.f32 %v5348_v41, %v3353_v10 }
0x20d4   : > { %v4395_v11 = vpop.f32.mrf.mxu1 }
0x20d5   : > { %v3360_v3 = vmax.f32 %v3354_v16, 0.0 }
0x20d6   : > { %v3356_v43 = vpop.f32.mrf.mxu1 }
0x20d7   : > { %v3357_v63 = vadd.f32 %v5348_v41, %v3356_v43 }
0x20d8   : > { %v4396_v0 = vpop.f32.mrf.mxu1 }
0x20d9   : > { %v3361_v61 = vmax.f32 %v3357_v63, 0.0 }
0x20db   : > { %v3362_v44 = vpack.c.bf16 %v3361_v61, %v3360_v3 }
0x20dd   : > { %4402 = vmatmul.mubr.msk.bf16.vlgmr.msra.gmra.mxu0 %vm407_vm1, %v3362_v44 }
0x219d   : > { %v3400_v45 = vpop.f32.mrf.mxu0 }
0x219e   : > { %v3401_v12 = vadd.f32 %v5375_v59, %v3400_v45 }
0x219f   : > { %v4403_v19 = vpop.f32.mrf.mxu0 }
0x21a0   : > { %v3407_v20 = vadd.f32 %v3401_v12, %v3311_v15 }
0x21a1   : > { %v3403_v2 = vpop.f32.mrf.mxu0 }
0x21a2   : > { %v3404_v34 = vadd.f32 %v5375_v59, %v3403_v2  ;;  %v3409_v29 = vmax.f32 %v3407_v20, 0.0  ;;  %v3459_v59 = vpop.permute.xlu1 %3458 }
0x21a3   : > { %v4404_v21 = vpop.f32.mrf.mxu0  ;;  %v3513_v47 = vsel %vm3512_vm2, %v895_v26, %v3459_v59 }
0x21a4   : > { %v3408_v24 = vadd.f32 %v3404_v34, %v3312_v7  ;;  %v3515_v48 = vsel %vm407_vm1, %v3513_v47, %v3467_v32 }
0x21a5   : > { %v3518_v57 = vsel %vm3517_vm3, %v3515_v48, %v3475_v56 }
0x21a6   : > { %v3410_v22 = vmax.f32 %v3408_v24, 0.0  ;;  %v3461_v36 = vpop.permute.xlu1 %3460  ;;  %v3521_v4 = vsel %vm3520_vm4, %v3518_v57, %v3483_v25 }
0x21a7   : > { %v3514_v27 = vsel %vm3512_vm2, %v898_v50, %v3461_v36  ;;  %v3524_v52 = vsel %vm3523_vm5, %v3521_v4, %v3491_v13 }
0x21a8   : > { %v3411_v55 = vpack.c.bf16 %v3410_v22, %v3409_v29  ;;  %v3527_v58 = vsel %vm3526_vm6, %v3524_v52, %v3499_v49 }
0x21aa   : > { %4410 = vmatmul.mubr.msk.bf16.vlgmr.msra.gmra.mxu1 %vm407_vm1, %v3411_v55  ;;  %v3469_v35 = vpop.permute.xlu1 %3468 }
0x21ab   : > { %v3516_v53 = vsel %vm407_vm1, %v3514_v27, %v3469_v35 }
0x21ae   : > { %v3477_v40 = vpop.permute.xlu1 %3476 }
0x21af   : > { %v3519_v8 = vsel %vm3517_vm3, %v3516_v53, %v3477_v40 }
0x21b2   : > { %v3485_v42 = vpop.permute.xlu1 %3484 }
0x21b3   : > { %v3522_v14 = vsel %vm3520_vm4, %v3519_v8, %v3485_v42 }
0x21b6   : > { %v3493_v46 = vpop.permute.xlu1 %3492 }
0x21b7   : > { %v3525_v18 = vsel %vm3523_vm5, %v3522_v14, %v3493_v46 }
0x21ba   : > { %v3501_v54 = vpop.permute.xlu1 %3500 }
0x21bb   : > { %v3528_v38 = vsel %vm3526_vm6, %v3525_v18, %v3501_v54 }
0x226a   : > { %v3449_v41 = vpop.f32.mrf.mxu1 }
0x226b   : > { %v3450_v23 = vadd.f32 %v5470_v39, %v3449_v41 }
0x226c   : > { %v4411_v28 = vpop.f32.mrf.mxu1 }
0x226d   : > { %3506 = vrot.lane.b32.xlu0 %v3450_v23, %s4603_s19 }
0x226e   : > { %v3452_v5 = vpop.f32.mrf.mxu1 }
0x226f   : > { %v3453_v31 = vadd.f32 %v5470_v39, %v3452_v5 }
0x2270   : > { %v4412_v30 = vpop.f32.mrf.mxu1 }
0x2271   : > { %3508 = vrot.lane.b32.xlu1 %v3453_v31, %s4603_s19  ;;  %s4522_s19 = scalar_lea.vmem %s4521_s12, 512 }
0x2272   : > { %p4524_p3 = scmp.lt.s32.totalorder %s4522_s19, %s4516_s26 }
0x2274   : > { %p4525_p5 = por %p4524_p3, %p4523_p2 }
0x2276   : > { %p4526_p6 = pnand %p4525_p5, %p4519_p1 }
0x22df   : > { %v3507_v37 = vpop.permute.xlu0 %3506 }
0x22e0   : > { %v3530_v39 = vsel %vm3529_vm7, %v3527_v58, %v3507_v37 }
0x22e1   : > { %3532 = vst [vmem:[%s337_s20] sm:$0xff] %v3530_v39 }
0x22e3   : > { %v3509_v6 = vpop.permute.xlu1 %3508 }
0x22e4   : > { %v3531_v9 = vsel %vm3529_vm7, %v3528_v38, %v3509_v6 }
0x22e5   : > { %3533 = vst [vmem:[%s337_s20 + $0x8] sm:$0xff] %v3531_v9 }
0x22e6   : > { %4529 = shalt.err (!%p4526_p6)
}
0x22e7   : > { %s4530_s14 = scalar_lea.hbm %s5536_s25, 256  ;;  %s4534_s22 = scalar_lea.hbm %s5594_s8, 512 }
0x22e8   : > { %p4531_p7 = scmp.ne.s32.totalorder %s5536_s25, %s4530_s14  ;;  %p4535_p11 = scmp.lt.s32.totalorder %s5536_s25, %s5594_s8 }
0x22e9   : > { %p4536_p12 = scmp.lt.s32.totalorder %s4534_s22, %s4530_s14 }
0x22ea   : > { %p4532_p9 = pnand %p4531_p7, %p4692_p4 }
0x22eb   : > { %p4537_p13 = por %p4536_p12, %p4535_p11 }
0x22ec   : > { %p4533_p10 = pneg %p4532_p9 }
0x22ee   : > { %p4538_p0 = pnand %p4537_p13, %p4533_p10 }
0x22f0   : > { %4541 = shalt.err (!%p4538_p0)
}
0x22f1   : > { %s4605_s26 = smov 128   ;;  %s4606_s11 = smov 8  }
0x22f2   : > { %4413 = dma.vmem_to_hbm [thread:$0]  (%p4692_p4), %s5530_s21, 256, %s5536_s25, %s5541_s30, %s4605_s26, %s4605_s26, %s4606_s11  }
0x22f3 PF: > { %p4419_p1 = scmp.ge.s32.totalorder %s4592_s10, 2  ;;  %s3565_s12 = sand.u32 1, %s4572_s27  }
0x22f4   : > { %s3566_s19 = scalar_lea.sflag [#allocation3], %s3565_s12 }
0x22f5   : > { %p4416_p2 = pnand %p4419_p1, %p4699_p8 }
0x22f7   : > { %p4417_p3 = pneg %p4416_p2 }
0x22f9   : > { %4567 = dma.done.wait (%p4417_p3), %s3566_s19, 256  }
0x22fa   : > { %4569 = vsyncadd (%p4417_p3), %s3566_s19, 4294967040  ;;  %s21_s10 = sadd.s32 1, %s4592_s10   ;;  %s5597_s27 = smov %s4576_s28 }
0x22fb   : > { %p18_p5 = scmp.ge.s32.totalorder %s21_s10, 4   ;;  %s5598_s28 = smov %s4580_s29 }
0x22fc   : > { %s5599_s29 = smov %s4705_s18  ;;  %s5600_s30 = smov %s4588_s9 }
0x22fd   : > { %s5601_s9 = smov %s5603_s13  ;;  %20 = sbr.rel (!%p18_p5) target bundleno = 4 (0x4), region = 121 }
0x2302   :  { %3571 = vsyncpa [#allocation3], 1 }
0x2303   :  { %3573 = vsyncpa [#allocation3 + $0x1], 1 }

</bundles_post_ra>
